<compile_context>
chip_gen: v7x
topology: tpu7x:2x2x1
jax: 0.10.0
libtpu: 0.0.40
codegen_flags: <defaults>
</compile_context>

<pallas_src>
import math
import functools

import jax
import jax.numpy as jnp
from jax.experimental import pallas as pl
from jax.experimental.pallas import tpu as pltpu


def _layer_norm(v, g, b, eps=1e-5):
    v = v.astype(jnp.float32)
    mu = jnp.mean(v, axis=-1, keepdims=True)
    var = jnp.mean((v - mu) ** 2, axis=-1, keepdims=True)
    return (v - mu) * jax.lax.rsqrt(var + eps) * g.astype(jnp.float32) + b.astype(jnp.float32)


def decoder_layer_kernel(x_ref, enc_ref,
                         sa_wqkv_ref, sa_bqkv_ref, sa_wo_ref, sa_bo_ref,
                         ca_wq_ref, ca_bq_ref, ca_wkv_ref, ca_bkv_ref,
                         ca_wo_ref, ca_bo_ref,
                         w1_ref, b1_ref, w2_ref, b2_ref,
                         g1_ref, be1_ref, g2_ref, be2_ref, g3_ref, be3_ref,
                         out_ref, attn_buf,
                         *, n_heads, kv_block, ff_block, exp_dtype, approx_recip):
    Bb, L, E = x_ref.shape
    S = enc_ref.shape[1]
    H = n_heads
    dh = E // H
    dt = x_ref.dtype          # MXU input dtype follows the caller (f32 or bf16)
    f32 = jnp.float32
    M = Bb * L

    # 2-D slabs: projections / FFN / LayerNorm operate on (Bb*L, E).
    x = x_ref[...].reshape(M, E)
    enc = enc_ref[...].reshape(Bb * S, E)

    def attention(q2d, k2d, v2d, n_kv, wo_ref, bo_ref):
        # q2d: (M, E) with the 1/sqrt(dh) scale already folded into Wq/bq.
        q3 = q2d.reshape(Bb, L, E)
        k3 = k2d.reshape(Bb, n_kv, E)
        v3 = v2d.reshape(Bb, n_kv, E)
        # Static head loop (dynamic lane-offset slicing under fori_loop would
        # force relayouts); each head's score/prob temporaries are dead once
        # its normalised output is stored into the VMEM scratch, so at most one
        # head's (Bb, L, kv_chunk) f32 tensors are live at a time.
        for h in range(H):
            sl = slice(h * dh, (h + 1) * dh)
            qh = q3[:, :, sl]
            if n_kv <= kv_block:
                # Single-chunk fast path: full softmax, deferred normalisation.
                s = jnp.einsum('bld,bsd->bls', qh, k3[:, :, sl],
                               preferred_element_type=f32)
                s = s - jnp.max(s, axis=-1, keepdims=True)
                p = jnp.exp(s.astype(exp_dtype))
                denom = jnp.sum(p.astype(f32), axis=-1, keepdims=True)
                o_h = jnp.einsum('bls,bsd->bld', p.astype(dt), v3[:, :, sl],
                                 preferred_element_type=f32)
            else:
                # Flash-style online softmax over KV chunks: bounds the score
                # tensor to (Bb, L, kv_block) and keeps it out of HBM/VMEM slabs.
                m_run = jnp.full((Bb, L, 1), -jnp.inf, f32)
                l_run = jnp.zeros((Bb, L, 1), f32)
                acc = jnp.zeros((Bb, L, dh), f32)
                for lo in range(0, n_kv, kv_block):
                    hi = min(lo + kv_block, n_kv)
                    s = jnp.einsum('bld,bsd->bls', qh, k3[:, lo:hi, sl],
                                   preferred_element_type=f32)
                    m_new = jnp.maximum(m_run, jnp.max(s, axis=-1, keepdims=True))
                    alpha = jnp.exp(m_run - m_new)
                    p = jnp.exp((s - m_new).astype(exp_dtype))
                    l_run = alpha * l_run + jnp.sum(p.astype(f32), axis=-1, keepdims=True)
                    acc = alpha * acc + jnp.einsum('bls,bsd->bld', p.astype(dt),
                                                   v3[:, lo:hi, sl],
                                                   preferred_element_type=f32)
                    m_run = m_new
                denom = l_run
                o_h = acc
            # Deferred softmax normalisation on the small (L, dh) result
            # (reciprocal uses the otherwise-idle EUP slot when approx=True).
            o_h = o_h * pl.reciprocal(denom, approx=approx_recip)
            attn_buf[:, sl] = o_h.reshape(M, dh).astype(attn_buf.dtype)
        # Single full-depth (M, E) @ (E, E) output projection: fills the 256-deep
        # MXU on v6e/v7x and removes the per-head partial-sum accumulation.
        return jnp.dot(attn_buf[...], wo_ref[...], preferred_element_type=f32) + bo_ref[0]

    # ---- self attention + residual + norm1 (dropout == identity in eval) ----
    qkv = (jnp.dot(x, sa_wqkv_ref[...], preferred_element_type=f32)
           + sa_bqkv_ref[0]).astype(dt)                              # fused (M, 3E) QKV
    sa = attention(qkv[:, :E], qkv[:, E:2 * E], qkv[:, 2 * E:], L, sa_wo_ref, sa_bo_ref)
    x1 = _layer_norm(x.astype(f32) + sa, g1_ref[0], be1_ref[0]).astype(dt)

    # ---- cross attention + residual + norm2 ----
    q_c = (jnp.dot(x1, ca_wq_ref[...], preferred_element_type=f32)
           + ca_bq_ref[0]).astype(dt)                                # (M, E)
    kv = (jnp.dot(enc, ca_wkv_ref[...], preferred_element_type=f32)
          + ca_bkv_ref[0]).astype(dt)                                # fused (Ms, 2E) KV
    ca = attention(q_c, kv[:, :E], kv[:, E:], S, ca_wo_ref, ca_bo_ref)
    x2 = _layer_norm(x1.astype(f32) + ca, g2_ref[0], be2_ref[0]).astype(dt)

    # ---- FFN (chunked over FF when large) + residual + norm3 ----
    FF = w1_ref.shape[1]
    if FF <= ff_block:
        h1 = jnp.maximum(jnp.dot(x2, w1_ref[...], preferred_element_type=f32)
                         + b1_ref[0], 0.0).astype(dt)
        ff = jnp.dot(h1, w2_ref[...], preferred_element_type=f32)
    else:
        ff = jnp.zeros((M, E), f32)
        for lo in range(0, FF, ff_block):
            hi = min(lo + ff_block, FF)
            h1 = jnp.maximum(jnp.dot(x2, w1_ref[:, lo:hi], preferred_element_type=f32)
                             + b1_ref[:, lo:hi], 0.0).astype(dt)
            ff = ff + jnp.dot(h1, w2_ref[lo:hi, :], preferred_element_type=f32)
    ff = ff + b2_ref[0]
    y = _layer_norm(x2.astype(f32) + ff, g3_ref[0], be3_ref[0])

    out_ref[...] = y.reshape(Bb, L, E).astype(out_ref.dtype)


def _prepare_params(params, n_heads, dtype):
    """One-time host-side weight prep: transpose, fuse QKV/KV, fold softmax scale.

    Matmul weights are cast to the input dtype (MXU operand dtype); biases and
    LayerNorm gamma/beta stay f32 (they only feed f32 accumulation / statistics).
    """
    (sa_w, sa_b, sa_ow, sa_ob, ca_w, ca_b, ca_ow, ca_ob,
     w1, b1, w2, b2, g1, be1, g2, be2, g3, be3) = params
    E = sa_ow.shape[0]
    dh = E // n_heads
    scale = 1.0 / math.sqrt(dh)
    f32 = jnp.float32

    sa_wqkv = jnp.concatenate([sa_w[:E].T * scale, sa_w[E:].T], axis=1).astype(dtype)      # (E, 3E)
    sa_bqkv = jnp.concatenate([sa_b[:E] * scale, sa_b[E:]]).reshape(1, 3 * E).astype(f32)  # (1, 3E)
    ca_wq = (ca_w[:E].T * scale).astype(dtype)                                             # (E, E)
    ca_bq = (ca_b[:E] * scale).reshape(1, E).astype(f32)                                   # (1, E)
    ca_wkv = ca_w[E:].T.astype(dtype)                                                      # (E, 2E)
    ca_bkv = ca_b[E:].reshape(1, 2 * E).astype(f32)                                        # (1, 2E)

    return [
        sa_wqkv, sa_bqkv, sa_ow.T.astype(dtype), sa_ob.reshape(1, E).astype(f32),
        ca_wq, ca_bq, ca_wkv, ca_bkv, ca_ow.T.astype(dtype), ca_ob.reshape(1, E).astype(f32),
        w1.T.astype(dtype), b1.reshape(1, -1).astype(f32),
        w2.T.astype(dtype), b2.reshape(1, E).astype(f32),
        g1.reshape(1, E).astype(f32), be1.reshape(1, E).astype(f32),
        g2.reshape(1, E).astype(f32), be2.reshape(1, E).astype(f32),
        g3.reshape(1, E).astype(f32), be3.reshape(1, E).astype(f32),
    ]


def _vmem_limit_bytes():
    """Explicit scoped-VMEM limit sized per generation (leave DMA/headroom)."""
    try:
        cap = int(pltpu.get_tpu_info().vmem_capacity_bytes)
    except Exception:
        cap = 64 * 1024 * 1024  # conservative fallback (safe on every generation)
    return max(32 * 1024 * 1024, cap - 16 * 1024 * 1024)


def _choose_batch_block(B, L, S, E, FF, itemsize, vmem_limit, kv_block, ff_block):
    """Largest batch fold that still leaves >= min(B,4) grid steps and fits VMEM."""
    weight_bytes = (3 * E * E + 5 * E * E + 2 * E * FF) * itemsize + (7 * E + FF + 6 * E) * 4

    def act_bytes(Bb):
        M, Ms = Bb * L, Bb * S
        b = 2 * (M * E + Ms * E + M * E) * itemsize         # x / enc / out tiles (double-buffered)
        b += (M * 3 * E + Ms * 2 * E) * itemsize            # qkv / kv slabs
        b += M * E * itemsize                               # attention VMEM scratch
        b += 2 * Bb * L * min(kv_block, max(S, L)) * 4      # one head's scores + probs (f32)
        b += M * min(ff_block, FF) * itemsize + M * E * 4   # ffn chunk + f32 accumulator
        b += 6 * M * E * 4                                  # LayerNorm / residual temporaries (slack)
        return b

    budget = int(vmem_limit * 0.75) - weight_bytes
    min_steps = min(B, 4)
    best = 1
    for cand in range(1, B + 1):
        if B % cand:
            continue
        if B // cand < min_steps:
            continue
        if act_bytes(cand) <= budget:
            best = max(best, cand)
    return best


def _weight_spec(shape, single_buffer):
    ndim = len(shape)
    idx = lambda i, _n=ndim: (0,) * _n     # grid-invariant: fetched once, not per step
    if single_buffer:
        try:
            # Weights never change across the grid -> a single buffer halves their
            # resident VMEM footprint (biggest relative win on v7x's 64 MiB).
            return pl.BlockSpec(shape, idx, pipeline_mode=pl.Buffered(1))
        except Exception:
            pass
    return pl.BlockSpec(shape, idx)


def _cost_estimate(B, L, S, E, FF, H, itemsize):
    M, Ms = B * L, B * S
    flops = 2 * M * E * 3 * E            # self QKV projection
    flops += 4 * B * L * L * E           # self-attn scores + PV
    flops += 2 * M * E * E               # self-attn out projection
    flops += 2 * M * E * E               # cross Q projection
    flops += 2 * Ms * E * 2 * E          # cross KV projection
    flops += 4 * B * L * S * E           # cross-attn scores + PV
    flops += 2 * M * E * E               # cross-attn out projection
    flops += 4 * M * E * FF              # FFN
    transcendentals = B * H * L * (L + S) + 3 * M
    weight_bytes = (8 * E * E + 2 * E * FF) * itemsize
    bytes_accessed = (M * E + Ms * E + M * E) * itemsize + weight_bytes
    return pl.CostEstimate(flops=int(flops), transcendentals=int(transcendentals),
                           bytes_accessed=int(bytes_accessed))


def decoder_layer(x, enc_output, params, n_heads, *,
                  batch_block=None, kv_block=512, ff_block=2048):
    """Batch-first decoder layer.  x: (B, L, E), enc_output: (B, S, E) -> (B, L, E)."""
    B, L, E = x.shape
    S = enc_output.shape[1]
    assert E % n_heads == 0, "d_model must be divisible by n_heads"
    FF = params[8].shape[0]
    dt = x.dtype
    itemsize = jnp.dtype(dt).itemsize

    vmem_limit = _vmem_limit_bytes()
    if batch_block is None:
        batch_block = _choose_batch_block(B, L, S, E, FF, itemsize, vmem_limit,
                                          kv_block, ff_block)
    if B % batch_block != 0:
        raise ValueError(f"batch_block={batch_block} must evenly divide batch size B={B}")
    n_blocks = B // batch_block

    prepared = _prepare_params(params, n_heads, dt)

    # bf16 exp only when inputs are bf16 (v6e/v7x EUP win); exact reciprocal and
    # f32 exp for f32 callers so numerics track the PyTorch layer.
    exp_dtype = jnp.bfloat16 if dt == jnp.bfloat16 else jnp.float32
    approx_recip = dt == jnp.bfloat16

    kernel = functools.partial(decoder_layer_kernel, n_heads=n_heads,
                               kv_block=kv_block, ff_block=ff_block,
                               exp_dtype=exp_dtype, approx_recip=approx_recip)
    cost = _cost_estimate(B, L, S, E, FF, n_heads, itemsize)

    def run(single_buffer_weights):
        weight_specs = [_weight_spec(p.shape, single_buffer_weights) for p in prepared]
        in_specs = ([pl.BlockSpec((batch_block, L, E), lambda i: (i, 0, 0)),
                     pl.BlockSpec((batch_block, S, E), lambda i: (i, 0, 0))]
                    + weight_specs)
        return pl.pallas_call(
            kernel,
            out_shape=jax.ShapeDtypeStruct((B, L, E), dt),
            grid=(n_blocks,),
            in_specs=in_specs,
            out_specs=pl.BlockSpec((batch_block, L, E), lambda i: (i, 0, 0)),
            scratch_shapes=[pltpu.VMEM((batch_block * L, E), dt)],
            compiler_params=pltpu.CompilerParams(
                dimension_semantics=("parallel",),
                vmem_limit_bytes=vmem_limit),
            cost_estimate=cost,
        )(x, enc_output, *prepared)

    try:
        return run(single_buffer_weights=True)
    except Exception:
        # Fallback for environments where pipeline_mode=pl.Buffered(1) is not
        # supported: default double-buffered (but still grid-invariant) weights.
        return run(single_buffer_weights=False)


def decoder_layer_seq_first(x, enc_output, params, n_heads):
    """Convenience wrapper for the PyTorch (seq, batch, embed) convention."""
    out = decoder_layer(jnp.transpose(x, (1, 0, 2)),
                        jnp.transpose(enc_output, (1, 0, 2)), params, n_heads)
    return jnp.transpose(out, (1, 0, 2))


# ------------------------- pure-JAX reference (batch-first) -------------------------
def _ref_mha(q_in, kv_in, w, b, ow, ob, n_heads):
    B, L, E = q_in.shape
    S = kv_in.shape[1]
    dh = E // n_heads
    q = q_in @ w[0:E].T + b[0:E]
    k = kv_in @ w[E:2 * E].T + b[E:2 * E]
    v = kv_in @ w[2 * E:].T + b[2 * E:]
    q = q.reshape(B, L, n_heads, dh).transpose(0, 2, 1, 3)
    k = k.reshape(B, S, n_heads, dh).transpose(0, 2, 1, 3)
    v = v.reshape(B, S, n_heads, dh).transpose(0, 2, 1, 3)
    s = jnp.einsum('bhld,bhsd->bhls', q, k) / math.sqrt(dh)
    p = jax.nn.softmax(s, axis=-1)
    o = jnp.einsum('bhls,bhsd->bhld', p, v).transpose(0, 2, 1, 3).reshape(B, L, E)
    return o @ ow.T + ob


def _ref_decoder_layer(x, enc, P, n_heads):
    (sa_w, sa_b, sa_ow, sa_ob, ca_w, ca_b, ca_ow, ca_ob,
     w1, b1, w2, b2, g1, be1, g2, be2, g3, be3) = P
    sa = _ref_mha(x, x, sa_w, sa_b, sa_ow, sa_ob, n_heads)
    x1 = _layer_norm(x + sa, g1, be1)
    ca = _ref_mha(x1, enc, ca_w, ca_b, ca_ow, ca_ob, n_heads)
    x2 = _layer_norm(x1 + ca, g2, be2)
    f = jnp.maximum(x2 @ w1.T + b1, 0.0) @ w2.T + b2
    return _layer_norm(x2 + f, g3, be3)


if __name__ == "__main__":
    L, S, B, E, H, FF = 8, 12, 2, 32, 4, 64

    key = jax.random.PRNGKey(0)
    keys = jax.random.split(key, 22)

    def init(k, shape, s=0.1):
        return jax.random.normal(k, shape, jnp.float32) * s

    params = [
        init(keys[0], (3 * E, E)), init(keys[1], (3 * E,)),            # self-attn in_proj
        init(keys[2], (E, E)),     init(keys[3], (E,)),                # self-attn out_proj
        init(keys[4], (3 * E, E)), init(keys[5], (3 * E,)),            # cross-attn in_proj
        init(keys[6], (E, E)),     init(keys[7], (E,)),                # cross-attn out_proj
        init(keys[8], (FF, E)),    init(keys[9], (FF,)),               # ffn linear1
        init(keys[10], (E, FF)),   init(keys[11], (E,)),               # ffn linear2
        1.0 + init(keys[12], (E,), 0.05), init(keys[13], (E,), 0.05),  # norm1
        1.0 + init(keys[14], (E,), 0.05), init(keys[15], (E,), 0.05),  # norm2
        1.0 + init(keys[16], (E,), 0.05), init(keys[17], (E,), 0.05),  # norm3
    ]

    # Batch-first inputs (no wrapper HBM transposes on the fast path).
    x = jax.random.normal(keys[20], (B, L, E), jnp.float32)
    enc = jax.random.normal(keys[21], (B, S, E), jnp.float32)

    out = decoder_layer(x, enc, params, H)
    out = jax.block_until_ready(out)

    ref = _ref_decoder_layer(x, enc, params, H)
    assert out.shape == (B, L, E)
    err = float(jnp.max(jnp.abs(out - ref)))
    assert jnp.allclose(out, ref, atol=5e-3, rtol=5e-3), err

    print("KERNEL_OK")
</pallas_src>

<mosaic_0001>
module attributes {stable_mosaic.version = 11 : i64} {
  func.func @decoder_layer_kernel(%arg0: i32, %arg1: memref<1x8x32xf32, #tpu.memory_space<vmem>>, %arg2: memref<1x12x32xf32, #tpu.memory_space<vmem>>, %arg3: memref<32x96xf32, #tpu.memory_space<vmem>>, %arg4: memref<1x96xf32, #tpu.memory_space<vmem>>, %arg5: memref<32x32xf32, #tpu.memory_space<vmem>>, %arg6: memref<1x32xf32, #tpu.memory_space<vmem>>, %arg7: memref<32x32xf32, #tpu.memory_space<vmem>>, %arg8: memref<1x32xf32, #tpu.memory_space<vmem>>, %arg9: memref<32x64xf32, #tpu.memory_space<vmem>>, %arg10: memref<1x64xf32, #tpu.memory_space<vmem>>, %arg11: memref<32x32xf32, #tpu.memory_space<vmem>>, %arg12: memref<1x32xf32, #tpu.memory_space<vmem>>, %arg13: memref<32x64xf32, #tpu.memory_space<vmem>>, %arg14: memref<1x64xf32, #tpu.memory_space<vmem>>, %arg15: memref<64x32xf32, #tpu.memory_space<vmem>>, %arg16: memref<1x32xf32, #tpu.memory_space<vmem>>, %arg17: memref<1x32xf32, #tpu.memory_space<vmem>>, %arg18: memref<1x32xf32, #tpu.memory_space<vmem>>, %arg19: memref<1x32xf32, #tpu.memory_space<vmem>>, %arg20: memref<1x32xf32, #tpu.memory_space<vmem>>, %arg21: memref<1x32xf32, #tpu.memory_space<vmem>>, %arg22: memref<1x32xf32, #tpu.memory_space<vmem>>, %arg23: memref<1x8x32xf32, #tpu.memory_space<vmem>>, %arg24: memref<8x32xf32, #tpu.memory_space<vmem>>) attributes {dimension_semantics = [#tpu.dimension_semantics<parallel>], iteration_bounds = array<i64: 2>, scalar_prefetch = 0 : i64, scratch_operands = 1 : i64, tpu.core_type = #tpu.core_type<tc>, window_params = [{transform_indices = @transform_0, window_bounds = array<i64: 1, 8, 32>}, {transform_indices = @transform_1, window_bounds = array<i64: 1, 12, 32>}, {pipeline_mode = #tpu.pipeline_mode<synchronous>, transform_indices = @transform_2, window_bounds = array<i64: 32, 96>}, {pipeline_mode = #tpu.pipeline_mode<synchronous>, transform_indices = @transform_3, window_bounds = array<i64: 1, 96>}, {pipeline_mode = #tpu.pipeline_mode<synchronous>, transform_indices = @transform_4, window_bounds = array<i64: 32, 32>}, {pipeline_mode = #tpu.pipeline_mode<synchronous>, transform_indices = @transform_5, window_bounds = array<i64: 1, 32>}, {pipeline_mode = #tpu.pipeline_mode<synchronous>, transform_indices = @transform_6, window_bounds = array<i64: 32, 32>}, {pipeline_mode = #tpu.pipeline_mode<synchronous>, transform_indices = @transform_7, window_bounds = array<i64: 1, 32>}, {pipeline_mode = #tpu.pipeline_mode<synchronous>, transform_indices = @transform_8, window_bounds = array<i64: 32, 64>}, {pipeline_mode = #tpu.pipeline_mode<synchronous>, transform_indices = @transform_9, window_bounds = array<i64: 1, 64>}, {pipeline_mode = #tpu.pipeline_mode<synchronous>, transform_indices = @transform_10, window_bounds = array<i64: 32, 32>}, {pipeline_mode = #tpu.pipeline_mode<synchronous>, transform_indices = @transform_11, window_bounds = array<i64: 1, 32>}, {pipeline_mode = #tpu.pipeline_mode<synchronous>, transform_indices = @transform_12, window_bounds = array<i64: 32, 64>}, {pipeline_mode = #tpu.pipeline_mode<synchronous>, transform_indices = @transform_13, window_bounds = array<i64: 1, 64>}, {pipeline_mode = #tpu.pipeline_mode<synchronous>, transform_indices = @transform_14, window_bounds = array<i64: 64, 32>}, {pipeline_mode = #tpu.pipeline_mode<synchronous>, transform_indices = @transform_15, window_bounds = array<i64: 1, 32>}, {pipeline_mode = #tpu.pipeline_mode<synchronous>, transform_indices = @transform_16, window_bounds = array<i64: 1, 32>}, {pipeline_mode = #tpu.pipeline_mode<synchronous>, transform_indices = @transform_17, window_bounds = array<i64: 1, 32>}, {pipeline_mode = #tpu.pipeline_mode<synchronous>, transform_indices = @transform_18, window_bounds = array<i64: 1, 32>}, {pipeline_mode = #tpu.pipeline_mode<synchronous>, transform_indices = @transform_19, window_bounds = array<i64: 1, 32>}, {pipeline_mode = #tpu.pipeline_mode<synchronous>, transform_indices = @transform_20, window_bounds = array<i64: 1, 32>}, {pipeline_mode = #tpu.pipeline_mode<synchronous>, transform_indices = @transform_21, window_bounds = array<i64: 1, 32>}, {transform_indices = @transform_22, window_bounds = array<i64: 1, 8, 32>}]} {
    %c0 = arith.constant 0 : index
    %c0_0 = arith.constant 0 : index
    %c0_1 = arith.constant 0 : index
    %0 = vector.load %arg1[%c0, %c0_0, %c0_1] : memref<1x8x32xf32, #tpu.memory_space<vmem>>, vector<1x8x32xf32>
    %1 = vector.shape_cast %0 : vector<1x8x32xf32> to vector<8x32xf32>
    %c0_2 = arith.constant 0 : index
    %c0_3 = arith.constant 0 : index
    %c0_4 = arith.constant 0 : index
    %2 = vector.load %arg2[%c0_2, %c0_3, %c0_4] : memref<1x12x32xf32, #tpu.memory_space<vmem>>, vector<1x12x32xf32>
    %3 = vector.shape_cast %2 : vector<1x12x32xf32> to vector<12x32xf32>
    %c0_5 = arith.constant 0 : index
    %c0_6 = arith.constant 0 : index
    %4 = vector.load %arg3[%c0_5, %c0_6] : memref<32x96xf32, #tpu.memory_space<vmem>>, vector<32x96xf32>
    %cst = arith.constant dense<0.000000e+00> : vector<8x96xf32>
    %5 = tpu.matmul %1, %4, %cst {dimension_numbers = #tpu.dot_dimension_numbers<[1], [0], [0], [1], [0, 0, 1, 1], [], []>} : vector<8x32xf32>, vector<32x96xf32>, vector<8x96xf32> -> vector<8x96xf32>
    %c0_7 = arith.constant 0 : index
    %c0_8 = arith.constant 0 : index
    %6 = vector.load %arg4[%c0_7, %c0_8] : memref<1x96xf32, #tpu.memory_space<vmem>>, vector<1x96xf32>
    %7 = vector.shape_cast %6 : vector<1x96xf32> to vector<96xf32>
    %8 = vector.shape_cast %7 : vector<96xf32> to vector<1x96xf32>
    %9 = vector.broadcast %8 : vector<1x96xf32> to vector<8x96xf32>
    %10 = arith.addf %5, %9 : vector<8x96xf32>
    %11 = vector.extract_strided_slice %10 {offsets = [0, 0], sizes = [8, 32], strides = [1, 1]} : vector<8x96xf32> to vector<8x32xf32>
    %12 = vector.extract_strided_slice %10 {offsets = [0, 32], sizes = [8, 32], strides = [1, 1]} : vector<8x96xf32> to vector<8x32xf32>
    %13 = vector.extract_strided_slice %10 {offsets = [0, 64], sizes = [8, 32], strides = [1, 1]} : vector<8x96xf32> to vector<8x32xf32>
    %14 = vector.shape_cast %11 : vector<8x32xf32> to vector<1x8x32xf32>
    %15 = vector.shape_cast %12 : vector<8x32xf32> to vector<1x8x32xf32>
    %16 = vector.shape_cast %13 : vector<8x32xf32> to vector<1x8x32xf32>
    %17 = vector.extract_strided_slice %14 {offsets = [0, 0, 0], sizes = [1, 8, 8], strides = [1, 1, 1]} : vector<1x8x32xf32> to vector<1x8x8xf32>
    %18 = vector.extract_strided_slice %15 {offsets = [0, 0, 0], sizes = [1, 8, 8], strides = [1, 1, 1]} : vector<1x8x32xf32> to vector<1x8x8xf32>
    "tpu.trace_start"() <{level = 10 : i32, message = "bld,bsd->bls"}> : () -> ()
    %cst_9 = arith.constant dense<0.000000e+00> : vector<1x8x8xf32>
    %19 = tpu.matmul %17, %18, %cst_9 {dimension_numbers = #tpu.dot_dimension_numbers<[2], [2], [1], [1], [0, 0, 0, 1, 1, 1], [0], [0]>} : vector<1x8x8xf32>, vector<1x8x8xf32>, vector<1x8x8xf32> -> vector<1x8x8xf32>
    "tpu.trace_stop"() : () -> ()
    %cst_10 = arith.constant dense<0xFF800000> : vector<1x8xf32>
    %20 = vector.multi_reduction <maximumf>, %19, %cst_10 [2] : vector<1x8x8xf32> to vector<1x8xf32>
    %21 = vector.shape_cast %20 : vector<1x8xf32> to vector<1x8x1xf32>
    %22 = vector.broadcast %21 : vector<1x8x1xf32> to vector<1x8x8xf32>
    %23 = arith.subf %19, %22 : vector<1x8x8xf32>
    %24 = math.exp %23 : vector<1x8x8xf32>
    %cst_11 = arith.constant dense<0.000000e+00> : vector<1x8xf32>
    %25 = vector.multi_reduction <add>, %24, %cst_11 [2] : vector<1x8x8xf32> to vector<1x8xf32>
    %26 = vector.shape_cast %25 : vector<1x8xf32> to vector<1x8x1xf32>
    %27 = vector.extract_strided_slice %16 {offsets = [0, 0, 0], sizes = [1, 8, 8], strides = [1, 1, 1]} : vector<1x8x32xf32> to vector<1x8x8xf32>
    "tpu.trace_start"() <{level = 10 : i32, message = "bls,bsd->bld"}> : () -> ()
    %cst_12 = arith.constant dense<0.000000e+00> : vector<1x8x8xf32>
    %28 = tpu.matmul %24, %27, %cst_12 {dimension_numbers = #tpu.dot_dimension_numbers<[2], [1], [1], [2], [0, 0, 0, 1, 1, 2], [0], [0]>} : vector<1x8x8xf32>, vector<1x8x8xf32>, vector<1x8x8xf32> -> vector<1x8x8xf32>
    "tpu.trace_stop"() : () -> ()
    %29 = tpu.reciprocal %26 : vector<1x8x1xf32> -> vector<1x8x1xf32>
    %30 = vector.broadcast %29 : vector<1x8x1xf32> to vector<1x8x8xf32>
    %31 = arith.mulf %28, %30 : vector<1x8x8xf32>
    %32 = vector.shape_cast %31 : vector<1x8x8xf32> to vector<8x8xf32>
    %c0_13 = arith.constant 0 : index
    %c0_14 = arith.constant 0 : index
    %33 = vector.load %arg24[%c0_13, %c0_14] : memref<8x32xf32, #tpu.memory_space<vmem>>, vector<8x8xf32>
    tpu.vector_store %arg24[%c0_13, %c0_14], %32 {strides = array<i32>} : memref<8x32xf32, #tpu.memory_space<vmem>>, vector<8x8xf32>,
    %34 = vector.extract_strided_slice %14 {offsets = [0, 0, 8], sizes = [1, 8, 8], strides = [1, 1, 1]} : vector<1x8x32xf32> to vector<1x8x8xf32>
    %35 = vector.extract_strided_slice %15 {offsets = [0, 0, 8], sizes = [1, 8, 8], strides = [1, 1, 1]} : vector<1x8x32xf32> to vector<1x8x8xf32>
    "tpu.trace_start"() <{level = 10 : i32, message = "bld,bsd->bls"}> : () -> ()
    %cst_15 = arith.constant dense<0.000000e+00> : vector<1x8x8xf32>
    %36 = tpu.matmul %34, %35, %cst_15 {dimension_numbers = #tpu.dot_dimension_numbers<[2], [2], [1], [1], [0, 0, 0, 1, 1, 1], [0], [0]>} : vector<1x8x8xf32>, vector<1x8x8xf32>, vector<1x8x8xf32> -> vector<1x8x8xf32>
    "tpu.trace_stop"() : () -> ()
    %cst_16 = arith.constant dense<0xFF800000> : vector<1x8xf32>
    %37 = vector.multi_reduction <maximumf>, %36, %cst_16 [2] : vector<1x8x8xf32> to vector<1x8xf32>
    %38 = vector.shape_cast %37 : vector<1x8xf32> to vector<1x8x1xf32>
    %39 = vector.broadcast %38 : vector<1x8x1xf32> to vector<1x8x8xf32>
    %40 = arith.subf %36, %39 : vector<1x8x8xf32>
    %41 = math.exp %40 : vector<1x8x8xf32>
    %cst_17 = arith.constant dense<0.000000e+00> : vector<1x8xf32>
    %42 = vector.multi_reduction <add>, %41, %cst_17 [2] : vector<1x8x8xf32> to vector<1x8xf32>
    %43 = vector.shape_cast %42 : vector<1x8xf32> to vector<1x8x1xf32>
    %44 = vector.extract_strided_slice %16 {offsets = [0, 0, 8], sizes = [1, 8, 8], strides = [1, 1, 1]} : vector<1x8x32xf32> to vector<1x8x8xf32>
    "tpu.trace_start"() <{level = 10 : i32, message = "bls,bsd->bld"}> : () -> ()
    %cst_18 = arith.constant dense<0.000000e+00> : vector<1x8x8xf32>
    %45 = tpu.matmul %41, %44, %cst_18 {dimension_numbers = #tpu.dot_dimension_numbers<[2], [1], [1], [2], [0, 0, 0, 1, 1, 2], [0], [0]>} : vector<1x8x8xf32>, vector<1x8x8xf32>, vector<1x8x8xf32> -> vector<1x8x8xf32>
    "tpu.trace_stop"() : () -> ()
    %46 = tpu.reciprocal %43 : vector<1x8x1xf32> -> vector<1x8x1xf32>
    %47 = vector.broadcast %46 : vector<1x8x1xf32> to vector<1x8x8xf32>
    %48 = arith.mulf %45, %47 : vector<1x8x8xf32>
    %49 = vector.shape_cast %48 : vector<1x8x8xf32> to vector<8x8xf32>
    %c0_19 = arith.constant 0 : index
    %c8 = arith.constant 8 : index
    %50 = vector.load %arg24[%c0_19, %c8] : memref<8x32xf32, #tpu.memory_space<vmem>>, vector<8x8xf32>
    tpu.vector_store %arg24[%c0_19, %c8], %49 {strides = array<i32>} : memref<8x32xf32, #tpu.memory_space<vmem>>, vector<8x8xf32>,
    %51 = vector.extract_strided_slice %14 {offsets = [0, 0, 16], sizes = [1, 8, 8], strides = [1, 1, 1]} : vector<1x8x32xf32> to vector<1x8x8xf32>
    %52 = vector.extract_strided_slice %15 {offsets = [0, 0, 16], sizes = [1, 8, 8], strides = [1, 1, 1]} : vector<1x8x32xf32> to vector<1x8x8xf32>
    "tpu.trace_start"() <{level = 10 : i32, message = "bld,bsd->bls"}> : () -> ()
    %cst_20 = arith.constant dense<0.000000e+00> : vector<1x8x8xf32>
    %53 = tpu.matmul %51, %52, %cst_20 {dimension_numbers = #tpu.dot_dimension_numbers<[2], [2], [1], [1], [0, 0, 0, 1, 1, 1], [0], [0]>} : vector<1x8x8xf32>, vector<1x8x8xf32>, vector<1x8x8xf32> -> vector<1x8x8xf32>
    "tpu.trace_stop"() : () -> ()
    %cst_21 = arith.constant dense<0xFF800000> : vector<1x8xf32>
    %54 = vector.multi_reduction <maximumf>, %53, %cst_21 [2] : vector<1x8x8xf32> to vector<1x8xf32>
    %55 = vector.shape_cast %54 : vector<1x8xf32> to vector<1x8x1xf32>
    %56 = vector.broadcast %55 : vector<1x8x1xf32> to vector<1x8x8xf32>
    %57 = arith.subf %53, %56 : vector<1x8x8xf32>
    %58 = math.exp %57 : vector<1x8x8xf32>
    %cst_22 = arith.constant dense<0.000000e+00> : vector<1x8xf32>
    %59 = vector.multi_reduction <add>, %58, %cst_22 [2] : vector<1x8x8xf32> to vector<1x8xf32>
    %60 = vector.shape_cast %59 : vector<1x8xf32> to vector<1x8x1xf32>
    %61 = vector.extract_strided_slice %16 {offsets = [0, 0, 16], sizes = [1, 8, 8], strides = [1, 1, 1]} : vector<1x8x32xf32> to vector<1x8x8xf32>
    "tpu.trace_start"() <{level = 10 : i32, message = "bls,bsd->bld"}> : () -> ()
    %cst_23 = arith.constant dense<0.000000e+00> : vector<1x8x8xf32>
    %62 = tpu.matmul %58, %61, %cst_23 {dimension_numbers = #tpu.dot_dimension_numbers<[2], [1], [1], [2], [0, 0, 0, 1, 1, 2], [0], [0]>} : vector<1x8x8xf32>, vector<1x8x8xf32>, vector<1x8x8xf32> -> vector<1x8x8xf32>
    "tpu.trace_stop"() : () -> ()
    %63 = tpu.reciprocal %60 : vector<1x8x1xf32> -> vector<1x8x1xf32>
    %64 = vector.broadcast %63 : vector<1x8x1xf32> to vector<1x8x8xf32>
    %65 = arith.mulf %62, %64 : vector<1x8x8xf32>
    %66 = vector.shape_cast %65 : vector<1x8x8xf32> to vector<8x8xf32>
    %c0_24 = arith.constant 0 : index
    %c16 = arith.constant 16 : index
    %67 = vector.load %arg24[%c0_24, %c16] : memref<8x32xf32, #tpu.memory_space<vmem>>, vector<8x8xf32>
    tpu.vector_store %arg24[%c0_24, %c16], %66 {strides = array<i32>} : memref<8x32xf32, #tpu.memory_space<vmem>>, vector<8x8xf32>,
    %68 = vector.extract_strided_slice %14 {offsets = [0, 0, 24], sizes = [1, 8, 8], strides = [1, 1, 1]} : vector<1x8x32xf32> to vector<1x8x8xf32>
    %69 = vector.extract_strided_slice %15 {offsets = [0, 0, 24], sizes = [1, 8, 8], strides = [1, 1, 1]} : vector<1x8x32xf32> to vector<1x8x8xf32>
    "tpu.trace_start"() <{level = 10 : i32, message = "bld,bsd->bls"}> : () -> ()
    %cst_25 = arith.constant dense<0.000000e+00> : vector<1x8x8xf32>
    %70 = tpu.matmul %68, %69, %cst_25 {dimension_numbers = #tpu.dot_dimension_numbers<[2], [2], [1], [1], [0, 0, 0, 1, 1, 1], [0], [0]>} : vector<1x8x8xf32>, vector<1x8x8xf32>, vector<1x8x8xf32> -> vector<1x8x8xf32>
    "tpu.trace_stop"() : () -> ()
    %cst_26 = arith.constant dense<0xFF800000> : vector<1x8xf32>
    %71 = vector.multi_reduction <maximumf>, %70, %cst_26 [2] : vector<1x8x8xf32> to vector<1x8xf32>
    %72 = vector.shape_cast %71 : vector<1x8xf32> to vector<1x8x1xf32>
    %73 = vector.broadcast %72 : vector<1x8x1xf32> to vector<1x8x8xf32>
    %74 = arith.subf %70, %73 : vector<1x8x8xf32>
    %75 = math.exp %74 : vector<1x8x8xf32>
    %cst_27 = arith.constant dense<0.000000e+00> : vector<1x8xf32>
    %76 = vector.multi_reduction <add>, %75, %cst_27 [2] : vector<1x8x8xf32> to vector<1x8xf32>
    %77 = vector.shape_cast %76 : vector<1x8xf32> to vector<1x8x1xf32>
    %78 = vector.extract_strided_slice %16 {offsets = [0, 0, 24], sizes = [1, 8, 8], strides = [1, 1, 1]} : vector<1x8x32xf32> to vector<1x8x8xf32>
    "tpu.trace_start"() <{level = 10 : i32, message = "bls,bsd->bld"}> : () -> ()
    %cst_28 = arith.constant dense<0.000000e+00> : vector<1x8x8xf32>
    %79 = tpu.matmul %75, %78, %cst_28 {dimension_numbers = #tpu.dot_dimension_numbers<[2], [1], [1], [2], [0, 0, 0, 1, 1, 2], [0], [0]>} : vector<1x8x8xf32>, vector<1x8x8xf32>, vector<1x8x8xf32> -> vector<1x8x8xf32>
    "tpu.trace_stop"() : () -> ()
    %80 = tpu.reciprocal %77 : vector<1x8x1xf32> -> vector<1x8x1xf32>
    %81 = vector.broadcast %80 : vector<1x8x1xf32> to vector<1x8x8xf32>
    %82 = arith.mulf %79, %81 : vector<1x8x8xf32>
    %83 = vector.shape_cast %82 : vector<1x8x8xf32> to vector<8x8xf32>
    %c0_29 = arith.constant 0 : index
    %c24 = arith.constant 24 : index
    %84 = vector.load %arg24[%c0_29, %c24] : memref<8x32xf32, #tpu.memory_space<vmem>>, vector<8x8xf32>
    tpu.vector_store %arg24[%c0_29, %c24], %83 {strides = array<i32>} : memref<8x32xf32, #tpu.memory_space<vmem>>, vector<8x8xf32>,
    %c0_30 = arith.constant 0 : index
    %c0_31 = arith.constant 0 : index
    %85 = vector.load %arg24[%c0_30, %c0_31] : memref<8x32xf32, #tpu.memory_space<vmem>>, vector<8x32xf32>
    %c0_32 = arith.constant 0 : index
    %c0_33 = arith.constant 0 : index
    %86 = vector.load %arg5[%c0_32, %c0_33] : memref<32x32xf32, #tpu.memory_space<vmem>>, vector<32x32xf32>
    %cst_34 = arith.constant dense<0.000000e+00> : vector<8x32xf32>
    %87 = tpu.matmul %85, %86, %cst_34 {dimension_numbers = #tpu.dot_dimension_numbers<[1], [0], [0], [1], [0, 0, 1, 1], [], []>} : vector<8x32xf32>, vector<32x32xf32>, vector<8x32xf32> -> vector<8x32xf32>
    %c0_35 = arith.constant 0 : index
    %c0_36 = arith.constant 0 : index
    %88 = vector.load %arg6[%c0_35, %c0_36] : memref<1x32xf32, #tpu.memory_space<vmem>>, vector<1x32xf32>
    %89 = vector.shape_cast %88 : vector<1x32xf32> to vector<32xf32>
    %90 = vector.shape_cast %89 : vector<32xf32> to vector<1x32xf32>
    %91 = vector.broadcast %90 : vector<1x32xf32> to vector<8x32xf32>
    %92 = arith.addf %87, %91 : vector<8x32xf32>
    %93 = arith.addf %1, %92 : vector<8x32xf32>
    %c0_37 = arith.constant 0 : index
    %c0_38 = arith.constant 0 : index
    %94 = vector.load %arg17[%c0_37, %c0_38] : memref<1x32xf32, #tpu.memory_space<vmem>>, vector<1x32xf32>
    %95 = vector.shape_cast %94 : vector<1x32xf32> to vector<32xf32>
    %c0_39 = arith.constant 0 : index
    %c0_40 = arith.constant 0 : index
    %96 = vector.load %arg18[%c0_39, %c0_40] : memref<1x32xf32, #tpu.memory_space<vmem>>, vector<1x32xf32>
    %97 = vector.shape_cast %96 : vector<1x32xf32> to vector<32xf32>
    %cst_41 = arith.constant dense<0.000000e+00> : vector<8xf32>
    %98 = vector.multi_reduction <add>, %93, %cst_41 [1] : vector<8x32xf32> to vector<8xf32>
    %99 = vector.shape_cast %98 : vector<8xf32> to vector<8x1xf32>
    %cst_42 = arith.constant 3.200000e+01 : f32
    %100 = vector.broadcast %cst_42 : f32 to vector<8x1xf32>
    %101 = arith.divf %99, %100 : vector<8x1xf32>
    %102 = vector.broadcast %101 : vector<8x1xf32> to vector<8x32xf32>
    %103 = arith.subf %93, %102 : vector<8x32xf32>
    %104 = arith.mulf %103, %103 : vector<8x32xf32>
    %cst_43 = arith.constant dense<0.000000e+00> : vector<8xf32>
    %105 = vector.multi_reduction <add>, %104, %cst_43 [1] : vector<8x32xf32> to vector<8xf32>
    %106 = vector.shape_cast %105 : vector<8xf32> to vector<8x1xf32>
    %cst_44 = arith.constant 3.200000e+01 : f32
    %107 = vector.broadcast %cst_44 : f32 to vector<8x1xf32>
    %108 = arith.divf %106, %107 : vector<8x1xf32>
    %109 = vector.broadcast %101 : vector<8x1xf32> to vector<8x32xf32>
    %110 = arith.subf %93, %109 : vector<8x32xf32>
    %cst_45 = arith.constant 9.99999974E-6 : f32
    %111 = vector.broadcast %cst_45 : f32 to vector<8x1xf32>
    %112 = arith.addf %108, %111 : vector<8x1xf32>
    %113 = math.rsqrt %112 : vector<8x1xf32>
    %114 = vector.broadcast %113 : vector<8x1xf32> to vector<8x32xf32>
    %115 = arith.mulf %110, %114 : vector<8x32xf32>
    %116 = vector.shape_cast %95 : vector<32xf32> to vector<1x32xf32>
    %117 = vector.broadcast %116 : vector<1x32xf32> to vector<8x32xf32>
    %118 = arith.mulf %115, %117 : vector<8x32xf32>
    %119 = vector.shape_cast %97 : vector<32xf32> to vector<1x32xf32>
    %120 = vector.broadcast %119 : vector<1x32xf32> to vector<8x32xf32>
    %121 = arith.addf %118, %120 : vector<8x32xf32>
    %c0_46 = arith.constant 0 : index
    %c0_47 = arith.constant 0 : index
    %122 = vector.load %arg7[%c0_46, %c0_47] : memref<32x32xf32, #tpu.memory_space<vmem>>, vector<32x32xf32>
    %cst_48 = arith.constant dense<0.000000e+00> : vector<8x32xf32>
    %123 = tpu.matmul %121, %122, %cst_48 {dimension_numbers = #tpu.dot_dimension_numbers<[1], [0], [0], [1], [0, 0, 1, 1], [], []>} : vector<8x32xf32>, vector<32x32xf32>, vector<8x32xf32> -> vector<8x32xf32>
    %c0_49 = arith.constant 0 : index
    %c0_50 = arith.constant 0 : index
    %124 = vector.load %arg8[%c0_49, %c0_50] : memref<1x32xf32, #tpu.memory_space<vmem>>, vector<1x32xf32>
    %125 = vector.shape_cast %124 : vector<1x32xf32> to vector<32xf32>
    %126 = vector.shape_cast %125 : vector<32xf32> to vector<1x32xf32>
    %127 = vector.broadcast %126 : vector<1x32xf32> to vector<8x32xf32>
    %128 = arith.addf %123, %127 : vector<8x32xf32>
    %c0_51 = arith.constant 0 : index
    %c0_52 = arith.constant 0 : index
    %129 = vector.load %arg9[%c0_51, %c0_52] : memref<32x64xf32, #tpu.memory_space<vmem>>, vector<32x64xf32>
    %cst_53 = arith.constant dense<0.000000e+00> : vector<12x64xf32>
    %130 = tpu.matmul %3, %129, %cst_53 {dimension_numbers = #tpu.dot_dimension_numbers<[1], [0], [0], [1], [0, 0, 1, 1], [], []>} : vector<12x32xf32>, vector<32x64xf32>, vector<12x64xf32> -> vector<12x64xf32>
    %c0_54 = arith.constant 0 : index
    %c0_55 = arith.constant 0 : index
    %131 = vector.load %arg10[%c0_54, %c0_55] : memref<1x64xf32, #tpu.memory_space<vmem>>, vector<1x64xf32>
    %132 = vector.shape_cast %131 : vector<1x64xf32> to vector<64xf32>
    %133 = vector.shape_cast %132 : vector<64xf32> to vector<1x64xf32>
    %134 = vector.broadcast %133 : vector<1x64xf32> to vector<12x64xf32>
    %135 = arith.addf %130, %134 : vector<12x64xf32>
    %136 = vector.extract_strided_slice %135 {offsets = [0, 0], sizes = [12, 32], strides = [1, 1]} : vector<12x64xf32> to vector<12x32xf32>
    %137 = vector.extract_strided_slice %135 {offsets = [0, 32], sizes = [12, 32], strides = [1, 1]} : vector<12x64xf32> to vector<12x32xf32>
    %138 = vector.shape_cast %128 : vector<8x32xf32> to vector<1x8x32xf32>
    %139 = vector.shape_cast %136 : vector<12x32xf32> to vector<1x12x32xf32>
    %140 = vector.shape_cast %137 : vector<12x32xf32> to vector<1x12x32xf32>
    %141 = vector.extract_strided_slice %138 {offsets = [0, 0, 0], sizes = [1, 8, 8], strides = [1, 1, 1]} : vector<1x8x32xf32> to vector<1x8x8xf32>
    %142 = vector.extract_strided_slice %139 {offsets = [0, 0, 0], sizes = [1, 12, 8], strides = [1, 1, 1]} : vector<1x12x32xf32> to vector<1x12x8xf32>
    "tpu.trace_start"() <{level = 10 : i32, message = "bld,bsd->bls"}> : () -> ()
    %cst_56 = arith.constant dense<0.000000e+00> : vector<1x8x12xf32>
    %143 = tpu.matmul %141, %142, %cst_56 {dimension_numbers = #tpu.dot_dimension_numbers<[2], [2], [1], [1], [0, 0, 0, 1, 1, 1], [0], [0]>} : vector<1x8x8xf32>, vector<1x12x8xf32>, vector<1x8x12xf32> -> vector<1x8x12xf32>
    "tpu.trace_stop"() : () -> ()
    %cst_57 = arith.constant dense<0xFF800000> : vector<1x8xf32>
    %144 = vector.multi_reduction <maximumf>, %143, %cst_57 [2] : vector<1x8x12xf32> to vector<1x8xf32>
    %145 = vector.shape_cast %144 : vector<1x8xf32> to vector<1x8x1xf32>
    %146 = vector.broadcast %145 : vector<1x8x1xf32> to vector<1x8x12xf32>
    %147 = arith.subf %143, %146 : vector<1x8x12xf32>
    %148 = math.exp %147 : vector<1x8x12xf32>
    %cst_58 = arith.constant dense<0.000000e+00> : vector<1x8xf32>
    %149 = vector.multi_reduction <add>, %148, %cst_58 [2] : vector<1x8x12xf32> to vector<1x8xf32>
    %150 = vector.shape_cast %149 : vector<1x8xf32> to vector<1x8x1xf32>
    %151 = vector.extract_strided_slice %140 {offsets = [0, 0, 0], sizes = [1, 12, 8], strides = [1, 1, 1]} : vector<1x12x32xf32> to vector<1x12x8xf32>
    "tpu.trace_start"() <{level = 10 : i32, message = "bls,bsd->bld"}> : () -> ()
    %cst_59 = arith.constant dense<0.000000e+00> : vector<1x8x8xf32>
    %152 = tpu.matmul %148, %151, %cst_59 {dimension_numbers = #tpu.dot_dimension_numbers<[2], [1], [1], [2], [0, 0, 0, 1, 1, 2], [0], [0]>} : vector<1x8x12xf32>, vector<1x12x8xf32>, vector<1x8x8xf32> -> vector<1x8x8xf32>
    "tpu.trace_stop"() : () -> ()
    %153 = tpu.reciprocal %150 : vector<1x8x1xf32> -> vector<1x8x1xf32>
    %154 = vector.broadcast %153 : vector<1x8x1xf32> to vector<1x8x8xf32>
    %155 = arith.mulf %152, %154 : vector<1x8x8xf32>
    %156 = vector.shape_cast %155 : vector<1x8x8xf32> to vector<8x8xf32>
    %c0_60 = arith.constant 0 : index
    %c0_61 = arith.constant 0 : index
    %157 = vector.load %arg24[%c0_60, %c0_61] : memref<8x32xf32, #tpu.memory_space<vmem>>, vector<8x8xf32>
    tpu.vector_store %arg24[%c0_60, %c0_61], %156 {strides = array<i32>} : memref<8x32xf32, #tpu.memory_space<vmem>>, vector<8x8xf32>,
    %158 = vector.extract_strided_slice %138 {offsets = [0, 0, 8], sizes = [1, 8, 8], strides = [1, 1, 1]} : vector<1x8x32xf32> to vector<1x8x8xf32>
    %159 = vector.extract_strided_slice %139 {offsets = [0, 0, 8], sizes = [1, 12, 8], strides = [1, 1, 1]} : vector<1x12x32xf32> to vector<1x12x8xf32>
    "tpu.trace_start"() <{level = 10 : i32, message = "bld,bsd->bls"}> : () -> ()
    %cst_62 = arith.constant dense<0.000000e+00> : vector<1x8x12xf32>
    %160 = tpu.matmul %158, %159, %cst_62 {dimension_numbers = #tpu.dot_dimension_numbers<[2], [2], [1], [1], [0, 0, 0, 1, 1, 1], [0], [0]>} : vector<1x8x8xf32>, vector<1x12x8xf32>, vector<1x8x12xf32> -> vector<1x8x12xf32>
    "tpu.trace_stop"() : () -> ()
    %cst_63 = arith.constant dense<0xFF800000> : vector<1x8xf32>
    %161 = vector.multi_reduction <maximumf>, %160, %cst_63 [2] : vector<1x8x12xf32> to vector<1x8xf32>
    %162 = vector.shape_cast %161 : vector<1x8xf32> to vector<1x8x1xf32>
    %163 = vector.broadcast %162 : vector<1x8x1xf32> to vector<1x8x12xf32>
    %164 = arith.subf %160, %163 : vector<1x8x12xf32>
    %165 = math.exp %164 : vector<1x8x12xf32>
    %cst_64 = arith.constant dense<0.000000e+00> : vector<1x8xf32>
    %166 = vector.multi_reduction <add>, %165, %cst_64 [2] : vector<1x8x12xf32> to vector<1x8xf32>
    %167 = vector.shape_cast %166 : vector<1x8xf32> to vector<1x8x1xf32>
    %168 = vector.extract_strided_slice %140 {offsets = [0, 0, 8], sizes = [1, 12, 8], strides = [1, 1, 1]} : vector<1x12x32xf32> to vector<1x12x8xf32>
    "tpu.trace_start"() <{level = 10 : i32, message = "bls,bsd->bld"}> : () -> ()
    %cst_65 = arith.constant dense<0.000000e+00> : vector<1x8x8xf32>
    %169 = tpu.matmul %165, %168, %cst_65 {dimension_numbers = #tpu.dot_dimension_numbers<[2], [1], [1], [2], [0, 0, 0, 1, 1, 2], [0], [0]>} : vector<1x8x12xf32>, vector<1x12x8xf32>, vector<1x8x8xf32> -> vector<1x8x8xf32>
    "tpu.trace_stop"() : () -> ()
    %170 = tpu.reciprocal %167 : vector<1x8x1xf32> -> vector<1x8x1xf32>
    %171 = vector.broadcast %170 : vector<1x8x1xf32> to vector<1x8x8xf32>
    %172 = arith.mulf %169, %171 : vector<1x8x8xf32>
    %173 = vector.shape_cast %172 : vector<1x8x8xf32> to vector<8x8xf32>
    %c0_66 = arith.constant 0 : index
    %c8_67 = arith.constant 8 : index
    %174 = vector.load %arg24[%c0_66, %c8_67] : memref<8x32xf32, #tpu.memory_space<vmem>>, vector<8x8xf32>
    tpu.vector_store %arg24[%c0_66, %c8_67], %173 {strides = array<i32>} : memref<8x32xf32, #tpu.memory_space<vmem>>, vector<8x8xf32>,
    %175 = vector.extract_strided_slice %138 {offsets = [0, 0, 16], sizes = [1, 8, 8], strides = [1, 1, 1]} : vector<1x8x32xf32> to vector<1x8x8xf32>
    %176 = vector.extract_strided_slice %139 {offsets = [0, 0, 16], sizes = [1, 12, 8], strides = [1, 1, 1]} : vector<1x12x32xf32> to vector<1x12x8xf32>
    "tpu.trace_start"() <{level = 10 : i32, message = "bld,bsd->bls"}> : () -> ()
    %cst_68 = arith.constant dense<0.000000e+00> : vector<1x8x12xf32>
    %177 = tpu.matmul %175, %176, %cst_68 {dimension_numbers = #tpu.dot_dimension_numbers<[2], [2], [1], [1], [0, 0, 0, 1, 1, 1], [0], [0]>} : vector<1x8x8xf32>, vector<1x12x8xf32>, vector<1x8x12xf32> -> vector<1x8x12xf32>
    "tpu.trace_stop"() : () -> ()
    %cst_69 = arith.constant dense<0xFF800000> : vector<1x8xf32>
    %178 = vector.multi_reduction <maximumf>, %177, %cst_69 [2] : vector<1x8x12xf32> to vector<1x8xf32>
    %179 = vector.shape_cast %178 : vector<1x8xf32> to vector<1x8x1xf32>
    %180 = vector.broadcast %179 : vector<1x8x1xf32> to vector<1x8x12xf32>
    %181 = arith.subf %177, %180 : vector<1x8x12xf32>
    %182 = math.exp %181 : vector<1x8x12xf32>
    %cst_70 = arith.constant dense<0.000000e+00> : vector<1x8xf32>
    %183 = vector.multi_reduction <add>, %182, %cst_70 [2] : vector<1x8x12xf32> to vector<1x8xf32>
    %184 = vector.shape_cast %183 : vector<1x8xf32> to vector<1x8x1xf32>
    %185 = vector.extract_strided_slice %140 {offsets = [0, 0, 16], sizes = [1, 12, 8], strides = [1, 1, 1]} : vector<1x12x32xf32> to vector<1x12x8xf32>
    "tpu.trace_start"() <{level = 10 : i32, message = "bls,bsd->bld"}> : () -> ()
    %cst_71 = arith.constant dense<0.000000e+00> : vector<1x8x8xf32>
    %186 = tpu.matmul %182, %185, %cst_71 {dimension_numbers = #tpu.dot_dimension_numbers<[2], [1], [1], [2], [0, 0, 0, 1, 1, 2], [0], [0]>} : vector<1x8x12xf32>, vector<1x12x8xf32>, vector<1x8x8xf32> -> vector<1x8x8xf32>
    "tpu.trace_stop"() : () -> ()
    %187 = tpu.reciprocal %184 : vector<1x8x1xf32> -> vector<1x8x1xf32>
    %188 = vector.broadcast %187 : vector<1x8x1xf32> to vector<1x8x8xf32>
    %189 = arith.mulf %186, %188 : vector<1x8x8xf32>
    %190 = vector.shape_cast %189 : vector<1x8x8xf32> to vector<8x8xf32>
    %c0_72 = arith.constant 0 : index
    %c16_73 = arith.constant 16 : index
    %191 = vector.load %arg24[%c0_72, %c16_73] : memref<8x32xf32, #tpu.memory_space<vmem>>, vector<8x8xf32>
    tpu.vector_store %arg24[%c0_72, %c16_73], %190 {strides = array<i32>} : memref<8x32xf32, #tpu.memory_space<vmem>>, vector<8x8xf32>,
    %192 = vector.extract_strided_slice %138 {offsets = [0, 0, 24], sizes = [1, 8, 8], strides = [1, 1, 1]} : vector<1x8x32xf32> to vector<1x8x8xf32>
    %193 = vector.extract_strided_slice %139 {offsets = [0, 0, 24], sizes = [1, 12, 8], strides = [1, 1, 1]} : vector<1x12x32xf32> to vector<1x12x8xf32>
    "tpu.trace_start"() <{level = 10 : i32, message = "bld,bsd->bls"}> : () -> ()
    %cst_74 = arith.constant dense<0.000000e+00> : vector<1x8x12xf32>
    %194 = tpu.matmul %192, %193, %cst_74 {dimension_numbers = #tpu.dot_dimension_numbers<[2], [2], [1], [1], [0, 0, 0, 1, 1, 1], [0], [0]>} : vector<1x8x8xf32>, vector<1x12x8xf32>, vector<1x8x12xf32> -> vector<1x8x12xf32>
    "tpu.trace_stop"() : () -> ()
    %cst_75 = arith.constant dense<0xFF800000> : vector<1x8xf32>
    %195 = vector.multi_reduction <maximumf>, %194, %cst_75 [2] : vector<1x8x12xf32> to vector<1x8xf32>
    %196 = vector.shape_cast %195 : vector<1x8xf32> to vector<1x8x1xf32>
    %197 = vector.broadcast %196 : vector<1x8x1xf32> to vector<1x8x12xf32>
    %198 = arith.subf %194, %197 : vector<1x8x12xf32>
    %199 = math.exp %198 : vector<1x8x12xf32>
    %cst_76 = arith.constant dense<0.000000e+00> : vector<1x8xf32>
    %200 = vector.multi_reduction <add>, %199, %cst_76 [2] : vector<1x8x12xf32> to vector<1x8xf32>
    %201 = vector.shape_cast %200 : vector<1x8xf32> to vector<1x8x1xf32>
    %202 = vector.extract_strided_slice %140 {offsets = [0, 0, 24], sizes = [1, 12, 8], strides = [1, 1, 1]} : vector<1x12x32xf32> to vector<1x12x8xf32>
    "tpu.trace_start"() <{level = 10 : i32, message = "bls,bsd->bld"}> : () -> ()
    %cst_77 = arith.constant dense<0.000000e+00> : vector<1x8x8xf32>
    %203 = tpu.matmul %199, %202, %cst_77 {dimension_numbers = #tpu.dot_dimension_numbers<[2], [1], [1], [2], [0, 0, 0, 1, 1, 2], [0], [0]>} : vector<1x8x12xf32>, vector<1x12x8xf32>, vector<1x8x8xf32> -> vector<1x8x8xf32>
    "tpu.trace_stop"() : () -> ()
    %204 = tpu.reciprocal %201 : vector<1x8x1xf32> -> vector<1x8x1xf32>
    %205 = vector.broadcast %204 : vector<1x8x1xf32> to vector<1x8x8xf32>
    %206 = arith.mulf %203, %205 : vector<1x8x8xf32>
    %207 = vector.shape_cast %206 : vector<1x8x8xf32> to vector<8x8xf32>
    %c0_78 = arith.constant 0 : index
    %c24_79 = arith.constant 24 : index
    %208 = vector.load %arg24[%c0_78, %c24_79] : memref<8x32xf32, #tpu.memory_space<vmem>>, vector<8x8xf32>
    tpu.vector_store %arg24[%c0_78, %c24_79], %207 {strides = array<i32>} : memref<8x32xf32, #tpu.memory_space<vmem>>, vector<8x8xf32>,
    %c0_80 = arith.constant 0 : index
    %c0_81 = arith.constant 0 : index
    %209 = vector.load %arg24[%c0_80, %c0_81] : memref<8x32xf32, #tpu.memory_space<vmem>>, vector<8x32xf32>
    %c0_82 = arith.constant 0 : index
    %c0_83 = arith.constant 0 : index
    %210 = vector.load %arg11[%c0_82, %c0_83] : memref<32x32xf32, #tpu.memory_space<vmem>>, vector<32x32xf32>
    %cst_84 = arith.constant dense<0.000000e+00> : vector<8x32xf32>
    %211 = tpu.matmul %209, %210, %cst_84 {dimension_numbers = #tpu.dot_dimension_numbers<[1], [0], [0], [1], [0, 0, 1, 1], [], []>} : vector<8x32xf32>, vector<32x32xf32>, vector<8x32xf32> -> vector<8x32xf32>
    %c0_85 = arith.constant 0 : index
    %c0_86 = arith.constant 0 : index
    %212 = vector.load %arg12[%c0_85, %c0_86] : memref<1x32xf32, #tpu.memory_space<vmem>>, vector<1x32xf32>
    %213 = vector.shape_cast %212 : vector<1x32xf32> to vector<32xf32>
    %214 = vector.shape_cast %213 : vector<32xf32> to vector<1x32xf32>
    %215 = vector.broadcast %214 : vector<1x32xf32> to vector<8x32xf32>
    %216 = arith.addf %211, %215 : vector<8x32xf32>
    %217 = arith.addf %121, %216 : vector<8x32xf32>
    %c0_87 = arith.constant 0 : index
    %c0_88 = arith.constant 0 : index
    %218 = vector.load %arg19[%c0_87, %c0_88] : memref<1x32xf32, #tpu.memory_space<vmem>>, vector<1x32xf32>
    %219 = vector.shape_cast %218 : vector<1x32xf32> to vector<32xf32>
    %c0_89 = arith.constant 0 : index
    %c0_90 = arith.constant 0 : index
    %220 = vector.load %arg20[%c0_89, %c0_90] : memref<1x32xf32, #tpu.memory_space<vmem>>, vector<1x32xf32>
    %221 = vector.shape_cast %220 : vector<1x32xf32> to vector<32xf32>
    %cst_91 = arith.constant dense<0.000000e+00> : vector<8xf32>
    %222 = vector.multi_reduction <add>, %217, %cst_91 [1] : vector<8x32xf32> to vector<8xf32>
    %223 = vector.shape_cast %222 : vector<8xf32> to vector<8x1xf32>
    %cst_92 = arith.constant 3.200000e+01 : f32
    %224 = vector.broadcast %cst_92 : f32 to vector<8x1xf32>
    %225 = arith.divf %223, %224 : vector<8x1xf32>
    %226 = vector.broadcast %225 : vector<8x1xf32> to vector<8x32xf32>
    %227 = arith.subf %217, %226 : vector<8x32xf32>
    %228 = arith.mulf %227, %227 : vector<8x32xf32>
    %cst_93 = arith.constant dense<0.000000e+00> : vector<8xf32>
    %229 = vector.multi_reduction <add>, %228, %cst_93 [1] : vector<8x32xf32> to vector<8xf32>
    %230 = vector.shape_cast %229 : vector<8xf32> to vector<8x1xf32>
    %cst_94 = arith.constant 3.200000e+01 : f32
    %231 = vector.broadcast %cst_94 : f32 to vector<8x1xf32>
    %232 = arith.divf %230, %231 : vector<8x1xf32>
    %233 = vector.broadcast %225 : vector<8x1xf32> to vector<8x32xf32>
    %234 = arith.subf %217, %233 : vector<8x32xf32>
    %cst_95 = arith.constant 9.99999974E-6 : f32
    %235 = vector.broadcast %cst_95 : f32 to vector<8x1xf32>
    %236 = arith.addf %232, %235 : vector<8x1xf32>
    %237 = math.rsqrt %236 : vector<8x1xf32>
    %238 = vector.broadcast %237 : vector<8x1xf32> to vector<8x32xf32>
    %239 = arith.mulf %234, %238 : vector<8x32xf32>
    %240 = vector.shape_cast %219 : vector<32xf32> to vector<1x32xf32>
    %241 = vector.broadcast %240 : vector<1x32xf32> to vector<8x32xf32>
    %242 = arith.mulf %239, %241 : vector<8x32xf32>
    %243 = vector.shape_cast %221 : vector<32xf32> to vector<1x32xf32>
    %244 = vector.broadcast %243 : vector<1x32xf32> to vector<8x32xf32>
    %245 = arith.addf %242, %244 : vector<8x32xf32>
    %c0_96 = arith.constant 0 : index
    %c0_97 = arith.constant 0 : index
    %246 = vector.load %arg13[%c0_96, %c0_97] : memref<32x64xf32, #tpu.memory_space<vmem>>, vector<32x64xf32>
    %cst_98 = arith.constant dense<0.000000e+00> : vector<8x64xf32>
    %247 = tpu.matmul %245, %246, %cst_98 {dimension_numbers = #tpu.dot_dimension_numbers<[1], [0], [0], [1], [0, 0, 1, 1], [], []>} : vector<8x32xf32>, vector<32x64xf32>, vector<8x64xf32> -> vector<8x64xf32>
    %c0_99 = arith.constant 0 : index
    %c0_100 = arith.constant 0 : index
    %248 = vector.load %arg14[%c0_99, %c0_100] : memref<1x64xf32, #tpu.memory_space<vmem>>, vector<1x64xf32>
    %249 = vector.shape_cast %248 : vector<1x64xf32> to vector<64xf32>
    %250 = vector.shape_cast %249 : vector<64xf32> to vector<1x64xf32>
    %251 = vector.broadcast %250 : vector<1x64xf32> to vector<8x64xf32>
    %252 = arith.addf %247, %251 : vector<8x64xf32>
    %cst_101 = arith.constant 0.000000e+00 : f32
    %253 = vector.broadcast %cst_101 : f32 to vector<8x64xf32>
    %254 = arith.maximumf %252, %253 : vector<8x64xf32>
    %c0_102 = arith.constant 0 : index
    %c0_103 = arith.constant 0 : index
    %255 = vector.load %arg15[%c0_102, %c0_103] : memref<64x32xf32, #tpu.memory_space<vmem>>, vector<64x32xf32>
    %cst_104 = arith.constant dense<0.000000e+00> : vector<8x32xf32>
    %256 = tpu.matmul %254, %255, %cst_104 {dimension_numbers = #tpu.dot_dimension_numbers<[1], [0], [0], [1], [0, 0, 1, 1], [], []>} : vector<8x64xf32>, vector<64x32xf32>, vector<8x32xf32> -> vector<8x32xf32>
    %c0_105 = arith.constant 0 : index
    %c0_106 = arith.constant 0 : index
    %257 = vector.load %arg16[%c0_105, %c0_106] : memref<1x32xf32, #tpu.memory_space<vmem>>, vector<1x32xf32>
    %258 = vector.shape_cast %257 : vector<1x32xf32> to vector<32xf32>
    %259 = vector.shape_cast %258 : vector<32xf32> to vector<1x32xf32>
    %260 = vector.broadcast %259 : vector<1x32xf32> to vector<8x32xf32>
    %261 = arith.addf %256, %260 : vector<8x32xf32>
    %262 = arith.addf %245, %261 : vector<8x32xf32>
    %c0_107 = arith.constant 0 : index
    %c0_108 = arith.constant 0 : index
    %263 = vector.load %arg21[%c0_107, %c0_108] : memref<1x32xf32, #tpu.memory_space<vmem>>, vector<1x32xf32>
    %264 = vector.shape_cast %263 : vector<1x32xf32> to vector<32xf32>
    %c0_109 = arith.constant 0 : index
    %c0_110 = arith.constant 0 : index
    %265 = vector.load %arg22[%c0_109, %c0_110] : memref<1x32xf32, #tpu.memory_space<vmem>>, vector<1x32xf32>
    %266 = vector.shape_cast %265 : vector<1x32xf32> to vector<32xf32>
    %cst_111 = arith.constant dense<0.000000e+00> : vector<8xf32>
    %267 = vector.multi_reduction <add>, %262, %cst_111 [1] : vector<8x32xf32> to vector<8xf32>
    %268 = vector.shape_cast %267 : vector<8xf32> to vector<8x1xf32>
    %cst_112 = arith.constant 3.200000e+01 : f32
    %269 = vector.broadcast %cst_112 : f32 to vector<8x1xf32>
    %270 = arith.divf %268, %269 : vector<8x1xf32>
    %271 = vector.broadcast %270 : vector<8x1xf32> to vector<8x32xf32>
    %272 = arith.subf %262, %271 : vector<8x32xf32>
    %273 = arith.mulf %272, %272 : vector<8x32xf32>
    %cst_113 = arith.constant dense<0.000000e+00> : vector<8xf32>
    %274 = vector.multi_reduction <add>, %273, %cst_113 [1] : vector<8x32xf32> to vector<8xf32>
    %275 = vector.shape_cast %274 : vector<8xf32> to vector<8x1xf32>
    %cst_114 = arith.constant 3.200000e+01 : f32
    %276 = vector.broadcast %cst_114 : f32 to vector<8x1xf32>
    %277 = arith.divf %275, %276 : vector<8x1xf32>
    %278 = vector.broadcast %270 : vector<8x1xf32> to vector<8x32xf32>
    %279 = arith.subf %262, %278 : vector<8x32xf32>
    %cst_115 = arith.constant 9.99999974E-6 : f32
    %280 = vector.broadcast %cst_115 : f32 to vector<8x1xf32>
    %281 = arith.addf %277, %280 : vector<8x1xf32>
    %282 = math.rsqrt %281 : vector<8x1xf32>
    %283 = vector.broadcast %282 : vector<8x1xf32> to vector<8x32xf32>
    %284 = arith.mulf %279, %283 : vector<8x32xf32>
    %285 = vector.shape_cast %264 : vector<32xf32> to vector<1x32xf32>
    %286 = vector.broadcast %285 : vector<1x32xf32> to vector<8x32xf32>
    %287 = arith.mulf %284, %286 : vector<8x32xf32>
    %288 = vector.shape_cast %266 : vector<32xf32> to vector<1x32xf32>
    %289 = vector.broadcast %288 : vector<1x32xf32> to vector<8x32xf32>
    %290 = arith.addf %287, %289 : vector<8x32xf32>
    %291 = vector.shape_cast %290 : vector<8x32xf32> to vector<1x8x32xf32>
    %c0_116 = arith.constant 0 : index
    %c0_117 = arith.constant 0 : index
    %c0_118 = arith.constant 0 : index
    %292 = vector.load %arg23[%c0_116, %c0_117, %c0_118] : memref<1x8x32xf32, #tpu.memory_space<vmem>>, vector<1x8x32xf32>
    tpu.vector_store %arg23[%c0_116, %c0_117, %c0_118], %291 {strides = array<i32>} : memref<1x8x32xf32, #tpu.memory_space<vmem>>, vector<1x8x32xf32>,
    return
  }
  func.func @transform_0(%arg0: i32) -> (i32, i32, i32) {
    %c0_i32 = arith.constant 0 : i32
    %c0_i32_0 = arith.constant 0 : i32
    %c0_i32_1 = arith.constant 0 : i32
    return %arg0, %c0_i32, %c0_i32_0 : i32, i32, i32
  }
  func.func @transform_1(%arg0: i32) -> (i32, i32, i32) {
    %c0_i32 = arith.constant 0 : i32
    %c0_i32_0 = arith.constant 0 : i32
    %c0_i32_1 = arith.constant 0 : i32
    return %arg0, %c0_i32, %c0_i32_0 : i32, i32, i32
  }
  func.func @transform_2(%arg0: i32) -> (i32, i32) {
    %c0_i32 = arith.constant 0 : i32
    %c0_i32_0 = arith.constant 0 : i32
    %c0_i32_1 = arith.constant 0 : i32
    return %c0_i32, %c0_i32_0 : i32, i32
  }
  func.func @transform_3(%arg0: i32) -> (i32, i32) {
    %c0_i32 = arith.constant 0 : i32
    %c0_i32_0 = arith.constant 0 : i32
    %c0_i32_1 = arith.constant 0 : i32
    return %c0_i32, %c0_i32_0 : i32, i32
  }
  func.func @transform_4(%arg0: i32) -> (i32, i32) {
    %c0_i32 = arith.constant 0 : i32
    %c0_i32_0 = arith.constant 0 : i32
    %c0_i32_1 = arith.constant 0 : i32
    return %c0_i32, %c0_i32_0 : i32, i32
  }
  func.func @transform_5(%arg0: i32) -> (i32, i32) {
    %c0_i32 = arith.constant 0 : i32
    %c0_i32_0 = arith.constant 0 : i32
    %c0_i32_1 = arith.constant 0 : i32
    return %c0_i32, %c0_i32_0 : i32, i32
  }
  func.func @transform_6(%arg0: i32) -> (i32, i32) {
    %c0_i32 = arith.constant 0 : i32
    %c0_i32_0 = arith.constant 0 : i32
    %c0_i32_1 = arith.constant 0 : i32
    return %c0_i32, %c0_i32_0 : i32, i32
  }
  func.func @transform_7(%arg0: i32) -> (i32, i32) {
    %c0_i32 = arith.constant 0 : i32
    %c0_i32_0 = arith.constant 0 : i32
    %c0_i32_1 = arith.constant 0 : i32
    return %c0_i32, %c0_i32_0 : i32, i32
  }
  func.func @transform_8(%arg0: i32) -> (i32, i32) {
    %c0_i32 = arith.constant 0 : i32
    %c0_i32_0 = arith.constant 0 : i32
    %c0_i32_1 = arith.constant 0 : i32
    return %c0_i32, %c0_i32_0 : i32, i32
  }
  func.func @transform_9(%arg0: i32) -> (i32, i32) {
    %c0_i32 = arith.constant 0 : i32
    %c0_i32_0 = arith.constant 0 : i32
    %c0_i32_1 = arith.constant 0 : i32
    return %c0_i32, %c0_i32_0 : i32, i32
  }
  func.func @transform_10(%arg0: i32) -> (i32, i32) {
    %c0_i32 = arith.constant 0 : i32
    %c0_i32_0 = arith.constant 0 : i32
    %c0_i32_1 = arith.constant 0 : i32
    return %c0_i32, %c0_i32_0 : i32, i32
  }
  func.func @transform_11(%arg0: i32) -> (i32, i32) {
    %c0_i32 = arith.constant 0 : i32
    %c0_i32_0 = arith.constant 0 : i32
    %c0_i32_1 = arith.constant 0 : i32
    return %c0_i32, %c0_i32_0 : i32, i32
  }
  func.func @transform_12(%arg0: i32) -> (i32, i32) {
    %c0_i32 = arith.constant 0 : i32
    %c0_i32_0 = arith.constant 0 : i32
    %c0_i32_1 = arith.constant 0 : i32
    return %c0_i32, %c0_i32_0 : i32, i32
  }
  func.func @transform_13(%arg0: i32) -> (i32, i32) {
    %c0_i32 = arith.constant 0 : i32
    %c0_i32_0 = arith.constant 0 : i32
    %c0_i32_1 = arith.constant 0 : i32
    return %c0_i32, %c0_i32_0 : i32, i32
  }
  func.func @transform_14(%arg0: i32) -> (i32, i32) {
    %c0_i32 = arith.constant 0 : i32
    %c0_i32_0 = arith.constant 0 : i32
    %c0_i32_1 = arith.constant 0 : i32
    return %c0_i32, %c0_i32_0 : i32, i32
  }
  func.func @transform_15(%arg0: i32) -> (i32, i32) {
    %c0_i32 = arith.constant 0 : i32
    %c0_i32_0 = arith.constant 0 : i32
    %c0_i32_1 = arith.constant 0 : i32
    return %c0_i32, %c0_i32_0 : i32, i32
  }
  func.func @transform_16(%arg0: i32) -> (i32, i32) {
    %c0_i32 = arith.constant 0 : i32
    %c0_i32_0 = arith.constant 0 : i32
    %c0_i32_1 = arith.constant 0 : i32
    return %c0_i32, %c0_i32_0 : i32, i32
  }
  func.func @transform_17(%arg0: i32) -> (i32, i32) {
    %c0_i32 = arith.constant 0 : i32
    %c0_i32_0 = arith.constant 0 : i32
    %c0_i32_1 = arith.constant 0 : i32
    return %c0_i32, %c0_i32_0 : i32, i32
  }
  func.func @transform_18(%arg0: i32) -> (i32, i32) {
    %c0_i32 = arith.constant 0 : i32
    %c0_i32_0 = arith.constant 0 : i32
    %c0_i32_1 = arith.constant 0 : i32
    return %c0_i32, %c0_i32_0 : i32, i32
  }
  func.func @transform_19(%arg0: i32) -> (i32, i32) {
    %c0_i32 = arith.constant 0 : i32
    %c0_i32_0 = arith.constant 0 : i32
    %c0_i32_1 = arith.constant 0 : i32
    return %c0_i32, %c0_i32_0 : i32, i32
  }
  func.func @transform_20(%arg0: i32) -> (i32, i32) {
    %c0_i32 = arith.constant 0 : i32
    %c0_i32_0 = arith.constant 0 : i32
    %c0_i32_1 = arith.constant 0 : i32
    return %c0_i32, %c0_i32_0 : i32, i32
  }
  func.func @transform_21(%arg0: i32) -> (i32, i32) {
    %c0_i32 = arith.constant 0 : i32
    %c0_i32_0 = arith.constant 0 : i32
    %c0_i32_1 = arith.constant 0 : i32
    return %c0_i32, %c0_i32_0 : i32, i32
  }
  func.func @transform_22(%arg0: i32) -> (i32, i32, i32) {
    %c0_i32 = arith.constant 0 : i32
    %c0_i32_0 = arith.constant 0 : i32
    %c0_i32_1 = arith.constant 0 : i32
    return %arg0, %c0_i32, %c0_i32_0 : i32, i32, i32
  }
}

module attributes {stable_mosaic.version = 11 : i64} {
  func.func @decoder_layer_kernel(%arg0: i32, %arg1: memref<1x8x32xf32, #tpu.memory_space<vmem>>, %arg2: memref<1x12x32xf32, #tpu.memory_space<vmem>>, %arg3: memref<32x96xf32, #tpu.memory_space<vmem>>, %arg4: memref<1x96xf32, #tpu.memory_space<vmem>>, %arg5: memref<32x32xf32, #tpu.memory_space<vmem>>, %arg6: memref<1x32xf32, #tpu.memory_space<vmem>>, %arg7: memref<32x32xf32, #tpu.memory_space<vmem>>, %arg8: memref<1x32xf32, #tpu.memory_space<vmem>>, %arg9: memref<32x64xf32, #tpu.memory_space<vmem>>, %arg10: memref<1x64xf32, #tpu.memory_space<vmem>>, %arg11: memref<32x32xf32, #tpu.memory_space<vmem>>, %arg12: memref<1x32xf32, #tpu.memory_space<vmem>>, %arg13: memref<32x64xf32, #tpu.memory_space<vmem>>, %arg14: memref<1x64xf32, #tpu.memory_space<vmem>>, %arg15: memref<64x32xf32, #tpu.memory_space<vmem>>, %arg16: memref<1x32xf32, #tpu.memory_space<vmem>>, %arg17: memref<1x32xf32, #tpu.memory_space<vmem>>, %arg18: memref<1x32xf32, #tpu.memory_space<vmem>>, %arg19: memref<1x32xf32, #tpu.memory_space<vmem>>, %arg20: memref<1x32xf32, #tpu.memory_space<vmem>>, %arg21: memref<1x32xf32, #tpu.memory_space<vmem>>, %arg22: memref<1x32xf32, #tpu.memory_space<vmem>>, %arg23: memref<1x8x32xf32, #tpu.memory_space<vmem>>, %arg24: memref<8x32xf32, #tpu.memory_space<vmem>>) attributes {dimension_semantics = [#tpu.dimension_semantics<parallel>], iteration_bounds = array<i64: 2>, scalar_prefetch = 0 : i64, scratch_operands = 1 : i64, tpu.core_type = #tpu.core_type<tc>, window_params = [{transform_indices = @transform_0, window_bounds = array<i64: 1, 8, 32>}, {transform_indices = @transform_1, window_bounds = array<i64: 1, 12, 32>}, {pipeline_mode = #tpu.pipeline_mode<synchronous>, transform_indices = @transform_2, window_bounds = array<i64: 32, 96>}, {pipeline_mode = #tpu.pipeline_mode<synchronous>, transform_indices = @transform_3, window_bounds = array<i64: 1, 96>}, {pipeline_mode = #tpu.pipeline_mode<synchronous>, transform_indices = @transform_4, window_bounds = array<i64: 32, 32>}, {pipeline_mode = #tpu.pipeline_mode<synchronous>, transform_indices = @transform_5, window_bounds = array<i64: 1, 32>}, {pipeline_mode = #tpu.pipeline_mode<synchronous>, transform_indices = @transform_6, window_bounds = array<i64: 32, 32>}, {pipeline_mode = #tpu.pipeline_mode<synchronous>, transform_indices = @transform_7, window_bounds = array<i64: 1, 32>}, {pipeline_mode = #tpu.pipeline_mode<synchronous>, transform_indices = @transform_8, window_bounds = array<i64: 32, 64>}, {pipeline_mode = #tpu.pipeline_mode<synchronous>, transform_indices = @transform_9, window_bounds = array<i64: 1, 64>}, {pipeline_mode = #tpu.pipeline_mode<synchronous>, transform_indices = @transform_10, window_bounds = array<i64: 32, 32>}, {pipeline_mode = #tpu.pipeline_mode<synchronous>, transform_indices = @transform_11, window_bounds = array<i64: 1, 32>}, {pipeline_mode = #tpu.pipeline_mode<synchronous>, transform_indices = @transform_12, window_bounds = array<i64: 32, 64>}, {pipeline_mode = #tpu.pipeline_mode<synchronous>, transform_indices = @transform_13, window_bounds = array<i64: 1, 64>}, {pipeline_mode = #tpu.pipeline_mode<synchronous>, transform_indices = @transform_14, window_bounds = array<i64: 64, 32>}, {pipeline_mode = #tpu.pipeline_mode<synchronous>, transform_indices = @transform_15, window_bounds = array<i64: 1, 32>}, {pipeline_mode = #tpu.pipeline_mode<synchronous>, transform_indices = @transform_16, window_bounds = array<i64: 1, 32>}, {pipeline_mode = #tpu.pipeline_mode<synchronous>, transform_indices = @transform_17, window_bounds = array<i64: 1, 32>}, {pipeline_mode = #tpu.pipeline_mode<synchronous>, transform_indices = @transform_18, window_bounds = array<i64: 1, 32>}, {pipeline_mode = #tpu.pipeline_mode<synchronous>, transform_indices = @transform_19, window_bounds = array<i64: 1, 32>}, {pipeline_mode = #tpu.pipeline_mode<synchronous>, transform_indices = @transform_20, window_bounds = array<i64: 1, 32>}, {pipeline_mode = #tpu.pipeline_mode<synchronous>, transform_indices = @transform_21, window_bounds = array<i64: 1, 32>}, {transform_indices = @transform_22, window_bounds = array<i64: 1, 8, 32>}]} {
    %c0 = arith.constant 0 : index
    %c0_0 = arith.constant 0 : index
    %c0_1 = arith.constant 0 : index
    %0 = vector.load %arg1[%c0, %c0_0, %c0_1] : memref<1x8x32xf32, #tpu.memory_space<vmem>>, vector<1x8x32xf32>
    %1 = vector.shape_cast %0 : vector<1x8x32xf32> to vector<8x32xf32>
    %c0_2 = arith.constant 0 : index
    %c0_3 = arith.constant 0 : index
    %c0_4 = arith.constant 0 : index
    %2 = vector.load %arg2[%c0_2, %c0_3, %c0_4] : memref<1x12x32xf32, #tpu.memory_space<vmem>>, vector<1x12x32xf32>
    %3 = vector.shape_cast %2 : vector<1x12x32xf32> to vector<12x32xf32>
    %c0_5 = arith.constant 0 : index
    %c0_6 = arith.constant 0 : index
    %4 = vector.load %arg3[%c0_5, %c0_6] : memref<32x96xf32, #tpu.memory_space<vmem>>, vector<32x96xf32>
    %cst = arith.constant dense<0.000000e+00> : vector<8x96xf32>
    %5 = tpu.matmul %1, %4, %cst {dimension_numbers = #tpu.dot_dimension_numbers<[1], [0], [0], [1], [0, 0, 1, 1], [], []>} : vector<8x32xf32>, vector<32x96xf32>, vector<8x96xf32> -> vector<8x96xf32>
    %c0_7 = arith.constant 0 : index
    %c0_8 = arith.constant 0 : index
    %6 = vector.load %arg4[%c0_7, %c0_8] : memref<1x96xf32, #tpu.memory_space<vmem>>, vector<1x96xf32>
    %7 = vector.shape_cast %6 : vector<1x96xf32> to vector<96xf32>
    %8 = vector.shape_cast %7 : vector<96xf32> to vector<1x96xf32>
    %9 = vector.broadcast %8 : vector<1x96xf32> to vector<8x96xf32>
    %10 = arith.addf %5, %9 : vector<8x96xf32>
    %11 = vector.extract_strided_slice %10 {offsets = [0, 0], sizes = [8, 32], strides = [1, 1]} : vector<8x96xf32> to vector<8x32xf32>
    %12 = vector.extract_strided_slice %10 {offsets = [0, 32], sizes = [8, 32], strides = [1, 1]} : vector<8x96xf32> to vector<8x32xf32>
    %13 = vector.extract_strided_slice %10 {offsets = [0, 64], sizes = [8, 32], strides = [1, 1]} : vector<8x96xf32> to vector<8x32xf32>
    %14 = vector.shape_cast %11 : vector<8x32xf32> to vector<1x8x32xf32>
    %15 = vector.shape_cast %12 : vector<8x32xf32> to vector<1x8x32xf32>
    %16 = vector.shape_cast %13 : vector<8x32xf32> to vector<1x8x32xf32>
    %17 = vector.extract_strided_slice %14 {offsets = [0, 0, 0], sizes = [1, 8, 8], strides = [1, 1, 1]} : vector<1x8x32xf32> to vector<1x8x8xf32>
    %18 = vector.extract_strided_slice %15 {offsets = [0, 0, 0], sizes = [1, 8, 8], strides = [1, 1, 1]} : vector<1x8x32xf32> to vector<1x8x8xf32>
    "tpu.trace_start"() <{level = 10 : i32, message = "bld,bsd->bls"}> : () -> ()
    %cst_9 = arith.constant dense<0.000000e+00> : vector<1x8x8xf32>
    %19 = tpu.matmul %17, %18, %cst_9 {dimension_numbers = #tpu.dot_dimension_numbers<[2], [2], [1], [1], [0, 0, 0, 1, 1, 1], [0], [0]>} : vector<1x8x8xf32>, vector<1x8x8xf32>, vector<1x8x8xf32> -> vector<1x8x8xf32>
    "tpu.trace_stop"() : () -> ()
    %cst_10 = arith.constant dense<0xFF800000> : vector<1x8xf32>
    %20 = vector.multi_reduction <maximumf>, %19, %cst_10 [2] : vector<1x8x8xf32> to vector<1x8xf32>
    %21 = vector.shape_cast %20 : vector<1x8xf32> to vector<1x8x1xf32>
    %22 = vector.broadcast %21 : vector<1x8x1xf32> to vector<1x8x8xf32>
    %23 = arith.subf %19, %22 : vector<1x8x8xf32>
    %24 = math.exp %23 : vector<1x8x8xf32>
    %cst_11 = arith.constant dense<0.000000e+00> : vector<1x8xf32>
    %25 = vector.multi_reduction <add>, %24, %cst_11 [2] : vector<1x8x8xf32> to vector<1x8xf32>
    %26 = vector.shape_cast %25 : vector<1x8xf32> to vector<1x8x1xf32>
    %27 = vector.extract_strided_slice %16 {offsets = [0, 0, 0], sizes = [1, 8, 8], strides = [1, 1, 1]} : vector<1x8x32xf32> to vector<1x8x8xf32>
    "tpu.trace_start"() <{level = 10 : i32, message = "bls,bsd->bld"}> : () -> ()
    %cst_12 = arith.constant dense<0.000000e+00> : vector<1x8x8xf32>
    %28 = tpu.matmul %24, %27, %cst_12 {dimension_numbers = #tpu.dot_dimension_numbers<[2], [1], [1], [2], [0, 0, 0, 1, 1, 2], [0], [0]>} : vector<1x8x8xf32>, vector<1x8x8xf32>, vector<1x8x8xf32> -> vector<1x8x8xf32>
    "tpu.trace_stop"() : () -> ()
    %29 = tpu.reciprocal %26 : vector<1x8x1xf32> -> vector<1x8x1xf32>
    %30 = vector.broadcast %29 : vector<1x8x1xf32> to vector<1x8x8xf32>
    %31 = arith.mulf %28, %30 : vector<1x8x8xf32>
    %32 = vector.shape_cast %31 : vector<1x8x8xf32> to vector<8x8xf32>
    %c0_13 = arith.constant 0 : index
    %c0_14 = arith.constant 0 : index
    %33 = vector.load %arg24[%c0_13, %c0_14] : memref<8x32xf32, #tpu.memory_space<vmem>>, vector<8x8xf32>
    tpu.vector_store %arg24[%c0_13, %c0_14], %32 {strides = array<i32>} : memref<8x32xf32, #tpu.memory_space<vmem>>, vector<8x8xf32>,
    %34 = vector.extract_strided_slice %14 {offsets = [0, 0, 8], sizes = [1, 8, 8], strides = [1, 1, 1]} : vector<1x8x32xf32> to vector<1x8x8xf32>
    %35 = vector.extract_strided_slice %15 {offsets = [0, 0, 8], sizes = [1, 8, 8], strides = [1, 1, 1]} : vector<1x8x32xf32> to vector<1x8x8xf32>
    "tpu.trace_start"() <{level = 10 : i32, message = "bld,bsd->bls"}> : () -> ()
    %cst_15 = arith.constant dense<0.000000e+00> : vector<1x8x8xf32>
    %36 = tpu.matmul %34, %35, %cst_15 {dimension_numbers = #tpu.dot_dimension_numbers<[2], [2], [1], [1], [0, 0, 0, 1, 1, 1], [0], [0]>} : vector<1x8x8xf32>, vector<1x8x8xf32>, vector<1x8x8xf32> -> vector<1x8x8xf32>
    "tpu.trace_stop"() : () -> ()
    %cst_16 = arith.constant dense<0xFF800000> : vector<1x8xf32>
    %37 = vector.multi_reduction <maximumf>, %36, %cst_16 [2] : vector<1x8x8xf32> to vector<1x8xf32>
    %38 = vector.shape_cast %37 : vector<1x8xf32> to vector<1x8x1xf32>
    %39 = vector.broadcast %38 : vector<1x8x1xf32> to vector<1x8x8xf32>
    %40 = arith.subf %36, %39 : vector<1x8x8xf32>
    %41 = math.exp %40 : vector<1x8x8xf32>
    %cst_17 = arith.constant dense<0.000000e+00> : vector<1x8xf32>
    %42 = vector.multi_reduction <add>, %41, %cst_17 [2] : vector<1x8x8xf32> to vector<1x8xf32>
    %43 = vector.shape_cast %42 : vector<1x8xf32> to vector<1x8x1xf32>
    %44 = vector.extract_strided_slice %16 {offsets = [0, 0, 8], sizes = [1, 8, 8], strides = [1, 1, 1]} : vector<1x8x32xf32> to vector<1x8x8xf32>
    "tpu.trace_start"() <{level = 10 : i32, message = "bls,bsd->bld"}> : () -> ()
    %cst_18 = arith.constant dense<0.000000e+00> : vector<1x8x8xf32>
    %45 = tpu.matmul %41, %44, %cst_18 {dimension_numbers = #tpu.dot_dimension_numbers<[2], [1], [1], [2], [0, 0, 0, 1, 1, 2], [0], [0]>} : vector<1x8x8xf32>, vector<1x8x8xf32>, vector<1x8x8xf32> -> vector<1x8x8xf32>
    "tpu.trace_stop"() : () -> ()
    %46 = tpu.reciprocal %43 : vector<1x8x1xf32> -> vector<1x8x1xf32>
    %47 = vector.broadcast %46 : vector<1x8x1xf32> to vector<1x8x8xf32>
    %48 = arith.mulf %45, %47 : vector<1x8x8xf32>
    %49 = vector.shape_cast %48 : vector<1x8x8xf32> to vector<8x8xf32>
    %c0_19 = arith.constant 0 : index
    %c8 = arith.constant 8 : index
    %50 = vector.load %arg24[%c0_19, %c8] : memref<8x32xf32, #tpu.memory_space<vmem>>, vector<8x8xf32>
    tpu.vector_store %arg24[%c0_19, %c8], %49 {strides = array<i32>} : memref<8x32xf32, #tpu.memory_space<vmem>>, vector<8x8xf32>,
    %51 = vector.extract_strided_slice %14 {offsets = [0, 0, 16], sizes = [1, 8, 8], strides = [1, 1, 1]} : vector<1x8x32xf32> to vector<1x8x8xf32>
    %52 = vector.extract_strided_slice %15 {offsets = [0, 0, 16], sizes = [1, 8, 8], strides = [1, 1, 1]} : vector<1x8x32xf32> to vector<1x8x8xf32>
    "tpu.trace_start"() <{level = 10 : i32, message = "bld,bsd->bls"}> : () -> ()
    %cst_20 = arith.constant dense<0.000000e+00> : vector<1x8x8xf32>
    %53 = tpu.matmul %51, %52, %cst_20 {dimension_numbers = #tpu.dot_dimension_numbers<[2], [2], [1], [1], [0, 0, 0, 1, 1, 1], [0], [0]>} : vector<1x8x8xf32>, vector<1x8x8xf32>, vector<1x8x8xf32> -> vector<1x8x8xf32>
    "tpu.trace_stop"() : () -> ()
    %cst_21 = arith.constant dense<0xFF800000> : vector<1x8xf32>
    %54 = vector.multi_reduction <maximumf>, %53, %cst_21 [2] : vector<1x8x8xf32> to vector<1x8xf32>
    %55 = vector.shape_cast %54 : vector<1x8xf32> to vector<1x8x1xf32>
    %56 = vector.broadcast %55 : vector<1x8x1xf32> to vector<1x8x8xf32>
    %57 = arith.subf %53, %56 : vector<1x8x8xf32>
    %58 = math.exp %57 : vector<1x8x8xf32>
    %cst_22 = arith.constant dense<0.000000e+00> : vector<1x8xf32>
    %59 = vector.multi_reduction <add>, %58, %cst_22 [2] : vector<1x8x8xf32> to vector<1x8xf32>
    %60 = vector.shape_cast %59 : vector<1x8xf32> to vector<1x8x1xf32>
    %61 = vector.extract_strided_slice %16 {offsets = [0, 0, 16], sizes = [1, 8, 8], strides = [1, 1, 1]} : vector<1x8x32xf32> to vector<1x8x8xf32>
    "tpu.trace_start"() <{level = 10 : i32, message = "bls,bsd->bld"}> : () -> ()
    %cst_23 = arith.constant dense<0.000000e+00> : vector<1x8x8xf32>
    %62 = tpu.matmul %58, %61, %cst_23 {dimension_numbers = #tpu.dot_dimension_numbers<[2], [1], [1], [2], [0, 0, 0, 1, 1, 2], [0], [0]>} : vector<1x8x8xf32>, vector<1x8x8xf32>, vector<1x8x8xf32> -> vector<1x8x8xf32>
    "tpu.trace_stop"() : () -> ()
    %63 = tpu.reciprocal %60 : vector<1x8x1xf32> -> vector<1x8x1xf32>
    %64 = vector.broadcast %63 : vector<1x8x1xf32> to vector<1x8x8xf32>
    %65 = arith.mulf %62, %64 : vector<1x8x8xf32>
    %66 = vector.shape_cast %65 : vector<1x8x8xf32> to vector<8x8xf32>
    %c0_24 = arith.constant 0 : index
    %c16 = arith.constant 16 : index
    %67 = vector.load %arg24[%c0_24, %c16] : memref<8x32xf32, #tpu.memory_space<vmem>>, vector<8x8xf32>
    tpu.vector_store %arg24[%c0_24, %c16], %66 {strides = array<i32>} : memref<8x32xf32, #tpu.memory_space<vmem>>, vector<8x8xf32>,
    %68 = vector.extract_strided_slice %14 {offsets = [0, 0, 24], sizes = [1, 8, 8], strides = [1, 1, 1]} : vector<1x8x32xf32> to vector<1x8x8xf32>
    %69 = vector.extract_strided_slice %15 {offsets = [0, 0, 24], sizes = [1, 8, 8], strides = [1, 1, 1]} : vector<1x8x32xf32> to vector<1x8x8xf32>
    "tpu.trace_start"() <{level = 10 : i32, message = "bld,bsd->bls"}> : () -> ()
    %cst_25 = arith.constant dense<0.000000e+00> : vector<1x8x8xf32>
    %70 = tpu.matmul %68, %69, %cst_25 {dimension_numbers = #tpu.dot_dimension_numbers<[2], [2], [1], [1], [0, 0, 0, 1, 1, 1], [0], [0]>} : vector<1x8x8xf32>, vector<1x8x8xf32>, vector<1x8x8xf32> -> vector<1x8x8xf32>
    "tpu.trace_stop"() : () -> ()
    %cst_26 = arith.constant dense<0xFF800000> : vector<1x8xf32>
    %71 = vector.multi_reduction <maximumf>, %70, %cst_26 [2] : vector<1x8x8xf32> to vector<1x8xf32>
    %72 = vector.shape_cast %71 : vector<1x8xf32> to vector<1x8x1xf32>
    %73 = vector.broadcast %72 : vector<1x8x1xf32> to vector<1x8x8xf32>
    %74 = arith.subf %70, %73 : vector<1x8x8xf32>
    %75 = math.exp %74 : vector<1x8x8xf32>
    %cst_27 = arith.constant dense<0.000000e+00> : vector<1x8xf32>
    %76 = vector.multi_reduction <add>, %75, %cst_27 [2] : vector<1x8x8xf32> to vector<1x8xf32>
    %77 = vector.shape_cast %76 : vector<1x8xf32> to vector<1x8x1xf32>
    %78 = vector.extract_strided_slice %16 {offsets = [0, 0, 24], sizes = [1, 8, 8], strides = [1, 1, 1]} : vector<1x8x32xf32> to vector<1x8x8xf32>
    "tpu.trace_start"() <{level = 10 : i32, message = "bls,bsd->bld"}> : () -> ()
    %cst_28 = arith.constant dense<0.000000e+00> : vector<1x8x8xf32>
    %79 = tpu.matmul %75, %78, %cst_28 {dimension_numbers = #tpu.dot_dimension_numbers<[2], [1], [1], [2], [0, 0, 0, 1, 1, 2], [0], [0]>} : vector<1x8x8xf32>, vector<1x8x8xf32>, vector<1x8x8xf32> -> vector<1x8x8xf32>
    "tpu.trace_stop"() : () -> ()
    %80 = tpu.reciprocal %77 : vector<1x8x1xf32> -> vector<1x8x1xf32>
    %81 = vector.broadcast %80 : vector<1x8x1xf32> to vector<1x8x8xf32>
    %82 = arith.mulf %79, %81 : vector<1x8x8xf32>
    %83 = vector.shape_cast %82 : vector<1x8x8xf32> to vector<8x8xf32>
    %c0_29 = arith.constant 0 : index
    %c24 = arith.constant 24 : index
    %84 = vector.load %arg24[%c0_29, %c24] : memref<8x32xf32, #tpu.memory_space<vmem>>, vector<8x8xf32>
    tpu.vector_store %arg24[%c0_29, %c24], %83 {strides = array<i32>} : memref<8x32xf32, #tpu.memory_space<vmem>>, vector<8x8xf32>,
    %c0_30 = arith.constant 0 : index
    %c0_31 = arith.constant 0 : index
    %85 = vector.load %arg24[%c0_30, %c0_31] : memref<8x32xf32, #tpu.memory_space<vmem>>, vector<8x32xf32>
    %c0_32 = arith.constant 0 : index
    %c0_33 = arith.constant 0 : index
    %86 = vector.load %arg5[%c0_32, %c0_33] : memref<32x32xf32, #tpu.memory_space<vmem>>, vector<32x32xf32>
    %cst_34 = arith.constant dense<0.000000e+00> : vector<8x32xf32>
    %87 = tpu.matmul %85, %86, %cst_34 {dimension_numbers = #tpu.dot_dimension_numbers<[1], [0], [0], [1], [0, 0, 1, 1], [], []>} : vector<8x32xf32>, vector<32x32xf32>, vector<8x32xf32> -> vector<8x32xf32>
    %c0_35 = arith.constant 0 : index
    %c0_36 = arith.constant 0 : index
    %88 = vector.load %arg6[%c0_35, %c0_36] : memref<1x32xf32, #tpu.memory_space<vmem>>, vector<1x32xf32>
    %89 = vector.shape_cast %88 : vector<1x32xf32> to vector<32xf32>
    %90 = vector.shape_cast %89 : vector<32xf32> to vector<1x32xf32>
    %91 = vector.broadcast %90 : vector<1x32xf32> to vector<8x32xf32>
    %92 = arith.addf %87, %91 : vector<8x32xf32>
    %93 = arith.addf %1, %92 : vector<8x32xf32>
    %c0_37 = arith.constant 0 : index
    %c0_38 = arith.constant 0 : index
    %94 = vector.load %arg17[%c0_37, %c0_38] : memref<1x32xf32, #tpu.memory_space<vmem>>, vector<1x32xf32>
    %95 = vector.shape_cast %94 : vector<1x32xf32> to vector<32xf32>
    %c0_39 = arith.constant 0 : index
    %c0_40 = arith.constant 0 : index
    %96 = vector.load %arg18[%c0_39, %c0_40] : memref<1x32xf32, #tpu.memory_space<vmem>>, vector<1x32xf32>
    %97 = vector.shape_cast %96 : vector<1x32xf32> to vector<32xf32>
    %cst_41 = arith.constant dense<0.000000e+00> : vector<8xf32>
    %98 = vector.multi_reduction <add>, %93, %cst_41 [1] : vector<8x32xf32> to vector<8xf32>
    %99 = vector.shape_cast %98 : vector<8xf32> to vector<8x1xf32>
    %cst_42 = arith.constant 3.200000e+01 : f32
    %100 = vector.broadcast %cst_42 : f32 to vector<8x1xf32>
    %101 = arith.divf %99, %100 : vector<8x1xf32>
    %102 = vector.broadcast %101 : vector<8x1xf32> to vector<8x32xf32>
    %103 = arith.subf %93, %102 : vector<8x32xf32>
    %104 = arith.mulf %103, %103 : vector<8x32xf32>
    %cst_43 = arith.constant dense<0.000000e+00> : vector<8xf32>
    %105 = vector.multi_reduction <add>, %104, %cst_43 [1] : vector<8x32xf32> to vector<8xf32>
    %106 = vector.shape_cast %105 : vector<8xf32> to vector<8x1xf32>
    %cst_44 = arith.constant 3.200000e+01 : f32
    %107 = vector.broadcast %cst_44 : f32 to vector<8x1xf32>
    %108 = arith.divf %106, %107 : vector<8x1xf32>
    %109 = vector.broadcast %101 : vector<8x1xf32> to vector<8x32xf32>
    %110 = arith.subf %93, %109 : vector<8x32xf32>
    %cst_45 = arith.constant 9.99999974E-6 : f32
    %111 = vector.broadcast %cst_45 : f32 to vector<8x1xf32>
    %112 = arith.addf %108, %111 : vector<8x1xf32>
    %113 = math.rsqrt %112 : vector<8x1xf32>
    %114 = vector.broadcast %113 : vector<8x1xf32> to vector<8x32xf32>
    %115 = arith.mulf %110, %114 : vector<8x32xf32>
    %116 = vector.shape_cast %95 : vector<32xf32> to vector<1x32xf32>
    %117 = vector.broadcast %116 : vector<1x32xf32> to vector<8x32xf32>
    %118 = arith.mulf %115, %117 : vector<8x32xf32>
    %119 = vector.shape_cast %97 : vector<32xf32> to vector<1x32xf32>
    %120 = vector.broadcast %119 : vector<1x32xf32> to vector<8x32xf32>
    %121 = arith.addf %118, %120 : vector<8x32xf32>
    %c0_46 = arith.constant 0 : index
    %c0_47 = arith.constant 0 : index
    %122 = vector.load %arg7[%c0_46, %c0_47] : memref<32x32xf32, #tpu.memory_space<vmem>>, vector<32x32xf32>
    %cst_48 = arith.constant dense<0.000000e+00> : vector<8x32xf32>
    %123 = tpu.matmul %121, %122, %cst_48 {dimension_numbers = #tpu.dot_dimension_numbers<[1], [0], [0], [1], [0, 0, 1, 1], [], []>} : vector<8x32xf32>, vector<32x32xf32>, vector<8x32xf32> -> vector<8x32xf32>
    %c0_49 = arith.constant 0 : index
    %c0_50 = arith.constant 0 : index
    %124 = vector.load %arg8[%c0_49, %c0_50] : memref<1x32xf32, #tpu.memory_space<vmem>>, vector<1x32xf32>
    %125 = vector.shape_cast %124 : vector<1x32xf32> to vector<32xf32>
    %126 = vector.shape_cast %125 : vector<32xf32> to vector<1x32xf32>
    %127 = vector.broadcast %126 : vector<1x32xf32> to vector<8x32xf32>
    %128 = arith.addf %123, %127 : vector<8x32xf32>
    %c0_51 = arith.constant 0 : index
    %c0_52 = arith.constant 0 : index
    %129 = vector.load %arg9[%c0_51, %c0_52] : memref<32x64xf32, #tpu.memory_space<vmem>>, vector<32x64xf32>
    %cst_53 = arith.constant dense<0.000000e+00> : vector<12x64xf32>
    %130 = tpu.matmul %3, %129, %cst_53 {dimension_numbers = #tpu.dot_dimension_numbers<[1], [0], [0], [1], [0, 0, 1, 1], [], []>} : vector<12x32xf32>, vector<32x64xf32>, vector<12x64xf32> -> vector<12x64xf32>
    %c0_54 = arith.constant 0 : index
    %c0_55 = arith.constant 0 : index
    %131 = vector.load %arg10[%c0_54, %c0_55] : memref<1x64xf32, #tpu.memory_space<vmem>>, vector<1x64xf32>
    %132 = vector.shape_cast %131 : vector<1x64xf32> to vector<64xf32>
    %133 = vector.shape_cast %132 : vector<64xf32> to vector<1x64xf32>
    %134 = vector.broadcast %133 : vector<1x64xf32> to vector<12x64xf32>
    %135 = arith.addf %130, %134 : vector<12x64xf32>
    %136 = vector.extract_strided_slice %135 {offsets = [0, 0], sizes = [12, 32], strides = [1, 1]} : vector<12x64xf32> to vector<12x32xf32>
    %137 = vector.extract_strided_slice %135 {offsets = [0, 32], sizes = [12, 32], strides = [1, 1]} : vector<12x64xf32> to vector<12x32xf32>
    %138 = vector.shape_cast %128 : vector<8x32xf32> to vector<1x8x32xf32>
    %139 = vector.shape_cast %136 : vector<12x32xf32> to vector<1x12x32xf32>
    %140 = vector.shape_cast %137 : vector<12x32xf32> to vector<1x12x32xf32>
    %141 = vector.extract_strided_slice %138 {offsets = [0, 0, 0], sizes = [1, 8, 8], strides = [1, 1, 1]} : vector<1x8x32xf32> to vector<1x8x8xf32>
    %142 = vector.extract_strided_slice %139 {offsets = [0, 0, 0], sizes = [1, 12, 8], strides = [1, 1, 1]} : vector<1x12x32xf32> to vector<1x12x8xf32>
    "tpu.trace_start"() <{level = 10 : i32, message = "bld,bsd->bls"}> : () -> ()
    %cst_56 = arith.constant dense<0.000000e+00> : vector<1x8x12xf32>
    %143 = tpu.matmul %141, %142, %cst_56 {dimension_numbers = #tpu.dot_dimension_numbers<[2], [2], [1], [1], [0, 0, 0, 1, 1, 1], [0], [0]>} : vector<1x8x8xf32>, vector<1x12x8xf32>, vector<1x8x12xf32> -> vector<1x8x12xf32>
    "tpu.trace_stop"() : () -> ()
    %cst_57 = arith.constant dense<0xFF800000> : vector<1x8xf32>
    %144 = vector.multi_reduction <maximumf>, %143, %cst_57 [2] : vector<1x8x12xf32> to vector<1x8xf32>
    %145 = vector.shape_cast %144 : vector<1x8xf32> to vector<1x8x1xf32>
    %146 = vector.broadcast %145 : vector<1x8x1xf32> to vector<1x8x12xf32>
    %147 = arith.subf %143, %146 : vector<1x8x12xf32>
    %148 = math.exp %147 : vector<1x8x12xf32>
    %cst_58 = arith.constant dense<0.000000e+00> : vector<1x8xf32>
    %149 = vector.multi_reduction <add>, %148, %cst_58 [2] : vector<1x8x12xf32> to vector<1x8xf32>
    %150 = vector.shape_cast %149 : vector<1x8xf32> to vector<1x8x1xf32>
    %151 = vector.extract_strided_slice %140 {offsets = [0, 0, 0], sizes = [1, 12, 8], strides = [1, 1, 1]} : vector<1x12x32xf32> to vector<1x12x8xf32>
    "tpu.trace_start"() <{level = 10 : i32, message = "bls,bsd->bld"}> : () -> ()
    %cst_59 = arith.constant dense<0.000000e+00> : vector<1x8x8xf32>
    %152 = tpu.matmul %148, %151, %cst_59 {dimension_numbers = #tpu.dot_dimension_numbers<[2], [1], [1], [2], [0, 0, 0, 1, 1, 2], [0], [0]>} : vector<1x8x12xf32>, vector<1x12x8xf32>, vector<1x8x8xf32> -> vector<1x8x8xf32>
    "tpu.trace_stop"() : () -> ()
    %153 = tpu.reciprocal %150 : vector<1x8x1xf32> -> vector<1x8x1xf32>
    %154 = vector.broadcast %153 : vector<1x8x1xf32> to vector<1x8x8xf32>
    %155 = arith.mulf %152, %154 : vector<1x8x8xf32>
    %156 = vector.shape_cast %155 : vector<1x8x8xf32> to vector<8x8xf32>
    %c0_60 = arith.constant 0 : index
    %c0_61 = arith.constant 0 : index
    %157 = vector.load %arg24[%c0_60, %c0_61] : memref<8x32xf32, #tpu.memory_space<vmem>>, vector<8x8xf32>
    tpu.vector_store %arg24[%c0_60, %c0_61], %156 {strides = array<i32>} : memref<8x32xf32, #tpu.memory_space<vmem>>, vector<8x8xf32>,
    %158 = vector.extract_strided_slice %138 {offsets = [0, 0, 8], sizes = [1, 8, 8], strides = [1, 1, 1]} : vector<1x8x32xf32> to vector<1x8x8xf32>
    %159 = vector.extract_strided_slice %139 {offsets = [0, 0, 8], sizes = [1, 12, 8], strides = [1, 1, 1]} : vector<1x12x32xf32> to vector<1x12x8xf32>
    "tpu.trace_start"() <{level = 10 : i32, message = "bld,bsd->bls"}> : () -> ()
    %cst_62 = arith.constant dense<0.000000e+00> : vector<1x8x12xf32>
    %160 = tpu.matmul %158, %159, %cst_62 {dimension_numbers = #tpu.dot_dimension_numbers<[2], [2], [1], [1], [0, 0, 0, 1, 1, 1], [0], [0]>} : vector<1x8x8xf32>, vector<1x12x8xf32>, vector<1x8x12xf32> -> vector<1x8x12xf32>
    "tpu.trace_stop"() : () -> ()
    %cst_63 = arith.constant dense<0xFF800000> : vector<1x8xf32>
    %161 = vector.multi_reduction <maximumf>, %160, %cst_63 [2] : vector<1x8x12xf32> to vector<1x8xf32>
    %162 = vector.shape_cast %161 : vector<1x8xf32> to vector<1x8x1xf32>
    %163 = vector.broadcast %162 : vector<1x8x1xf32> to vector<1x8x12xf32>
    %164 = arith.subf %160, %163 : vector<1x8x12xf32>
    %165 = math.exp %164 : vector<1x8x12xf32>
    %cst_64 = arith.constant dense<0.000000e+00> : vector<1x8xf32>
    %166 = vector.multi_reduction <add>, %165, %cst_64 [2] : vector<1x8x12xf32> to vector<1x8xf32>
    %167 = vector.shape_cast %166 : vector<1x8xf32> to vector<1x8x1xf32>
    %168 = vector.extract_strided_slice %140 {offsets = [0, 0, 8], sizes = [1, 12, 8], strides = [1, 1, 1]} : vector<1x12x32xf32> to vector<1x12x8xf32>
    "tpu.trace_start"() <{level = 10 : i32, message = "bls,bsd->bld"}> : () -> ()
    %cst_65 = arith.constant dense<0.000000e+00> : vector<1x8x8xf32>
    %169 = tpu.matmul %165, %168, %cst_65 {dimension_numbers = #tpu.dot_dimension_numbers<[2], [1], [1], [2], [0, 0, 0, 1, 1, 2], [0], [0]>} : vector<1x8x12xf32>, vector<1x12x8xf32>, vector<1x8x8xf32> -> vector<1x8x8xf32>
    "tpu.trace_stop"() : () -> ()
    %170 = tpu.reciprocal %167 : vector<1x8x1xf32> -> vector<1x8x1xf32>
    %171 = vector.broadcast %170 : vector<1x8x1xf32> to vector<1x8x8xf32>
    %172 = arith.mulf %169, %171 : vector<1x8x8xf32>
    %173 = vector.shape_cast %172 : vector<1x8x8xf32> to vector<8x8xf32>
    %c0_66 = arith.constant 0 : index
    %c8_67 = arith.constant 8 : index
    %174 = vector.load %arg24[%c0_66, %c8_67] : memref<8x32xf32, #tpu.memory_space<vmem>>, vector<8x8xf32>
    tpu.vector_store %arg24[%c0_66, %c8_67], %173 {strides = array<i32>} : memref<8x32xf32, #tpu.memory_space<vmem>>, vector<8x8xf32>,
    %175 = vector.extract_strided_slice %138 {offsets = [0, 0, 16], sizes = [1, 8, 8], strides = [1, 1, 1]} : vector<1x8x32xf32> to vector<1x8x8xf32>
    %176 = vector.extract_strided_slice %139 {offsets = [0, 0, 16], sizes = [1, 12, 8], strides = [1, 1, 1]} : vector<1x12x32xf32> to vector<1x12x8xf32>
    "tpu.trace_start"() <{level = 10 : i32, message = "bld,bsd->bls"}> : () -> ()
    %cst_68 = arith.constant dense<0.000000e+00> : vector<1x8x12xf32>
    %177 = tpu.matmul %175, %176, %cst_68 {dimension_numbers = #tpu.dot_dimension_numbers<[2], [2], [1], [1], [0, 0, 0, 1, 1, 1], [0], [0]>} : vector<1x8x8xf32>, vector<1x12x8xf32>, vector<1x8x12xf32> -> vector<1x8x12xf32>
    "tpu.trace_stop"() : () -> ()
    %cst_69 = arith.constant dense<0xFF800000> : vector<1x8xf32>
    %178 = vector.multi_reduction <maximumf>, %177, %cst_69 [2] : vector<1x8x12xf32> to vector<1x8xf32>
    %179 = vector.shape_cast %178 : vector<1x8xf32> to vector<1x8x1xf32>
    %180 = vector.broadcast %179 : vector<1x8x1xf32> to vector<1x8x12xf32>
    %181 = arith.subf %177, %180 : vector<1x8x12xf32>
    %182 = math.exp %181 : vector<1x8x12xf32>
    %cst_70 = arith.constant dense<0.000000e+00> : vector<1x8xf32>
    %183 = vector.multi_reduction <add>, %182, %cst_70 [2] : vector<1x8x12xf32> to vector<1x8xf32>
    %184 = vector.shape_cast %183 : vector<1x8xf32> to vector<1x8x1xf32>
    %185 = vector.extract_strided_slice %140 {offsets = [0, 0, 16], sizes = [1, 12, 8], strides = [1, 1, 1]} : vector<1x12x32xf32> to vector<1x12x8xf32>
    "tpu.trace_start"() <{level = 10 : i32, message = "bls,bsd->bld"}> : () -> ()
    %cst_71 = arith.constant dense<0.000000e+00> : vector<1x8x8xf32>
    %186 = tpu.matmul %182, %185, %cst_71 {dimension_numbers = #tpu.dot_dimension_numbers<[2], [1], [1], [2], [0, 0, 0, 1, 1, 2], [0], [0]>} : vector<1x8x12xf32>, vector<1x12x8xf32>, vector<1x8x8xf32> -> vector<1x8x8xf32>
    "tpu.trace_stop"() : () -> ()
    %187 = tpu.reciprocal %184 : vector<1x8x1xf32> -> vector<1x8x1xf32>
    %188 = vector.broadcast %187 : vector<1x8x1xf32> to vector<1x8x8xf32>
    %189 = arith.mulf %186, %188 : vector<1x8x8xf32>
    %190 = vector.shape_cast %189 : vector<1x8x8xf32> to vector<8x8xf32>
    %c0_72 = arith.constant 0 : index
    %c16_73 = arith.constant 16 : index
    %191 = vector.load %arg24[%c0_72, %c16_73] : memref<8x32xf32, #tpu.memory_space<vmem>>, vector<8x8xf32>
    tpu.vector_store %arg24[%c0_72, %c16_73], %190 {strides = array<i32>} : memref<8x32xf32, #tpu.memory_space<vmem>>, vector<8x8xf32>,
    %192 = vector.extract_strided_slice %138 {offsets = [0, 0, 24], sizes = [1, 8, 8], strides = [1, 1, 1]} : vector<1x8x32xf32> to vector<1x8x8xf32>
    %193 = vector.extract_strided_slice %139 {offsets = [0, 0, 24], sizes = [1, 12, 8], strides = [1, 1, 1]} : vector<1x12x32xf32> to vector<1x12x8xf32>
    "tpu.trace_start"() <{level = 10 : i32, message = "bld,bsd->bls"}> : () -> ()
    %cst_74 = arith.constant dense<0.000000e+00> : vector<1x8x12xf32>
    %194 = tpu.matmul %192, %193, %cst_74 {dimension_numbers = #tpu.dot_dimension_numbers<[2], [2], [1], [1], [0, 0, 0, 1, 1, 1], [0], [0]>} : vector<1x8x8xf32>, vector<1x12x8xf32>, vector<1x8x12xf32> -> vector<1x8x12xf32>
    "tpu.trace_stop"() : () -> ()
    %cst_75 = arith.constant dense<0xFF800000> : vector<1x8xf32>
    %195 = vector.multi_reduction <maximumf>, %194, %cst_75 [2] : vector<1x8x12xf32> to vector<1x8xf32>
    %196 = vector.shape_cast %195 : vector<1x8xf32> to vector<1x8x1xf32>
    %197 = vector.broadcast %196 : vector<1x8x1xf32> to vector<1x8x12xf32>
    %198 = arith.subf %194, %197 : vector<1x8x12xf32>
    %199 = math.exp %198 : vector<1x8x12xf32>
    %cst_76 = arith.constant dense<0.000000e+00> : vector<1x8xf32>
    %200 = vector.multi_reduction <add>, %199, %cst_76 [2] : vector<1x8x12xf32> to vector<1x8xf32>
    %201 = vector.shape_cast %200 : vector<1x8xf32> to vector<1x8x1xf32>
    %202 = vector.extract_strided_slice %140 {offsets = [0, 0, 24], sizes = [1, 12, 8], strides = [1, 1, 1]} : vector<1x12x32xf32> to vector<1x12x8xf32>
    "tpu.trace_start"() <{level = 10 : i32, message = "bls,bsd->bld"}> : () -> ()
    %cst_77 = arith.constant dense<0.000000e+00> : vector<1x8x8xf32>
    %203 = tpu.matmul %199, %202, %cst_77 {dimension_numbers = #tpu.dot_dimension_numbers<[2], [1], [1], [2], [0, 0, 0, 1, 1, 2], [0], [0]>} : vector<1x8x12xf32>, vector<1x12x8xf32>, vector<1x8x8xf32> -> vector<1x8x8xf32>
    "tpu.trace_stop"() : () -> ()
    %204 = tpu.reciprocal %201 : vector<1x8x1xf32> -> vector<1x8x1xf32>
    %205 = vector.broadcast %204 : vector<1x8x1xf32> to vector<1x8x8xf32>
    %206 = arith.mulf %203, %205 : vector<1x8x8xf32>
    %207 = vector.shape_cast %206 : vector<1x8x8xf32> to vector<8x8xf32>
    %c0_78 = arith.constant 0 : index
    %c24_79 = arith.constant 24 : index
    %208 = vector.load %arg24[%c0_78, %c24_79] : memref<8x32xf32, #tpu.memory_space<vmem>>, vector<8x8xf32>
    tpu.vector_store %arg24[%c0_78, %c24_79], %207 {strides = array<i32>} : memref<8x32xf32, #tpu.memory_space<vmem>>, vector<8x8xf32>,
    %c0_80 = arith.constant 0 : index
    %c0_81 = arith.constant 0 : index
    %209 = vector.load %arg24[%c0_80, %c0_81] : memref<8x32xf32, #tpu.memory_space<vmem>>, vector<8x32xf32>
    %c0_82 = arith.constant 0 : index
    %c0_83 = arith.constant 0 : index
    %210 = vector.load %arg11[%c0_82, %c0_83] : memref<32x32xf32, #tpu.memory_space<vmem>>, vector<32x32xf32>
    %cst_84 = arith.constant dense<0.000000e+00> : vector<8x32xf32>
    %211 = tpu.matmul %209, %210, %cst_84 {dimension_numbers = #tpu.dot_dimension_numbers<[1], [0], [0], [1], [0, 0, 1, 1], [], []>} : vector<8x32xf32>, vector<32x32xf32>, vector<8x32xf32> -> vector<8x32xf32>
    %c0_85 = arith.constant 0 : index
    %c0_86 = arith.constant 0 : index
    %212 = vector.load %arg12[%c0_85, %c0_86] : memref<1x32xf32, #tpu.memory_space<vmem>>, vector<1x32xf32>
    %213 = vector.shape_cast %212 : vector<1x32xf32> to vector<32xf32>
    %214 = vector.shape_cast %213 : vector<32xf32> to vector<1x32xf32>
    %215 = vector.broadcast %214 : vector<1x32xf32> to vector<8x32xf32>
    %216 = arith.addf %211, %215 : vector<8x32xf32>
    %217 = arith.addf %121, %216 : vector<8x32xf32>
    %c0_87 = arith.constant 0 : index
    %c0_88 = arith.constant 0 : index
    %218 = vector.load %arg19[%c0_87, %c0_88] : memref<1x32xf32, #tpu.memory_space<vmem>>, vector<1x32xf32>
    %219 = vector.shape_cast %218 : vector<1x32xf32> to vector<32xf32>
    %c0_89 = arith.constant 0 : index
    %c0_90 = arith.constant 0 : index
    %220 = vector.load %arg20[%c0_89, %c0_90] : memref<1x32xf32, #tpu.memory_space<vmem>>, vector<1x32xf32>
    %221 = vector.shape_cast %220 : vector<1x32xf32> to vector<32xf32>
    %cst_91 = arith.constant dense<0.000000e+00> : vector<8xf32>
    %222 = vector.multi_reduction <add>, %217, %cst_91 [1] : vector<8x32xf32> to vector<8xf32>
    %223 = vector.shape_cast %222 : vector<8xf32> to vector<8x1xf32>
    %cst_92 = arith.constant 3.200000e+01 : f32
    %224 = vector.broadcast %cst_92 : f32 to vector<8x1xf32>
    %225 = arith.divf %223, %224 : vector<8x1xf32>
    %226 = vector.broadcast %225 : vector<8x1xf32> to vector<8x32xf32>
    %227 = arith.subf %217, %226 : vector<8x32xf32>
    %228 = arith.mulf %227, %227 : vector<8x32xf32>
    %cst_93 = arith.constant dense<0.000000e+00> : vector<8xf32>
    %229 = vector.multi_reduction <add>, %228, %cst_93 [1] : vector<8x32xf32> to vector<8xf32>
    %230 = vector.shape_cast %229 : vector<8xf32> to vector<8x1xf32>
    %cst_94 = arith.constant 3.200000e+01 : f32
    %231 = vector.broadcast %cst_94 : f32 to vector<8x1xf32>
    %232 = arith.divf %230, %231 : vector<8x1xf32>
    %233 = vector.broadcast %225 : vector<8x1xf32> to vector<8x32xf32>
    %234 = arith.subf %217, %233 : vector<8x32xf32>
    %cst_95 = arith.constant 9.99999974E-6 : f32
    %235 = vector.broadcast %cst_95 : f32 to vector<8x1xf32>
    %236 = arith.addf %232, %235 : vector<8x1xf32>
    %237 = math.rsqrt %236 : vector<8x1xf32>
    %238 = vector.broadcast %237 : vector<8x1xf32> to vector<8x32xf32>
    %239 = arith.mulf %234, %238 : vector<8x32xf32>
    %240 = vector.shape_cast %219 : vector<32xf32> to vector<1x32xf32>
    %241 = vector.broadcast %240 : vector<1x32xf32> to vector<8x32xf32>
    %242 = arith.mulf %239, %241 : vector<8x32xf32>
    %243 = vector.shape_cast %221 : vector<32xf32> to vector<1x32xf32>
    %244 = vector.broadcast %243 : vector<1x32xf32> to vector<8x32xf32>
    %245 = arith.addf %242, %244 : vector<8x32xf32>
    %c0_96 = arith.constant 0 : index
    %c0_97 = arith.constant 0 : index
    %246 = vector.load %arg13[%c0_96, %c0_97] : memref<32x64xf32, #tpu.memory_space<vmem>>, vector<32x64xf32>
    %cst_98 = arith.constant dense<0.000000e+00> : vector<8x64xf32>
    %247 = tpu.matmul %245, %246, %cst_98 {dimension_numbers = #tpu.dot_dimension_numbers<[1], [0], [0], [1], [0, 0, 1, 1], [], []>} : vector<8x32xf32>, vector<32x64xf32>, vector<8x64xf32> -> vector<8x64xf32>
    %c0_99 = arith.constant 0 : index
    %c0_100 = arith.constant 0 : index
    %248 = vector.load %arg14[%c0_99, %c0_100] : memref<1x64xf32, #tpu.memory_space<vmem>>, vector<1x64xf32>
    %249 = vector.shape_cast %248 : vector<1x64xf32> to vector<64xf32>
    %250 = vector.shape_cast %249 : vector<64xf32> to vector<1x64xf32>
    %251 = vector.broadcast %250 : vector<1x64xf32> to vector<8x64xf32>
    %252 = arith.addf %247, %251 : vector<8x64xf32>
    %cst_101 = arith.constant 0.000000e+00 : f32
    %253 = vector.broadcast %cst_101 : f32 to vector<8x64xf32>
    %254 = arith.maximumf %252, %253 : vector<8x64xf32>
    %c0_102 = arith.constant 0 : index
    %c0_103 = arith.constant 0 : index
    %255 = vector.load %arg15[%c0_102, %c0_103] : memref<64x32xf32, #tpu.memory_space<vmem>>, vector<64x32xf32>
    %cst_104 = arith.constant dense<0.000000e+00> : vector<8x32xf32>
    %256 = tpu.matmul %254, %255, %cst_104 {dimension_numbers = #tpu.dot_dimension_numbers<[1], [0], [0], [1], [0, 0, 1, 1], [], []>} : vector<8x64xf32>, vector<64x32xf32>, vector<8x32xf32> -> vector<8x32xf32>
    %c0_105 = arith.constant 0 : index
    %c0_106 = arith.constant 0 : index
    %257 = vector.load %arg16[%c0_105, %c0_106] : memref<1x32xf32, #tpu.memory_space<vmem>>, vector<1x32xf32>
    %258 = vector.shape_cast %257 : vector<1x32xf32> to vector<32xf32>
    %259 = vector.shape_cast %258 : vector<32xf32> to vector<1x32xf32>
    %260 = vector.broadcast %259 : vector<1x32xf32> to vector<8x32xf32>
    %261 = arith.addf %256, %260 : vector<8x32xf32>
    %262 = arith.addf %245, %261 : vector<8x32xf32>
    %c0_107 = arith.constant 0 : index
    %c0_108 = arith.constant 0 : index
    %263 = vector.load %arg21[%c0_107, %c0_108] : memref<1x32xf32, #tpu.memory_space<vmem>>, vector<1x32xf32>
    %264 = vector.shape_cast %263 : vector<1x32xf32> to vector<32xf32>
    %c0_109 = arith.constant 0 : index
    %c0_110 = arith.constant 0 : index
    %265 = vector.load %arg22[%c0_109, %c0_110] : memref<1x32xf32, #tpu.memory_space<vmem>>, vector<1x32xf32>
    %266 = vector.shape_cast %265 : vector<1x32xf32> to vector<32xf32>
    %cst_111 = arith.constant dense<0.000000e+00> : vector<8xf32>
    %267 = vector.multi_reduction <add>, %262, %cst_111 [1] : vector<8x32xf32> to vector<8xf32>
    %268 = vector.shape_cast %267 : vector<8xf32> to vector<8x1xf32>
    %cst_112 = arith.constant 3.200000e+01 : f32
    %269 = vector.broadcast %cst_112 : f32 to vector<8x1xf32>
    %270 = arith.divf %268, %269 : vector<8x1xf32>
    %271 = vector.broadcast %270 : vector<8x1xf32> to vector<8x32xf32>
    %272 = arith.subf %262, %271 : vector<8x32xf32>
    %273 = arith.mulf %272, %272 : vector<8x32xf32>
    %cst_113 = arith.constant dense<0.000000e+00> : vector<8xf32>
    %274 = vector.multi_reduction <add>, %273, %cst_113 [1] : vector<8x32xf32> to vector<8xf32>
    %275 = vector.shape_cast %274 : vector<8xf32> to vector<8x1xf32>
    %cst_114 = arith.constant 3.200000e+01 : f32
    %276 = vector.broadcast %cst_114 : f32 to vector<8x1xf32>
    %277 = arith.divf %275, %276 : vector<8x1xf32>
    %278 = vector.broadcast %270 : vector<8x1xf32> to vector<8x32xf32>
    %279 = arith.subf %262, %278 : vector<8x32xf32>
    %cst_115 = arith.constant 9.99999974E-6 : f32
    %280 = vector.broadcast %cst_115 : f32 to vector<8x1xf32>
    %281 = arith.addf %277, %280 : vector<8x1xf32>
    %282 = math.rsqrt %281 : vector<8x1xf32>
    %283 = vector.broadcast %282 : vector<8x1xf32> to vector<8x32xf32>
    %284 = arith.mulf %279, %283 : vector<8x32xf32>
    %285 = vector.shape_cast %264 : vector<32xf32> to vector<1x32xf32>
    %286 = vector.broadcast %285 : vector<1x32xf32> to vector<8x32xf32>
    %287 = arith.mulf %284, %286 : vector<8x32xf32>
    %288 = vector.shape_cast %266 : vector<32xf32> to vector<1x32xf32>
    %289 = vector.broadcast %288 : vector<1x32xf32> to vector<8x32xf32>
    %290 = arith.addf %287, %289 : vector<8x32xf32>
    %291 = vector.shape_cast %290 : vector<8x32xf32> to vector<1x8x32xf32>
    %c0_116 = arith.constant 0 : index
    %c0_117 = arith.constant 0 : index
    %c0_118 = arith.constant 0 : index
    %292 = vector.load %arg23[%c0_116, %c0_117, %c0_118] : memref<1x8x32xf32, #tpu.memory_space<vmem>>, vector<1x8x32xf32>
    tpu.vector_store %arg23[%c0_116, %c0_117, %c0_118], %291 {strides = array<i32>} : memref<1x8x32xf32, #tpu.memory_space<vmem>>, vector<1x8x32xf32>,
    return
  }
  func.func @transform_0(%arg0: i32) -> (i32, i32, i32) {
    %c0_i32 = arith.constant 0 : i32
    %c0_i32_0 = arith.constant 0 : i32
    %c0_i32_1 = arith.constant 0 : i32
    return %arg0, %c0_i32, %c0_i32_0 : i32, i32, i32
  }
  func.func @transform_1(%arg0: i32) -> (i32, i32, i32) {
    %c0_i32 = arith.constant 0 : i32
    %c0_i32_0 = arith.constant 0 : i32
    %c0_i32_1 = arith.constant 0 : i32
    return %arg0, %c0_i32, %c0_i32_0 : i32, i32, i32
  }
  func.func @transform_2(%arg0: i32) -> (i32, i32) {
    %c0_i32 = arith.constant 0 : i32
    %c0_i32_0 = arith.constant 0 : i32
    %c0_i32_1 = arith.constant 0 : i32
    return %c0_i32, %c0_i32_0 : i32, i32
  }
  func.func @transform_3(%arg0: i32) -> (i32, i32) {
    %c0_i32 = arith.constant 0 : i32
    %c0_i32_0 = arith.constant 0 : i32
    %c0_i32_1 = arith.constant 0 : i32
    return %c0_i32, %c0_i32_0 : i32, i32
  }
  func.func @transform_4(%arg0: i32) -> (i32, i32) {
    %c0_i32 = arith.constant 0 : i32
    %c0_i32_0 = arith.constant 0 : i32
    %c0_i32_1 = arith.constant 0 : i32
    return %c0_i32, %c0_i32_0 : i32, i32
  }
  func.func @transform_5(%arg0: i32) -> (i32, i32) {
    %c0_i32 = arith.constant 0 : i32
    %c0_i32_0 = arith.constant 0 : i32
    %c0_i32_1 = arith.constant 0 : i32
    return %c0_i32, %c0_i32_0 : i32, i32
  }
  func.func @transform_6(%arg0: i32) -> (i32, i32) {
    %c0_i32 = arith.constant 0 : i32
    %c0_i32_0 = arith.constant 0 : i32
    %c0_i32_1 = arith.constant 0 : i32
    return %c0_i32, %c0_i32_0 : i32, i32
  }
  func.func @transform_7(%arg0: i32) -> (i32, i32) {
    %c0_i32 = arith.constant 0 : i32
    %c0_i32_0 = arith.constant 0 : i32
    %c0_i32_1 = arith.constant 0 : i32
    return %c0_i32, %c0_i32_0 : i32, i32
  }
  func.func @transform_8(%arg0: i32) -> (i32, i32) {
    %c0_i32 = arith.constant 0 : i32
    %c0_i32_0 = arith.constant 0 : i32
    %c0_i32_1 = arith.constant 0 : i32
    return %c0_i32, %c0_i32_0 : i32, i32
  }
  func.func @transform_9(%arg0: i32) -> (i32, i32) {
    %c0_i32 = arith.constant 0 : i32
    %c0_i32_0 = arith.constant 0 : i32
    %c0_i32_1 = arith.constant 0 : i32
    return %c0_i32, %c0_i32_0 : i32, i32
  }
  func.func @transform_10(%arg0: i32) -> (i32, i32) {
    %c0_i32 = arith.constant 0 : i32
    %c0_i32_0 = arith.constant 0 : i32
    %c0_i32_1 = arith.constant 0 : i32
    return %c0_i32, %c0_i32_0 : i32, i32
  }
  func.func @transform_11(%arg0: i32) -> (i32, i32) {
    %c0_i32 = arith.constant 0 : i32
    %c0_i32_0 = arith.constant 0 : i32
    %c0_i32_1 = arith.constant 0 : i32
    return %c0_i32, %c0_i32_0 : i32, i32
  }
  func.func @transform_12(%arg0: i32) -> (i32, i32) {
    %c0_i32 = arith.constant 0 : i32
    %c0_i32_0 = arith.constant 0 : i32
    %c0_i32_1 = arith.constant 0 : i32
    return %c0_i32, %c0_i32_0 : i32, i32
  }
  func.func @transform_13(%arg0: i32) -> (i32, i32) {
    %c0_i32 = arith.constant 0 : i32
    %c0_i32_0 = arith.constant 0 : i32
    %c0_i32_1 = arith.constant 0 : i32
    return %c0_i32, %c0_i32_0 : i32, i32
  }
  func.func @transform_14(%arg0: i32) -> (i32, i32) {
    %c0_i32 = arith.constant 0 : i32
    %c0_i32_0 = arith.constant 0 : i32
    %c0_i32_1 = arith.constant 0 : i32
    return %c0_i32, %c0_i32_0 : i32, i32
  }
  func.func @transform_15(%arg0: i32) -> (i32, i32) {
    %c0_i32 = arith.constant 0 : i32
    %c0_i32_0 = arith.constant 0 : i32
    %c0_i32_1 = arith.constant 0 : i32
    return %c0_i32, %c0_i32_0 : i32, i32
  }
  func.func @transform_16(%arg0: i32) -> (i32, i32) {
    %c0_i32 = arith.constant 0 : i32
    %c0_i32_0 = arith.constant 0 : i32
    %c0_i32_1 = arith.constant 0 : i32
    return %c0_i32, %c0_i32_0 : i32, i32
  }
  func.func @transform_17(%arg0: i32) -> (i32, i32) {
    %c0_i32 = arith.constant 0 : i32
    %c0_i32_0 = arith.constant 0 : i32
    %c0_i32_1 = arith.constant 0 : i32
    return %c0_i32, %c0_i32_0 : i32, i32
  }
  func.func @transform_18(%arg0: i32) -> (i32, i32) {
    %c0_i32 = arith.constant 0 : i32
    %c0_i32_0 = arith.constant 0 : i32
    %c0_i32_1 = arith.constant 0 : i32
    return %c0_i32, %c0_i32_0 : i32, i32
  }
  func.func @transform_19(%arg0: i32) -> (i32, i32) {
    %c0_i32 = arith.constant 0 : i32
    %c0_i32_0 = arith.constant 0 : i32
    %c0_i32_1 = arith.constant 0 : i32
    return %c0_i32, %c0_i32_0 : i32, i32
  }
  func.func @transform_20(%arg0: i32) -> (i32, i32) {
    %c0_i32 = arith.constant 0 : i32
    %c0_i32_0 = arith.constant 0 : i32
    %c0_i32_1 = arith.constant 0 : i32
    return %c0_i32, %c0_i32_0 : i32, i32
  }
  func.func @transform_21(%arg0: i32) -> (i32, i32) {
    %c0_i32 = arith.constant 0 : i32
    %c0_i32_0 = arith.constant 0 : i32
    %c0_i32_1 = arith.constant 0 : i32
    return %c0_i32, %c0_i32_0 : i32, i32
  }
  func.func @transform_22(%arg0: i32) -> (i32, i32, i32) {
    %c0_i32 = arith.constant 0 : i32
    %c0_i32_0 = arith.constant 0 : i32
    %c0_i32_1 = arith.constant 0 : i32
    return %arg0, %c0_i32, %c0_i32_0 : i32, i32, i32
  }
}

</mosaic_0001>

<bundles_post_ra>
// kernel: tpu_custom_call.1
= control target key start
LH: loop header
LB: loop body
LE: loop exit
PB: predicated region body
PF: predicated region fallthrough
CT: control target
= control target key end

     0   :  { %s4644_s0 = inlined_call_operand.hbm [shape: f32[2,8,32], index: 0, kind: input, shape index: {}]   ;;  %s4645_s1 = inlined_call_operand.vmem [shape: f32[2,12,32], index: 1, kind: input, shape index: {}]   ;;  %s4646_s2 = inlined_call_operand.vmem [shape: f32[32,96], index: 2, kind: input, shape index: {}]   ;;  %s4647_s3 = inlined_call_operand.vmem [shape: f32[1,96], index: 3, kind: input, shape index: {}]   ;;  %s4648_s4 = inlined_call_operand.vmem [shape: f32[32,32], index: 4, kind: input, shape index: {}]   ;;  %s4649_s5 = inlined_call_operand.hbm [shape: f32[1,32], index: 5, kind: input, shape index: {}]   ;;  %s4650_s6 = inlined_call_operand.vmem [shape: f32[32,32], index: 6, kind: input, shape index: {}]   ;;  %s4651_s7 = inlined_call_operand.hbm [shape: f32[1,32], index: 7, kind: input, shape index: {}]   ;;  %s4652_s8 = inlined_call_operand.vmem [shape: f32[32,64], index: 8, kind: input, shape index: {}]   ;;  %s4653_s9 = inlined_call_operand.hbm [shape: f32[1,64], index: 9, kind: input, shape index: {}]   ;;  %s4654_s10 = inlined_call_operand.hbm [shape: f32[32,32], index: 10, kind: input, shape index: {}]   ;;  %s4655_s11 = inlined_call_operand.hbm [shape: f32[1,32], index: 11, kind: input, shape index: {}]   ;;  %s4656_s12 = inlined_call_operand.vmem [shape: f32[32,64], index: 12, kind: input, shape index: {}]   ;;  %s4657_s13 = inlined_call_operand.vmem [shape: f32[1,64], index: 13, kind: input, shape index: {}]   ;;  %s4658_s14 = inlined_call_operand.vmem [shape: f32[64,32], index: 14, kind: input, shape index: {}]   ;;  %s4659_s15 = inlined_call_operand.vmem [shape: f32[1,32], index: 15, kind: input, shape index: {}]   ;;  %s4660_s16 = inlined_call_operand.vmem [shape: f32[1,32], index: 16, kind: input, shape index: {}]   ;;  %s4661_s17 = inlined_call_operand.vmem [shape: f32[1,32], index: 17, kind: input, shape index: {}]   ;;  %s4662_s18 = inlined_call_operand.vmem [shape: f32[1,32], index: 18, kind: input, shape index: {}]   ;;  %s4663_s19 = inlined_call_operand.vmem [shape: f32[1,32], index: 19, kind: input, shape index: {}]   ;;  %s4664_s20 = inlined_call_operand.vmem [shape: f32[1,32], index: 20, kind: input, shape index: {}]   ;;  %s4665_s21 = inlined_call_operand.vmem [shape: f32[1,32], index: 21, kind: input, shape index: {}]   ;;  %s4666_s22 = inlined_call_operand.hbm [shape: f32[2,8,32], index: 22, kind: output, shape index: {}]  }
   0x1   :  { %4692 = sst [smem:[#allocation20_spill]] %s4644_s0 }
   0x2   :  { %4693 = sst [smem:[#allocation21_spill]] %s4645_s1 }
   0x3   :  { %4694 = sst [smem:[#allocation22_spill]] %s4646_s2 }
   0x4   :  { %4695 = sst [smem:[#allocation23_spill]] %s4647_s3 }
   0x5   :  { %4696 = sst [smem:[#allocation24_spill]] %s4648_s4 }
   0x6   :  { %4697 = sst [smem:[#allocation25_spill]] %s4649_s5 }
   0x7   :  { %4698 = sst [smem:[#allocation26_spill]] %s4650_s6 }
   0x8   :  { %4699 = sst [smem:[#allocation27_spill]] %s4651_s7 }
   0x9   :  { %4700 = sst [smem:[#allocation28_spill]] %s4652_s8 }
   0xa   :  { %4701 = sst [smem:[#allocation29_spill]] %s4653_s9 }
   0xb   :  { %4702 = sst [smem:[#allocation30_spill]] %s4654_s10 }
   0xc   :  { %4703 = sst [smem:[#allocation31_spill]] %s4655_s11 }
   0xd   :  { %4704 = sst [smem:[#allocation32_spill]] %s4657_s13 }
   0xe   :  { %4705 = sst [smem:[#allocation33_spill]] %s4659_s15 }
   0xf   :  { %4706 = sst [smem:[#allocation34_spill]] %s4662_s18 }
  0x10   :  { %4707 = sst [smem:[#allocation35_spill]] %s4663_s19 }
  0x11   :  { %4708 = sst [smem:[#allocation36_spill]] %s4664_s20 }
  0x12   :  { %4709 = sst [smem:[#allocation37_spill]] %s4665_s21 }
  0x13   :  { %4710 = sst [smem:[#allocation38_spill]] %s4666_s22 }
  0x14   :  { %27 = vsyncpa [#allocation4], 0 }
  0x15   :  { %29 = vsyncpa [#allocation4 + $0x1], 0 }
  0x16   :  { %30 = vsyncpa [#allocation7], 0 }
  0x17   :  { %31 = vsyncpa [#allocation10], 0 }
  0x18   :  { %32 = vsyncpa [#allocation13], 0 }
  0x19   :  { %33 = vsyncpa [#allocation5], 0 }
  0x1a   :  { %35 = vsyncpa [#allocation5 + $0x1], 0  ;;  %s4017_s3 = smov 0   ;;  %s4019_s28 = smov 0  }
  0x1b   :  { %s4021_s29 = smov 0   ;;  %s4023_s30 = smov 0  }
  0x1c LB: > { %s3875_s4 = smov [#allocation6]   ;;  %s4038_s23 = sadd.s32 4294967295, %s3873_s30   ;;  %s3873_s30 = sphi %s4023_s30, %s4766_s30   ;;  %s3869_s29 = sphi %s4021_s29, %s4765_s29   ;;  %s3865_s28 = sphi %s4019_s28, %s4764_s28   ;;  %s3861_s3 = sphi %s4017_s3, %s4763_s3  }
  0x1d   : > { %s566_s0 = sshll.u32 %s3875_s4, 4  ;;  %p3015_p0 = scmp.ge.s32.totalorder %s3873_s30, 1  ;;  %s4043_s0 = int_to_ptr.vmem [resolvable:$true] %s566_s0 }
  0x1e   : > { %p4673_p1 = scmp.eq.s32.totalorder %s4038_s23, 0  ;;  %p544_p2 = scmp.lt.s32.totalorder %s3873_s30, 3 }
  0x1f   : > { %s3876_s5 = smov [#allocation9]   ;;  %s3877_s6 = smov [#allocation8]  }
  0x20   : > { %p4045_p3 = pnand %p3015_p0, %p544_p2  ;;  %s594_s24 = sshll.u32 %s3876_s5, 4  ;;  %s4052_s24 = int_to_ptr.vmem [resolvable:$true] %s594_s24 }
  0x21   : > { %s580_s25 = sshll.u32 %s3877_s6, 4  ;;  %s3878_s2 = smov [#allocation11]   ;;  %s4060_s25 = int_to_ptr.vmem [resolvable:$true] %s580_s25 }
  0x22   : > { %s4711_s1 = scalar_select %p4045_p3, 1, 0 }
  0x23   : > { %p3459_p5 = pneg %p4045_p3  ;;  %s4062_s27 = sshll.u32 %s3878_s2, 4  ;;  %s605_s27 = int_to_ptr.vmem [resolvable:$true] %s4062_s27 }
  0x24   : > { %s4713_s21 = sld [smem:[#allocation25_spill]] }
  0x25   : > { %p4056_p6 = pnand %p3459_p5, %p4673_p1 }
  0x27   : > { %p4072_p8 = pneg %p4056_p6 }
  0x2a   : > { %s3625_s20 = scalar_lea.hbm %s4713_s21, 16 }
  0x2b   : > { %p3626_p7 = scmp.ne.s32.totalorder %s4713_s21, %s3625_s20  ;;  %p3632_p11 = scmp.lt.u32.totalorder %s3625_s20, %s4713_s21 }
  0x2d   : > { %p3628_p9 = pnand %p4072_p8, %p3626_p7 }
  0x2f   : > { %p3629_p10 = pneg %p3628_p9 }
  0x31   : > { %p3634_p12 = pnand %p3632_p11, %p3629_p10 }
  0x33   : > { %3637 = shalt.err (!%p3634_p12)
}
  0x34   : > { %s3638_s15 = scalar_lea.vmem %s4043_s0, 16  ;;  %s3645_s22 = scalar_lea.vmem %s4043_s0, 32 }
  0x35   : > { %p3639_p13 = scmp.ne.s32.totalorder %s4043_s0, %s3638_s15  ;;  %p3646_p5 = scmp.lt.s32.totalorder %s4043_s0, %s4043_s0 }
  0x36   : > { %p3647_p7 = scmp.lt.s32.totalorder %s3645_s22, %s3638_s15 }
  0x37   : > { %p3641_p0 = pnand %p3639_p13, %p4072_p8 }
  0x38   : > { %p3648_p9 = por %p3647_p7, %p3646_p5 }
  0x39   : > { %p3642_p2 = pneg %p3641_p0 }
  0x3b   : > { %p3649_p4 = pnand %p3648_p9, %p3642_p2 }
  0x3d   : > { %3652 = shalt.err (!%p3649_p4)
}
  0x3e   : > { %3462 = dma.hbm_to_vmem [thread:$0]  (!%p4056_p6), %s4713_s21, 16, %s4043_s0, [#allocation7]  }
  0x3f   : > { %s4715_s9 = sld [smem:[#allocation29_spill]] }
  0x45   : > { %s3653_s2 = scalar_lea.hbm %s4715_s9, 16 }
  0x46   : > { %p3654_p10 = scmp.ne.s32.totalorder %s4715_s9, %s3653_s2  ;;  %p3660_p4 = scmp.lt.u32.totalorder %s3653_s2, %s4715_s9 }
  0x48   : > { %p3656_p11 = pnand %p3654_p10, %p4072_p8 }
  0x4a   : > { %p3657_p12 = pneg %p3656_p11 }
  0x4c   : > { %p3662_p13 = pnand %p3660_p4, %p3657_p12 }
  0x4e   : > { %3665 = shalt.err (!%p3662_p13)
}
  0x4f   : > { %s3666_s0 = scalar_lea.vmem %s4052_s24, 16  ;;  %s3673_s18 = scalar_lea.vmem %s4052_s24, 32 }
  0x50   : > { %p3667_p0 = scmp.ne.s32.totalorder %s4052_s24, %s3666_s0  ;;  %p3674_p7 = scmp.lt.s32.totalorder %s4052_s24, %s4052_s24 }
  0x51   : > { %p3675_p9 = scmp.lt.s32.totalorder %s3673_s18, %s3666_s0 }
  0x52   : > { %p3669_p2 = pnand %p3667_p0, %p4072_p8 }
  0x53   : > { %p3676_p10 = por %p3675_p9, %p3674_p7 }
  0x54   : > { %p3670_p5 = pneg %p3669_p2 }
  0x56   : > { %p3677_p11 = pnand %p3676_p10, %p3670_p5 }
  0x58   : > { %3680 = shalt.err (!%p3677_p11)
}
  0x59   : > { %3468 = dma.hbm_to_vmem [thread:$0]  (!%p4056_p6), %s4715_s9, 16, %s4052_s24, [#allocation10]  }
  0x5a   : > { %s4716_s7 = sld [smem:[#allocation27_spill]] }
  0x60   : > { %s3681_s5 = scalar_lea.hbm %s4716_s7, 16 }
  0x61   : > { %p3682_p12 = scmp.ne.s32.totalorder %s4716_s7, %s3681_s5  ;;  %p3688_p0 = scmp.lt.u32.totalorder %s3681_s5, %s4716_s7 }
  0x63   : > { %p3684_p4 = pnand %p3682_p12, %p4072_p8 }
  0x65   : > { %p3685_p13 = pneg %p3684_p4 }
  0x67   : > { %p3690_p2 = pnand %p3688_p0, %p3685_p13 }
  0x69   : > { %3693 = shalt.err (!%p3690_p2)
}
  0x6a   : > { %s3694_s24 = scalar_lea.vmem %s4060_s25, 16  ;;  %s3701_s18 = scalar_lea.vmem %s4060_s25, 32 }
  0x6b   : > { %p3695_p5 = scmp.ne.s32.totalorder %s4060_s25, %s3694_s24  ;;  %p3702_p10 = scmp.lt.s32.totalorder %s4060_s25, %s4060_s25 }
  0x6c   : > { %p3703_p11 = scmp.lt.s32.totalorder %s3701_s18, %s3694_s24 }
  0x6d   : > { %p3697_p7 = pnand %p3695_p5, %p4072_p8 }
  0x6e   : > { %p3704_p12 = por %p3703_p11, %p3702_p10 }
  0x6f   : > { %p3698_p9 = pneg %p3697_p7 }
  0x71   : > { %p3705_p4 = pnand %p3704_p12, %p3698_p9 }
  0x73   : > { %3708 = shalt.err (!%p3705_p4)
}
  0x74   : > { %3465 = dma.hbm_to_vmem [thread:$0]  (!%p4056_p6), %s4716_s7, 16, %s4060_s25, [#allocation7]  }
  0x75   : > { %s4717_s10 = sld [smem:[#allocation30_spill]] }
  0x7b   : > { %s3709_s5 = scalar_lea.hbm %s4717_s10, 512 }
  0x7c   : > { %p3710_p13 = scmp.ne.s32.totalorder %s4717_s10, %s3709_s5  ;;  %p3716_p5 = scmp.lt.u32.totalorder %s3709_s5, %s4717_s10 }
  0x7e   : > { %p3712_p0 = pnand %p3710_p13, %p4072_p8 }
  0x80   : > { %p3713_p2 = pneg %p3712_p0 }
  0x82   : > { %p3718_p7 = pnand %p3716_p5, %p3713_p2 }
  0x84   : > { %3721 = shalt.err (!%p3718_p7)
}
  0x85   : > { %s3722_s24 = scalar_lea.vmem %s605_s27, 512  ;;  %p3730_p12 = scmp.lt.s32.totalorder %s605_s27, %s605_s27 }
  0x86   : > { %p3723_p9 = scmp.ne.s32.totalorder %s605_s27, %s3722_s24  ;;  %p3731_p4 = scmp.lt.s32.totalorder %s3722_s24, %s3722_s24 }
  0x88   : > { %p3725_p10 = pnand %p3723_p9, %p4072_p8  ;;  %p3732_p1 = por %p3731_p4, %p3730_p12 }
  0x8a   : > { %p3726_p11 = pneg %p3725_p10 }
  0x8c   : > { %p3733_p3 = pnand %p3732_p1, %p3726_p11 }
  0x8e   : > { %3736 = shalt.err (!%p3733_p3)
}
  0x8f   : > { %s3879_s25 = smov 128   ;;  %s3880_s18 = smov 8  }
  0x90   : > { %3471 = dma.hbm_to_vmem [thread:$0]  (!%p4056_p6), %s4717_s10, 512, %s605_s27, [#allocation10], %s3879_s25, %s3879_s25, %s3880_s18  }
  0x91   : > { %s3881_s20 = smov [#allocation12]   ;;  %s4718_s11 = sld [smem:[#allocation31_spill]] }
  0x92   : > { %s618_s4 = sshll.u32 %s3881_s20, 4  ;;  %s619_s4 = int_to_ptr.vmem [resolvable:$true] %s618_s4 }
  0x97   : > { %s3737_s15 = scalar_lea.hbm %s4718_s11, 16 }
  0x98   : > { %p3738_p1 = scmp.ne.s32.totalorder %s4718_s11, %s3737_s15  ;;  %p3744_p0 = scmp.lt.u32.totalorder %s3737_s15, %s4718_s11 }
  0x9a   : > { %p3740_p3 = pnand %p3738_p1, %p4072_p8 }
  0x9c   : > { %p3741_p13 = pneg %p3740_p3 }
  0x9e   : > { %p3746_p2 = pnand %p3744_p0, %p3741_p13 }
  0xa0   : > { %3749 = shalt.err (!%p3746_p2)
}
  0xa1   : > { %s3750_s27 = scalar_lea.vmem %s619_s4, 16  ;;  %s3757_s25 = scalar_lea.vmem %s619_s4, 32 }
  0xa2   : > { %p3751_p5 = scmp.ne.s32.totalorder %s619_s4, %s3750_s27  ;;  %p3758_p10 = scmp.lt.s32.totalorder %s619_s4, %s619_s4 }
  0xa3   : > { %p3759_p11 = scmp.lt.s32.totalorder %s3757_s25, %s3750_s27 }
  0xa4   : > { %p3753_p7 = pnand %p3751_p5, %p4072_p8 }
  0xa5   : > { %p3760_p12 = por %p3759_p11, %p3758_p10 }
  0xa6   : > { %p3754_p9 = pneg %p3753_p7 }
  0xa8   : > { %p3761_p4 = pnand %p3760_p12, %p3754_p9 }
  0xaa   : > { %3764 = shalt.err (!%p3761_p4)
}
  0xab   : > { %3474 = dma.hbm_to_vmem [thread:$0]  (!%p4056_p6), %s4718_s11, 16, %s619_s4, [#allocation13]  }
  0xac   : > { %s3014_s7 = sadd.s32 4294967294, %s3873_s30   ;;  %s4181_s26 = sadd.s32 1, %s3873_s30  }
  0xad   : > { %s48_s6 = sadd.s32 1, %s3869_s29  ;;  %s45_s13 = ssub.s32 %s3873_s30, %s4181_s26 }
  0xae   : > { %p55_p8 = scmp.ne.s32.totalorder %s3869_s29, %s3865_s28  ;;  %p46_p1 = scmp.eq.s32.totalorder %s45_s13, 0 }
  0xaf   : > { %p56_p3 = scmp.eq.s32.totalorder %s3873_s30, 0  ;;  %p61_p13 = scmp.ne.s32.totalorder %s3865_s28, %s3861_s3 }
  0xb0   : > { %p531_p0 = scmp.eq.s32.totalorder %s4038_s23, 1  ;;  %p4719_p5 = scmp.eq.s32.totalorder %s4038_s23, 0 }
  0xb1   : > { %s4193_s20 = scalar_select %p46_p1, %s3869_s29, %s48_s6  }
  0xb2   : > { %p57_p2 = por %p56_p3, %p55_p8  ;;  %p4197_p7 = por %p4719_p5, %p61_p13 }
  0xb3   : > { %p4201_p6 = por %p531_p0, %p55_p8  ;;  %p537_p9 = scmp.eq.s32.totalorder %s3014_s7, 1 }
  0xb4   : > { %p3488_p10 = scmp.lt.s32.totalorder %s3873_s30, 2  ;;  %s659_s2 = sand.u32 1, %s3869_s29  }
  0xb5   : > { %s4721_s4 = scalar_select %p4201_p6, 1, 0 }
  0xb6   : > { %p4207_p11 = por %p537_p9, %p61_p13  ;;  %s3022_s22 = sshll.u32 %s659_s2, 3 }
  0xb7   : > { %s3023_s0 = sshll.u32 %s3873_s30, 7  ;;  %s4723_s25 = sld [smem:[#allocation20_spill]] }
  0xb8   : > { %s4722_s15 = scalar_select %p4207_p11, 1, 0 }
  0xb9   : > { %s663_s19 = scalar_lea.vmem [#allocation3], %s3022_s22  ;;  %p4217_p12 = pnand %p3488_p10, %p57_p2 }
  0xba   : > { %s670_s6 = sshll.u32 %s663_s19, 4  ;;  %s660_s13 = scalar_lea.sflag [#allocation4], %s659_s2  ;;  %s4221_s6 = int_to_ptr.vmem [resolvable:$true] %s670_s6 }
  0xbb   : > { %p3767_p8 = pneg %p4217_p12 }
  0xbd   : > { %s4215_s18 = scalar_lea.hbm %s4723_s25, %s3023_s0  ;;  %s3770_s24 = scalar_lea.hbm %s4723_s25, 256 }
  0xbe   : > { %s3765_s9 = scalar_lea.hbm %s4215_s18, 128  ;;  %p3771_p13 = scmp.lt.u32.totalorder %s4215_s18, %s4723_s25 }
  0xbf   : > { %p3766_p4 = scmp.ne.s32.totalorder %s4215_s18, %s3765_s9  ;;  %p3772_p0 = scmp.lt.u32.totalorder %s3770_s24, %s3765_s9 }
  0xc0   : > { %p3774_p5 = scmp.lt.u32.totalorder %s3765_s9, %s4215_s18 }
  0xc1   : > { %p3768_p1 = pnand %p3767_p8, %p3766_p4  ;;  %p3773_p2 = por %p3772_p0, %p3771_p13 }
  0xc3   : > { %p3769_p3 = pneg %p3768_p1  ;;  %p3775_p9 = por %p3774_p5, %p3773_p2 }
  0xc5   : > { %p3776_p10 = pnand %p3775_p9, %p3769_p3 }
  0xc7   : > { %3779 = shalt.err (!%p3776_p10)
}
  0xc8   : > { %s3780_s2 = scalar_lea.vmem %s4221_s6, 128  ;;  %s3882_s0 = smov [#allocation3]  }
  0xc9   : > { %p3781_p4 = scmp.ne.s32.totalorder %s4221_s6, %s3780_s2  ;;  %s3785_s22 = sshll.u32 %s3882_s0, 4  ;;  %s3786_s22 = int_to_ptr.vmem [resolvable:$false] %s3785_s22 }
  0xca   : > { %s3787_s27 = scalar_lea.vmem %s3786_s22, 256  ;;  %p3788_p6 = scmp.lt.s32.totalorder %s4221_s6, %s3786_s22 }
  0xcb   : > { %p3783_p1 = pnand %p3781_p4, %p3767_p8  ;;  %p3789_p13 = scmp.lt.s32.totalorder %s3787_s27, %s3780_s2 }
  0xcd   : > { %p3784_p11 = pneg %p3783_p1  ;;  %p3790_p0 = por %p3789_p13, %p3788_p6 }
  0xcf   : > { %p3791_p2 = pnand %p3790_p0, %p3784_p11 }
  0xd1   : > { %3794 = shalt.err (!%p3791_p2)
}
  0xd2   : > { %3478 = dma.hbm_to_vmem [thread:$0]  (!%p4217_p12), %s4215_s18, 128, %s4221_s6, %s660_s13  }
  0xd3   : > { %p4725_p3 = scmp.ne.s32.totalorder %s4711_s1, 0 }
  0xd4   : > { %s4251_s9 = sand.u32 (!%p4725_p3), 1, %s3865_s28  }
  0xd5   : > { %687 = sbr.rel (%p4725_p3) target bundleno = 4947 (0x1353), region = 108  ;;  %s4676_s24 = sshll.u32 (!%p4725_p3), %s4251_s9, 3 }
  0xd6   : > { %s690_s19 = scalar_lea.sflag (!%p4725_p3), [#allocation4], %s4251_s9  ;;  %s693_s2 = scalar_lea.vmem (!%p4725_p3), [#allocation3], %s4676_s24 }
  0xdc   : > { %3840 = dma.done.wait (%p4197_p7), %s690_s19, 128  }
  0xdd   : > { %3842 = vsyncadd (%p4197_p7), %s690_s19, 4294967168  ;;  %p4726_p6 = scmp.eq.s32.totalorder %s4038_s23, 0 }
  0xdf   : > { %3844 = dma.done.wait (%p4726_p6), [#allocation7], 32   ;;  %p4727_p11 = pmov %p4726_p6 }
  0xe0   : > { %p4728_p12 = pmov %p4726_p6 }
  0xe1   : > { %3846 = vsyncadd (%p4727_p11), [#allocation7], 4294967264 }
  0xe2   : > { %3848 = dma.done.wait (%p4728_p12), [#allocation10], 528   ;;  %p4729_p8 = pmov %p4726_p6 }
  0xe3   : > { %p4730_p5 = pmov %p4726_p6 }
  0xe4   : > { %3850 = vsyncadd (%p4729_p8), [#allocation10], 4294966768 }
  0xe5   : > { %3852 = dma.done.wait (%p4730_p5), [#allocation13], 16   ;;  %p4731_p9 = pmov %p4730_p5 }
  0xe6   : > { %v3883_v0 = vmov 0.0|0.0   ;;  %vm3884_vm0 = vmmov 0   ;;  %v3885_v1 = vmov 0.0   ;;  %s4732_s18 = sld [smem:[#allocation22_spill]]  ;;  %v4292_v8 = vld [vmem:[%s693_s2] sm:$0xff]  ;;  %vm798_vm1 = vcmask 261120  }
  0xe7   : > { %3854 = vsyncadd (%p4731_p9), [#allocation13], 4294967280  ;;  %3353 = vmatprep.subr.bf16.mxu1 %v3883_v0  ;;  %3180 = vmatprep.mubr.msk.f32.mxu1 %vm3884_vm0, %v3885_v1  ;;  %s4733_s5 = sld [smem:[#allocation23_spill]]  ;;  %s4688_s6 = smov 120   ;;  %vm875_vm2 = vcmask 64512   ;;  %vm1207_vm3 = vcmask 130112  }
  0xe8   : > { %3193 = vmatprep.subr.mxu0 %v3885_v1  ;;  %3195 = vmatprep.mubr.msk.f32.mxu0 %vm3884_vm0, %v3885_v1  ;;  %s4684_s2 = smov 96   ;;  %s4680_s7 = smov 80   ;;  %vm1378_vm4 = vcmask 195712   ;;  %vm1549_vm5 = vcmask 261312   ;;  %vm4427_vm6 = vmpackc.low %vm875_vm2, %vm875_vm2  ;;  %vm1922_vm7 = vcmask 97280   ;;  %vm1940_vm8 = vcmask 1043456  }
  0xe9   : > { %s4687_s13 = smov 88   ;;  %s4677_s0 = smov 72   ;;  %vm3900_vm9 = vmmov 1   ;;  %vm2765_vm11 = vcmask 523264  }
  0xea   : > { %s4681_s22 = smov 112   ;;  %s4678_s27 = smov 104   ;;  %vm4462_vm10 = vmpackc.low %vm1940_vm8, %vm3900_vm9 }
  0xeb   : > { %s3893_s19 = smov 56   ;;  %s3894_s1 = smov 64  }
  0xec   : > { %v787_v2 = vld [vmem:[%s4732_s18] sm:$0xff]  ;;  %v788_v3 = vld [vmem:[%s4732_s18 + $0x8] sm:$0xff]  ;;  %v789_v4 = vld [vmem:[%s4732_s18 + $0x10] sm:$0xff]  ;;  %s3896_s24 = smov 48   ;;  %s4735_s8 = sld [smem:[#allocation28_spill]] }
  0xed   : > { %v3354_v5 = vpack.c.bf16 %v788_v3, %v787_v2  ;;  %v790_v6 = vld [vmem:[%s4732_s18 + $0x18] sm:$0xff]  ;;  %v3034_v9 = vld [vmem:[%s4733_s5] ss:$0 sm:$0xff]  ;;  %s3895_s5 = smov 40   ;;  %p779_p7 = scmp.lt.s32.totalorder %s4038_s23, 1 }
  0xee   : > { %v3357_v7 = vpack.c.bf16 %v790_v6, %v789_v4  ;;  %s4759_s10 = sld [smem:[#allocation38_spill]]  ;;  %p4760_p4 = scmp.ne.s32.totalorder %s4721_s4, 0 }
  0xef   : > { %3355 = vmatpush3.bf16.msra.mxu1 %v3354_v5 }
  0xf0   : > { %3356 = vmatprep.subr.bf16.mxu1 %v3883_v0 }
  0xf3   : > { %3358 = vmatpush3.bf16.msra.mxu1 %v3357_v7 }
  0xf4   : > { %3183 = vmatprep.subr.mxu1 %v3885_v1 }
  0xf6   : > { %3181 = vmatmul.mubr.msk.f32.vlgmr.msra.gmra.mrb[0].mxu1 %vm798_vm1, %v4292_v8 }
  0xf7   : > { %3185 = vmatprep.mubr.msk.f32.mxu1 %vm3884_vm0, %v3885_v1 }
 0x1c9   : > { %v868_v10 = vpop.f32.mrb[0].mxu1 }
 0x1ca   : > { %v869_v11 = vadd.f32 %v3034_v9, %v868_v10  ;;  %v3182_v12 = vpop.f32.mrb[1].mxu1 }
 0x1cc   : > { %1038 = vrot.lane.b32.xlu1 %v869_v11, %s4688_s6  ;;  %873 = vrot.lane.b32.xlu0 %v869_v11, %s4684_s2  ;;  %s4737_s2 = sld [smem:[#allocation26_spill]] }
 0x1d0   : > { %1211 = vrot.lane.b32.xlu1 %v869_v11, %s4680_s7  ;;  %1040 = vrot.lane.b32.xlu0 %v869_v11, %s4687_s13  ;;  %s4685_s7 = smov 24   ;;  %s4736_s13 = sld [smem:[#allocation21_spill]] }
 0x1d4   : > { %1382 = vrot.lane.b32.xlu1 %v869_v11, %s4677_s0  ;;  %1209 = vrot.lane.b32.xlu0 %v869_v11, %s4681_s22  ;;  %s780_s22 = scalar_select %p779_p7, %s4038_s23, 1 }
 0x1d5   : > { %s4750_s0 = smov 16  }
 0x1d8   : > { %1380 = vrot.lane.b32.xlu0 %v869_v11, %s4678_s27  ;;  %s3091_s27 = sshll.u32 %s780_s22, 4  ;;  %s4740_s22 = smov 120  }
 0x1d9   : > { %s783_s6 = scalar_lea.vmem %s4736_s13, %s3091_s27  ;;  %s4741_s13 = smov 88  }
 0x1da   : > { %s4745_s27 = smov 104  }
 0x23e   : > { %v1039_v13 = vpop.permute.xlu1 %1038  ;;  %v874_v14 = vpop.permute.xlu0 %873 }
 0x23f   : > { %3184 = vmatpush3.xpose.msk.msra.mxu1 %vm875_vm2, %v874_v14 }
 0x240   : > { %3188 = vmatprep.subr.mxu1 %v3885_v1 }
 0x242   : > { %3186 = vmatmul.mubr.msk.f32.vlgmr.msra.gmra.mrb[2].mxu1 %vm875_vm2, %v869_v11  ;;  %v1041_v15 = vpop.permute.xlu0 %1040  ;;  %v1212_v16 = vpop.permute.xlu1 %1211 }
 0x243   : > { %3194 = vmatpush3.xpose.msk.msra.mxu0 %vm875_vm2, %v1041_v15  ;;  %3190 = vmatprep.mubr.msk.f32.mxu1 %vm3884_vm0, %v3885_v1 }
 0x244   : > { %3203 = vmatprep.subr.mxu0 %v3885_v1 }
 0x246   : > { %3196 = vmatmul.mubr.msk.f32.vlgmr.msra.gmra.mrb[0].mxu0 %vm875_vm2, %v1039_v13  ;;  %v1210_v17 = vpop.permute.xlu0 %1209  ;;  %v1383_v18 = vpop.permute.xlu1 %1382 }
 0x247   : > { %3204 = vmatpush3.xpose.msk.msra.mxu0 %vm875_vm2, %v1212_v16  ;;  %3205 = vmatprep.mubr.msk.f32.mxu0 %vm3884_vm0, %v3885_v1 }
 0x248   : > { %3213 = vmatprep.subr.mxu0 %v3885_v1 }
 0x24a   : > { %3206 = vmatmul.mubr.msk.f32.vlgmr.msra.gmra.mrb[2].mxu0 %vm875_vm2, %v1210_v17  ;;  %v1381_v19 = vpop.permute.xlu0 %1380 }
 0x24b   : > { %3214 = vmatpush3.xpose.msk.msra.mxu0 %vm875_vm2, %v1383_v18  ;;  %3215 = vmatprep.mubr.msk.f32.mxu0 %vm3884_vm0, %v3885_v1 }
 0x24c   : > { %3359 = vmatprep.subr.bf16.mxu0 %v3883_v0 }
 0x24e   : > { %3216 = vmatmul.mubr.msk.f32.vlgmr.msra.gmra.mrb[4].mxu0 %vm875_vm2, %v1381_v19 }
 0x24f   : > { %3231 = vmatprep.mubr.msk.f32.mxu0 %vm3884_vm0, %v3885_v1 }
 0x315   : > { %v946_v20 = vpop.f32.mrb[2].mxu1 }
 0x316   : > { %v3187_v21 = vpop.f32.mrb[3].mxu1  ;;  %v950_v22 = vsel %vm875_vm2, %v946_v20, -inf }
 0x317   : > { %951 = vmax.xlane.f32.xlu1 %v950_v22 }
 0x319   : > { %v1112_v23 = vpop.f32.mrb[0].mxu0 }
 0x31a   : > { %v3197_v24 = vpop.f32.mrb[1].mxu0  ;;  %v1116_v25 = vsel %vm875_vm2, %v1112_v23, -inf }
 0x31b   : > { %1117 = vmax.xlane.f32.xlu0 %v1116_v25  ;;  %v3048_v25 = vld [vmem:[#allocation6] ss:$0 sm:$0xff] }
 0x31d   : > { %v1283_v26 = vpop.f32.mrb[2].mxu0 }
 0x31e   : > { %v3207_v27 = vpop.f32.mrb[3].mxu0  ;;  %v1287_v28 = vsel %vm875_vm2, %v1283_v26, -inf }
 0x31f   : > { %1288 = vmax.xlane.f32.xlu0 %v1287_v28 }
 0x321   : > { %v1454_v29 = vpop.f32.mrb[4].mxu0 }
 0x322   : > { %v3217_v30 = vpop.f32.mrb[5].mxu0  ;;  %v1458_v31 = vsel %vm875_vm2, %v1454_v29, -inf }
 0x328   : > { %1125 = vrot.lane.b32.xlu1 %v869_v11, %s3893_s19  ;;  %s4686_s19 = smov 16  }
 0x335   : > { %959 = vrot.lane.b32.xlu0 %v869_v11, %s3894_s1  ;;  %s4749_s1 = smov 8  }
 0x339   : > { %1467 = vrot.lane.b32.xlu0 %v869_v11, %s3895_s5  ;;  %s4734_s5 = sld [smem:[#allocation24_spill]] }
 0x33f   : > { %v1552_v6 = vld [vmem:[%s4734_s5] sm:$0xff]  ;;  %v1553_v7 = vld [vmem:[%s4734_s5 + $0x8] sm:$0xff]  ;;  %v1554_v12 = vld [vmem:[%s4734_s5 + $0x10] sm:$0xff] }
 0x340   : > { %v1555_v13 = vld [vmem:[%s4734_s5 + $0x18] sm:$0xff] }
 0x341   : > { %v3363_v16 = vpack.c.bf16 %v1555_v13, %v1554_v12 }
 0x34c   : > { %1459 = vmax.xlane.f32.xlu1 %v1458_v31  ;;  %v1751_v31 = vld [vmem:[%s4735_s8] sm:$0xff] }
 0x35d   : > { %1296 = vrot.lane.b32.xlu1 %v869_v11, %s3896_s24  ;;  %s4683_s24 = smov 8   ;;  %v3360_v11 = vpack.c.bf16 %v1553_v7, %v1552_v6  ;;  %v3052_v7 = vld [vmem:[#allocation8] ss:$0 sm:$0xff] }
 0x35f   : > { %3361 = vmatpush3.bf16.msra.mxu0 %v3360_v11 }
 0x360   : > { %3362 = vmatprep.subr.bf16.mxu0 %v3883_v0 }
 0x363   : > { %3364 = vmatpush3.bf16.msra.mxu0 %v3363_v16 }
 0x3a4   : > { %v952_v32 = vpop.xlane.xlu1 %951 }
 0x3a5   : > { %v953_v33 = vsub.f32 %v946_v20, %v952_v32  ;;  %v1752_v32 = vld [vmem:[%s4735_s8 + $0x8] sm:$0xff] }
 0x3a7   : > { %v954_v34 = vmul.f32 1.442695, %v953_v33  ;;  %v3371_v33 = vpack.c.bf16 %v1752_v32, %v1751_v31 }
 0x3a8   : > { %v1118_v35 = vpop.xlane.xlu0 %1117  ;;  %v1126_v43 = vpop.permute.xlu1 %1125 }
 0x3a9   : > { %3587 = vpow2.f32 %v954_v34  ;;  %v1119_v36 = vsub.f32 %v1112_v23, %v1118_v35  ;;  %3372 = vmatprep.subr.bf16.mxu0 %v3371_v33 }
 0x3ab   : > { %v1120_v37 = vmul.f32 1.442695, %v1119_v36 }
 0x3ac   : > { %v1289_v38 = vpop.xlane.xlu0 %1288 }
 0x3ad   : > { %3589 = vpow2.f32 %v1120_v37  ;;  %v1290_v39 = vsub.f32 %v1283_v26, %v1289_v38  ;;  %v1753_v38 = vld [vmem:[%s4735_s8 + $0x10] sm:$0xff] }
 0x3af   : > { %v1291_v40 = vmul.f32 1.442695, %v1290_v39  ;;  %v1754_v39 = vld [vmem:[%s4735_s8 + $0x18] sm:$0xff] }
 0x3b0   : > { %v960_v41 = vpop.permute.xlu0 %959 }
 0x3b1   : > { %3591 = vpow2.f32 %v1291_v40  ;;  %3189 = vmatpush3.msra.mxu1 %v960_v41  ;;  %v3375_v40 = vpack.c.bf16 %v1754_v39, %v1753_v38  ;;  %v785_v41 = vld [vmem:[%s783_s6] sm:$0xff] }
 0x3b2   : > { %3198 = vmatprep.subr.mxu1 %v3885_v1 }
 0x3b3   : > { %v3588_v42 = vpop.eup %3587 }
 0x3b4   : > { %3191 = vmatmul.mubr.msk.f32.vlgmr.msra.gmra.mrb[4].mxu1 %vm875_vm2, %v3588_v42  ;;  %v956_v48 = vsel %vm875_vm2, %v3588_v42, 0.0  ;;  %v1468_v53 = vpop.permute.xlu0 %1467  ;;  %v786_v42 = vld [vmem:[%s783_s6 + $0x8] sm:$0xf]  ;;  %s4743_s6 = smov 112  }
 0x3b5   : > { %3199 = vmatpush3.msra.mxu1 %v1126_v43  ;;  %3200 = vmatprep.mubr.msk.f32.mxu1 %vm3884_vm0, %v3885_v1  ;;  %v1667_v43 = vld [vmem:[%s4737_s2] sm:$0xff] }
 0x3b6   : > { %3208 = vmatprep.subr.mxu1 %v3885_v1 }
 0x3b7   : > { %v3590_v44 = vpop.eup %3589 }
 0x3b8   : > { %3201 = vmatmul.mubr.msk.f32.vlgmr.msra.gmra.mrb[6].mxu1 %vm875_vm2, %v3590_v44  ;;  %v1122_v45 = vsel %vm875_vm2, %v3590_v44, 0.0  ;;  %v1668_v44 = vld [vmem:[%s4737_s2 + $0x8] sm:$0xff] }
 0x3b9   : > { %1123 = vadd.xlane.f32.xlu1 %v1122_v45  ;;  %3210 = vmatprep.mubr.msk.f32.mxu1 %vm3884_vm0, %v3885_v1  ;;  %v3366_v45 = vpack.c.bf16 %v1668_v44, %v1667_v43 }
 0x3bb   : > { %v3592_v46 = vpop.eup %3591 }
 0x3bc   : > { %v1293_v47 = vsel %vm875_vm2, %v3592_v46, 0.0 }
 0x3bd   : > { %1294 = vadd.xlane.f32.xlu0 %v1293_v47  ;;  %957 = vadd.xlane.f32.xlu1 %v956_v48  ;;  %v1670_v47 = vld [vmem:[%s4737_s2 + $0x18] sm:$0xff] }
 0x3d9   : > { %v1460_v49 = vpop.xlane.xlu1 %1459 }
 0x3da   : > { %v1461_v50 = vsub.f32 %v1454_v29, %v1460_v49 }
 0x3dc   : > { %v1462_v51 = vmul.f32 1.442695, %v1461_v50 }
 0x3dd   : > { %v1297_v52 = vpop.permute.xlu1 %1296 }
 0x3de   : > { %3593 = vpow2.f32 %v1462_v51  ;;  %3209 = vmatpush3.msra.mxu1 %v1297_v52 }
 0x3df   : > { %3211 = vmatmul.mubr.msk.f32.vlgmr.msra.gmra.mrb[8].mxu1 %vm875_vm2, %v3592_v46  ;;  %3218 = vmatprep.subr.mxu1 %v3885_v1  ;;  %v1669_v46 = vld [vmem:[%s4737_s2 + $0x10] sm:$0xff] }
 0x3e0   : > { %3219 = vmatpush3.msra.mxu1 %v1468_v53  ;;  %3220 = vmatprep.mubr.msk.f32.mxu1 %vm3884_vm0, %v3885_v1  ;;  %v3369_v48 = vpack.c.bf16 %v1670_v47, %v1669_v46  ;;  %v3050_v53 = vld [vmem:[%s4660_s16] ss:$0 sm:$0xff] }
 0x3e1   : > { %3365 = vmatprep.subr.bf16.mxu1 %v3883_v0 }
 0x3e8   : > { %v3594_v54 = vpop.eup %3593 }
 0x3e9   : > { %3221 = vmatmul.mubr.msk.f32.vlgmr.msra.gmra.mrb[10].mxu1 %vm875_vm2, %v3594_v54  ;;  %v1464_v55 = vsel %vm875_vm2, %v3594_v54, 0.0 }
 0x3ea   : > { %1465 = vadd.xlane.f32.xlu0 %v1464_v55  ;;  %3242 = vmatprep.mubr.msk.f32.mxu1 %vm3884_vm0, %v3885_v1  ;;  %v3051_v55 = vld [vmem:[%s4661_s17] ss:$0 sm:$0xff] }
 0x3eb   : > { %3367 = vmatpush3.bf16.msra.mxu1 %v3366_v45 }
 0x3ec   : > { %3368 = vmatprep.subr.bf16.mxu1 %v3883_v0 }
 0x3ef   : > { %3370 = vmatpush3.bf16.msra.mxu1 %v3369_v48 }
 0x3f0   : > { %3379 = vmatprep.subr.bf16.mxu1 %v3883_v0 }
 0x446   : > { %v1124_v56 = vpop.xlane.xlu1 %1123 }
 0x44a   : > { %v958_v57 = vpop.xlane.xlu1 %957  ;;  %v1295_v4 = vpop.xlane.xlu0 %1294 }
 0x44b   : > { %3595 = vrcp.f32 %v958_v57 }
 0x44c   : > { %3597 = vrcp.f32 %v1124_v56 }
 0x44d   : > { %3599 = vrcp.f32 %v1295_v4 }
 0x455   : > { %v3596_v58 = vpop.eup %3595 }
 0x456   : > { %v3598_v62 = vpop.eup %3597 }
 0x457   : > { %v3600_v9 = vpop.eup %3599 }
 0x477   : > { %v1466_v5 = vpop.xlane.xlu0 %1465 }
 0x478   : > { %3601 = vrcp.f32 %v1466_v5 }
 0x482   : > { %v3602_v17 = vpop.eup %3601 }
 0x487   : > { %v1031_v59 = vpop.f32.mrb[4].mxu1 }
 0x488   : > { %v1036_v60 = vmul.f32 %v3596_v58, %v1031_v59  ;;  %v3192_v61 = vpop.f32.mrb[5].mxu1  ;;  %v3054_v58 = vld [vmem:[#allocation9] ss:$0 sm:$0xff] }
 0x48a   : > { %1037 = vst.msk [vmem:[#allocation2] sm:$0xff] %vm875_vm2, %v1036_v60 }
 0x48b   : > { %v1197_v63 = vpop.f32.mrb[6].mxu1 }
 0x48c   : > { %v1202_v2 = vmul.f32 %v3598_v62, %v1197_v63  ;;  %v3202_v3 = vpop.f32.mrb[7].mxu1 }
 0x48e   : > { %1204 = vrot.lane.b32.xlu0 %v1202_v2, %s4683_s24  ;;  %s4748_s24 = smov 72  }
 0x4b2   : > { %v1368_v10 = vpop.f32.mrb[8].mxu1 }
 0x4b3   : > { %v1373_v14 = vmul.f32 %v3600_v9, %v1368_v10  ;;  %v3212_v15 = vpop.f32.mrb[9].mxu1 }
 0x4b5   : > { %1375 = vrot.lane.b32.xlu1 %v1373_v14, %s4686_s19  ;;  %s4742_s19 = smov 96  }
 0x4bc   : > { %v1539_v18 = vpop.f32.mrb[10].mxu1 }
 0x4bd   : > { %v1544_v19 = vmul.f32 %v3602_v17, %v1539_v18  ;;  %v3222_v20 = vpop.f32.mrb[11].mxu1 }
 0x4bf   : > { %1546 = vrot.lane.b32.xlu1 %v1544_v19, %s4685_s7  ;;  %s4744_s7 = smov 80  }
 0x500   : > { %v1205_v21 = vpop.permute.xlu0 %1204 }
 0x501   : > { %1208 = vst.msk [vmem:[#allocation2] sm:$0xff] %vm1207_vm3, %v1205_v21 }
 0x527   : > { %v1376_v22 = vpop.permute.xlu1 %1375 }
 0x528   : > { %1379 = vst.msk [vmem:[#allocation2] sm:$0xff] %vm1378_vm4, %v1376_v22 }
 0x531   : > { %v1547_v23 = vpop.permute.xlu1 %1546 }
 0x532   : > { %1550 = vst.msk [vmem:[#allocation2] sm:$0xff] %vm1549_vm5, %v1547_v23 }
 0x539   : > { %v1551_v24 = vld [vmem:[#allocation2] sm:$0xff] }
 0x53a   : > { %3232 = vmatmul.mubr.msk.f32.vlgmr.msra.gmra.mrb[6].mxu0 %vm798_vm1, %v1551_v24 }
 0x53b   : > { %3374 = vmatpush3.bf16.msra.mxu0 %v3371_v33  ;;  %3253 = vmatprep.mubr.msk.f32.mxu0 %vm798_vm1, %v785_v41 }
 0x53c   : > { %3376 = vmatprep.subr.bf16.mxu0 %v3375_v40 }
 0x53f   : > { %3378 = vmatpush3.bf16.msra.mxu0 %v3375_v40 }
 0x540   : > { %3383 = vmatprep.subr.bf16.mxu0 %v3883_v0 }
 0x542   : > { %3254 = vmatmul.mubr.msk.f32.vlgmr.msra.gmra.mrb[8].mxu0 %vm798_vm1, %v786_v42 }
 0x543   : > { %3267 = vmatprep.mubr.msk.f32.mxu0 %vm3884_vm0, %v3885_v1 }
 0x60d   : > { %v1632_v26 = vpop.f32.mrb[6].mxu0 }
 0x60e   : > { %v1633_v27 = vadd.f32 %v3048_v25, %v1632_v26  ;;  %v3233_v28 = vpop.f32.mrb[7].mxu0 }
 0x610   : > { %v1636_v29 = vadd.f32 %v1633_v27, %v4292_v8 }
 0x612   : > { %v1639_v30 = vsel %vm798_vm1, %v1636_v29, 0.0 }
 0x613   : > { %1640 = vadd.xlane.f32.xlu0 %v1639_v30 }
 0x615   : > { %v3255_v59 = vpop.f32.mrb[8].mxu0 }
 0x616   : > { %v1840_v60 = vadd.f32 %v3255_v59, %v3054_v58  ;;  %v1834_v61 = vpop.f32.mrb[9].mxu0 }
 0x617   : > { %v1835_v62 = vadd.f32 %v3054_v58, %v1834_v61 }
 0x619   : > { %v4431_v2 = vpack.i.bf16 %v1840_v60, %v1835_v62  ;;  %v3380_v3 = vpack.c.bf16 %v1840_v60, %v1835_v62 }
 0x629   : > { %3553 = vrot.lane.b32.xlu0 %v4431_v2, %s4740_s22 }
 0x6a0   : > { %v1641_v34 = vpop.xlane.xlu0 %1640 }
 0x6a1   : > { %v1643_v35 = vmul.f32 0.03125, %v1641_v34 }
 0x6a3   : > { %v1644_v36 = vsub.f32 %v1636_v29, %v1643_v35 }
 0x6a4   : > { %v3554_v4 = vpop.permute.xlu0 %3553 }
 0x6a5   : > { %v1645_v37 = vmul.f32 %v1644_v36, %v1644_v36  ;;  %v3556_v5 = vunpack.i.h.bf16 %v3554_v4  ;;  %v3555_v6 = vunpack.i.l.bf16 %v3554_v4 }
 0x6a7   : > { %v1646_v8 = vsel %vm798_vm1, %v1645_v37, 0.0  ;;  %v3388_v10 = vpack.c.bf16 %v3556_v5, %v3555_v6 }
 0x6a8   : > { %1647 = vadd.xlane.f32.xlu1 %v1646_v8 }
 0x735   : > { %v1648_v49 = vpop.xlane.xlu1 %1647 }
 0x736   : > { %v1649_v50 = vmul.f32 0.03125, %v1648_v49 }
 0x738   : > { %v1650_v51 = vadd.f32 1e-05, %v1649_v50 }
 0x73a   : > { %3603 = vrsqrt.f32 %v1650_v51 }
 0x744   : > { %v3604_v52 = vpop.eup %3603 }
 0x745   : > { %v1652_v54 = vmul.f32 %v3604_v52, %v1644_v36 }
 0x747   : > { %v1659_v56 = vmul.f32 %v3050_v53, %v1652_v54 }
 0x749   : > { %v4419_v57 = vadd.f32 %v3051_v55, %v1659_v56 }
 0x74b   : > { %3243 = vmatmul.mubr.msk.f32.vlgmr.msra.gmra.mrb[12].mxu1 %vm798_vm1, %v4419_v57 }
 0x74c   : > { %3260 = vmatprep.mubr.msk.f32.mxu1 %vm3884_vm0, %v3885_v1  ;;  %3382 = vmatpush3.bf16.xpose.msk.msra.mxu1 %vm4427_vm6, %v3380_v3 }
 0x74d   : > { %3387 = vmatprep.subr.bf16.mxu1 %v3883_v0 }
 0x81e   : > { %v1747_v9 = vpop.f32.mrb[12].mxu1 }
 0x81f   : > { %v1748_v11 = vadd.f32 %v3052_v7, %v1747_v9  ;;  %v3244_v12 = vpop.f32.mrb[13].mxu1 }
 0x821   : > { %2016 = vrot.lane.b32.xlu1 %v1748_v11, %s4740_s22  ;;  %3261 = vmatmul.mubr.msk.f32.vlgmr.msra.gmra.mrb[14].mxu1 %vm875_vm2, %v1748_v11  ;;  %s4751_s22 = smov 24  }
 0x822   : > { %3390 = vmatpush3.bf16.xpose.msk.msra.mxu1 %vm4427_vm6, %v3388_v10  ;;  %3274 = vmatprep.mubr.msk.f32.mxu1 %vm3884_vm0, %v3885_v1 }
 0x823   : > { %3399 = vmatprep.subr.bf16.mxu1 %v3883_v0 }
 0x825   : > { %3563 = vrot.lane.b32.xlu1 %v4431_v2, %s4741_s13 }
 0x893   : > { %v2017_v13 = vpop.permute.xlu1 %2016 }
 0x894   : > { %3275 = vmatmul.mubr.msk.f32.vlgmr.msra.gmra.mrb[16].mxu1 %vm875_vm2, %v2017_v13 }
 0x895   : > { %3295 = vmatprep.mubr.msk.f32.mxu1 %vm3884_vm0, %v3885_v1 }
 0x897   : > { %v3564_v28 = vpop.permute.xlu1 %3563 }
 0x898   : > { %v3566_v29 = vunpack.i.h.bf16 %v3564_v28  ;;  %v3565_v30 = vunpack.i.l.bf16 %v3564_v28 }
 0x89a   : > { %v3392_v32 = vpack.c.bf16 %v3566_v29, %v3565_v30  ;;  %v2551_v30 = vld [vmem:[#allocation11] sm:$0xff] }
 0x8f4   : > { %v1918_v14 = vpop.f32.mrb[14].mxu1 }
 0x8f5   : > { %v3262_v15 = vpop.f32.mrb[15].mxu1  ;;  %v1923_v16 = vsel %vm1922_vm7, %v1918_v14, -inf }
 0x8f6   : > { %1924 = vmax.xlane.f32.xlu0 %v1923_v16 }
 0x90c   : > { %3558 = vrot.lane.b32.xlu0 %v4431_v2, %s4742_s19  ;;  %s4757_s19 = sld [smem:[#allocation37_spill]] }
 0x910   : > { %3568 = vrot.lane.b32.xlu0 %v4431_v2, %s4743_s6 }
 0x967   : > { %v2094_v17 = vpop.f32.mrb[16].mxu1 }
 0x968   : > { %v3276_v18 = vpop.f32.mrb[17].mxu1  ;;  %v2098_v19 = vsel %vm1922_vm7, %v2094_v17, -inf }
 0x969   : > { %2099 = vmax.xlane.f32.xlu1 %v2098_v19 }
 0x97a   : > { %2194 = vrot.lane.b32.xlu1 %v1748_v11, %s4743_s6  ;;  %s4752_s6 = sld [smem:[#allocation34_spill]] }
 0x97e   : > { %3573 = vrot.lane.b32.xlu1 %v4431_v2, %s4744_s7  ;;  %s4758_s7 = sshll.u32 %s4251_s9, 3 }
 0x982   : > { %3578 = vrot.lane.b32.xlu1 %v4431_v2, %s4745_s27 }
 0x983   : > { %v1925_v20 = vpop.xlane.xlu0 %1924 }
 0x984   : > { %v1926_v21 = vsub.f32 %v1918_v14, %v1925_v20 }
 0x986   : > { %v1927_v22 = vmul.f32 1.442695, %v1926_v21  ;;  %2372 = vrot.lane.b32.xlu1 %v1748_v11, %s4745_s27  ;;  %s778_s27 = scalar_lea.vmem [#allocation14], %s4758_s7 }
 0x987   : > { %v3559_v23 = vpop.permute.xlu0 %3558 }
 0x988   : > { %3605 = vpow2.f32 %v1927_v22  ;;  %v3561_v24 = vunpack.i.h.bf16 %v3559_v23  ;;  %v3560_v25 = vunpack.i.l.bf16 %v3559_v23 }
 0x98a   : > { %v3384_v27 = vpack.c.bf16 %v3561_v24, %v3560_v25 }
 0x98b   : > { %v3569_v37 = vpop.permute.xlu0 %3568 }
 0x98c   : > { %3386 = vmatpush3.bf16.msk.msra.mxu0 %vm4462_vm10, %v3384_v27  ;;  %v3571_v40 = vunpack.i.h.bf16 %v3569_v37  ;;  %v3570_v41 = vunpack.i.l.bf16 %v3569_v37 }
 0x98d   : > { %3391 = vmatprep.subr.bf16.mxu0 %v3883_v0 }
 0x98e   : > { %v3396_v44 = vpack.c.bf16 %v3571_v40, %v3570_v41  ;;  %v3077_v41 = vld [vmem:[#allocation12] ss:$0 sm:$0xff] }
 0x992   : > { %v4469_v31 = vpop.eup %3605 }
 0x993   : > { %3268 = vmatmul.mubr.msk.f32.vlgmr.msra.gmra.mrb[10].mxu0 %vm1922_vm7, %v4469_v31  ;;  %v1929_v12 = vsel %vm1922_vm7, %v4469_v31, 0.0  ;;  %v2552_v31 = vld [vmem:[#allocation11 + $0x8] sm:$0xff] }
 0x994   : > { %3394 = vmatpush3.bf16.msk.msra.mxu0 %vm4462_vm10, %v3392_v32  ;;  %3281 = vmatprep.mubr.msk.f32.mxu0 %vm3884_vm0, %v3885_v1  ;;  %v3412_v32 = vpack.c.bf16 %v2552_v31, %v2551_v30 }
 0x995   : > { %3395 = vmatprep.subr.bf16.mxu0 %v3883_v0 }
 0x9f6   : > { %v2100_v33 = vpop.xlane.xlu1 %2099 }
 0x9f7   : > { %v2101_v34 = vsub.f32 %v2094_v17, %v2100_v33  ;;  %v2553_v33 = vld [vmem:[#allocation11 + $0x10] sm:$0xff] }
 0x9f9   : > { %v2102_v35 = vmul.f32 1.442695, %v2101_v34  ;;  %v2554_v34 = vld [vmem:[#allocation11 + $0x18] sm:$0xff] }
 0x9fa   : > { %v2195_v36 = vpop.permute.xlu1 %2194 }
 0x9fb   : > { %3607 = vpow2.f32 %v2102_v35  ;;  %v3415_v35 = vpack.c.bf16 %v2554_v34, %v2553_v33 }
 0x9fe   : > { %v3574_v8 = vpop.permute.xlu1 %3573 }
 0x9ff   : > { %v3576_v38 = vunpack.i.h.bf16 %v3574_v8  ;;  %v3575_v39 = vunpack.i.l.bf16 %v3574_v8 }
 0xa01   : > { %v3400_v42 = vpack.c.bf16 %v3576_v38, %v3575_v39 }
 0xa02   : > { %v3579_v60 = vpop.permute.xlu1 %3578 }
 0xa03   : > { %3402 = vmatpush3.bf16.msk.msra.mxu1 %vm4462_vm10, %v3400_v42  ;;  %v3581_v61 = vunpack.i.h.bf16 %v3579_v60  ;;  %v3580_v62 = vunpack.i.l.bf16 %v3579_v60 }
 0xa04   : > { %3403 = vmatprep.subr.bf16.mxu1 %v3883_v0 }
 0xa05   : > { %v3608_v43 = vpop.eup %3607  ;;  %v3404_v4 = vpack.c.bf16 %v3581_v61, %v3580_v62  ;;  %v2753_v61 = vld [vmem:[%s4658_s14 + $0x18] sm:$0xff] }
 0xa06   : > { %3282 = vmatmul.mubr.msk.f32.vlgmr.msra.gmra.mrb[12].mxu0 %vm1922_vm7, %v3608_v43  ;;  %v2104_v63 = vsel %vm1922_vm7, %v3608_v43, 0.0 }
 0xa07   : > { %3398 = vmatpush3.bf16.xpose.msk.msra.mxu0 %vm4427_vm6, %v3396_v44  ;;  %3288 = vmatprep.mubr.msk.f32.mxu0 %vm3884_vm0, %v3885_v1 }
 0xa08   : > { %3407 = vmatprep.subr.bf16.mxu0 %v3883_v0 }
 0xa0e   : > { %3289 = vmatmul.mubr.msk.f32.vlgmr.msra.gmra.mrb[14].mxu0 %vm875_vm2, %v2195_v36 }
 0xa0f   : > { %3309 = vmatprep.mubr.msk.f32.mxu0 %vm3884_vm0, %v3885_v1 }
 0xa66   : > { %v4490_v45 = vpop.f32.mrb[10].mxu0 }
 0xa67   : > { %v3269_v46 = vpop.f32.mrb[11].mxu0 }
 0xad9   : > { %v2183_v47 = vpop.f32.mrb[12].mxu0 }
 0xada   : > { %v3283_v48 = vpop.f32.mrb[13].mxu0 }
 0xae1   : > { %v2272_v49 = vpop.f32.mrb[14].mxu0 }
 0xae2   : > { %v3290_v50 = vpop.f32.mrb[15].mxu0  ;;  %v2276_v51 = vsel %vm1922_vm7, %v2272_v49, -inf }
 0xae3   : > { %2277 = vmax.xlane.f32.xlu0 %v2276_v51 }
 0xaf9   : > { %3583 = vrot.lane.b32.xlu0 %v4431_v2, %s4748_s24  ;;  %v2373_v2 = vpop.permute.xlu1 %2372  ;;  %s4753_s24 = sld [smem:[#allocation35_spill]] }
 0xb70   : > { %v2278_v52 = vpop.xlane.xlu0 %2277 }
 0xb71   : > { %v2279_v53 = vsub.f32 %v2272_v49, %v2278_v52  ;;  %v2666_v52 = vld [vmem:[%s4656_s12 + $0x8] sm:$0xff] }
 0xb73   : > { %v2280_v54 = vmul.f32 1.442695, %v2279_v53 }
 0xb74   : > { %v3584_v55 = vpop.permute.xlu0 %3583 }
 0xb75   : > { %3609 = vpow2.f32 %v2280_v54  ;;  %v3586_v56 = vunpack.i.h.bf16 %v3584_v55  ;;  %v3585_v58 = vunpack.i.l.bf16 %v3584_v55  ;;  %v2668_v54 = vld [vmem:[%s4656_s12 + $0x18] sm:$0xff] }
 0xb77   : > { %v3408_v59 = vpack.c.bf16 %v3586_v56, %v3585_v58  ;;  %v2750_v56 = vld [vmem:[%s4658_s14] sm:$0xff]  ;;  %v2751_v58 = vld [vmem:[%s4658_s14 + $0x8] sm:$0xff] }
 0xb78   : > { %v3424_v60 = vpack.c.bf16 %v2751_v58, %v2750_v56 }
 0xb79   : > { %3410 = vmatpush3.bf16.msk.msra.mxu0 %vm4462_vm10, %v3408_v59  ;;  %v2752_v59 = vld [vmem:[%s4658_s14 + $0x10] sm:$0xff] }
 0xb7a   : > { %3411 = vmatprep.subr.bf16.mxu0 %v3883_v0  ;;  %v3427_v62 = vpack.c.bf16 %v2753_v61, %v2752_v59 }
 0xb7f   : > { %v3610_v3 = vpop.eup %3609 }
 0xb80   : > { %3296 = vmatmul.mubr.msk.f32.vlgmr.msra.gmra.mrb[18].mxu1 %vm1922_vm7, %v3610_v3  ;;  %v2282_v11 = vsel %vm1922_vm7, %v3610_v3, 0.0  ;;  %v2754_v3 = vld [vmem:[%s4658_s14 + $0x20] sm:$0xff] }
 0xb81   : > { %3406 = vmatpush3.bf16.xpose.msk.msra.mxu1 %vm4427_vm6, %v3404_v4  ;;  %3302 = vmatprep.mubr.msk.f32.mxu1 %vm3884_vm0, %v3885_v1  ;;  %v2755_v4 = vld [vmem:[%s4658_s14 + $0x28] sm:$0xff] }
 0xb82   : > { %3417 = vmatprep.subr.bf16.mxu1 %v3883_v0 }
 0xb88   : > { %3303 = vmatmul.mubr.msk.f32.vlgmr.msra.gmra.mrb[20].mxu1 %vm875_vm2, %v2373_v2  ;;  %v3430_v2 = vpack.c.bf16 %v2755_v4, %v2754_v3 }
 0xb89   : > { %3331 = vmatprep.mubr.msk.f32.mxu1 %vm3884_vm0, %v3885_v1 }
 0xc53   : > { %v2361_v5 = vpop.f32.mrb[18].mxu1 }
 0xc54   : > { %v3297_v6 = vpop.f32.mrb[19].mxu1 }
 0xc5b   : > { %v2450_v7 = vpop.f32.mrb[20].mxu1 }
 0xc5c   : > { %v3304_v9 = vpop.f32.mrb[21].mxu1  ;;  %v2454_v10 = vsel %vm1922_vm7, %v2450_v7, -inf }
 0xc5d   : > { %2455 = vmax.xlane.f32.xlu1 %v2454_v10  ;;  %v3079_v10 = vld [vmem:[%s4752_s6] ss:$0 sm:$0xff]  ;;  %s4754_s6 = sld [smem:[#allocation32_spill]] }
 0xc61   : > { %2105 = vadd.xlane.f32.xlu1 %v2104_v63 }
 0xc65   : > { %2283 = vadd.xlane.f32.xlu1 %v2282_v11  ;;  %v3080_v11 = vld [vmem:[%s4753_s24] ss:$0 sm:$0xff]  ;;  %s4755_s24 = sld [smem:[#allocation33_spill]] }
 0xc69   : > { %1930 = vadd.xlane.f32.xlu1 %v1929_v12 }
 0xcea   : > { %v2456_v13 = vpop.xlane.xlu1 %2455 }
 0xceb   : > { %v2457_v14 = vsub.f32 %v2450_v7, %v2456_v13 }
 0xced   : > { %v2458_v15 = vmul.f32 1.442695, %v2457_v14  ;;  %v2757_v14 = vld [vmem:[%s4658_s14 + $0x38] sm:$0xff] }
 0xcee   : > { %v2106_v16 = vpop.xlane.xlu1 %2105 }
 0xcef   : > { %3611 = vpow2.f32 %v2458_v15 }
 0xcf0   : > { %3613 = vrcp.f32 %v2106_v16  ;;  %v3081_v16 = vld [vmem:[%s4754_s6] ss:$0 sm:$0xff]  ;;  %s3088_s6 = sshll.u32 %s4038_s23, 7  ;;  %s3901_s23 = smov [#allocation14]  }
 0xcf1   : > { %s4599_s11 = scalar_lea.hbm %s4759_s10, %s3088_s6 }
 0xcf2   : > { %v2284_v17 = vpop.xlane.xlu1 %2283 }
 0xcf3   : > { %3615 = vrcp.f32 %v2284_v17 }
 0xcf6   : > { %v1931_v18 = vpop.xlane.xlu1 %1930 }
 0xcf7   : > { %3617 = vrcp.f32 %v1931_v18 }
 0xcf9   : > { %v3612_v19 = vpop.eup %3611 }
 0xcfa   : > { %v3614_v20 = vpop.eup %3613  ;;  %3310 = vmatmul.mubr.msk.f32.vlgmr.msra.gmra.mrb[16].mxu0 %vm1922_vm7, %v3612_v19  ;;  %v2460_v21 = vsel %vm1922_vm7, %v3612_v19, 0.0 }
 0xcfb   : > { %2461 = vadd.xlane.f32.xlu0 %v2460_v21  ;;  %v2188_v22 = vmul.f32 %v3614_v20, %v2183_v47  ;;  %3320 = vmatprep.mubr.msk.f32.mxu0 %vm3884_vm0, %v3885_v1  ;;  %v3083_v21 = vld [vmem:[%s4755_s24] ss:$0 sm:$0xff]  ;;  %s2884_s24 = sshll.u32 %s778_s27, 4  ;;  %s4601_s24 = int_to_ptr.vmem [resolvable:$true] %s2884_s24 }
 0xcfc   : > { %3413 = vmatpush3.bf16.msra.mxu0 %v3412_v32 }
 0xcfd   : > { %v3616_v23 = vpop.eup %3615  ;;  %2190 = vrot.lane.b32.xlu1 %v2188_v22, %s4749_s1  ;;  %3414 = vmatprep.subr.bf16.mxu0 %v3883_v0  ;;  %s2871_s1 = scalar_lea.sflag [#allocation5], %s4251_s9 }
 0xcfe   : > { %v2366_v24 = vmul.f32 %v3616_v23, %v2361_v5 }
 0xd00   : > { %3416 = vmatpush3.bf16.msra.mxu0 %v3415_v35 }
 0xd01   : > { %v3618_v25 = vpop.eup %3617  ;;  %2368 = vrot.lane.b32.xlu1 %v2366_v24, %s4750_s0  ;;  %3423 = vmatprep.subr.bf16.mxu0 %v3883_v0  ;;  %s3795_s0 = scalar_lea.vmem %s4601_s24, 128 }
 0xd02   : > { %v2014_v26 = vmul.f32 %v3618_v25, %v4490_v45  ;;  %p3796_p10 = scmp.ne.s32.totalorder %s4601_s24, %s3795_s0 }
 0xd04   : > { %2015 = vst.msk [vmem:[#allocation2] sm:$0xff] %vm875_vm2, %v2014_v26  ;;  %p3797_p1 = pnand %p3796_p10, %p4760_p4 }
 0xd06   : > { %p3798_p13 = pneg %p3797_p1 }
 0xd6f   : > { %v2191_v27 = vpop.permute.xlu1 %2190 }
 0xd70   : > { %2193 = vst.msk [vmem:[#allocation2] sm:$0xff] %vm1207_vm3, %v2191_v27 }
 0xd73   : > { %v2369_v28 = vpop.permute.xlu1 %2368 }
 0xd74   : > { %2371 = vst.msk [vmem:[#allocation2] sm:$0xff] %vm1378_vm4, %v2369_v28 }
 0xd88   : > { %v2462_v29 = vpop.xlane.xlu0 %2461 }
 0xd89   : > { %3619 = vrcp.f32 %v2462_v29 }
 0xd93   : > { %v3620_v36 = vpop.eup %3619 }
 0xdcd   : > { %v2539_v37 = vpop.f32.mrb[16].mxu0 }
 0xdce   : > { %v2544_v8 = vmul.f32 %v3620_v36, %v2539_v37  ;;  %v3311_v38 = vpop.f32.mrb[17].mxu0 }
 0xdd0   : > { %2546 = vrot.lane.b32.xlu1 %v2544_v8, %s4751_s22  ;;  %s4756_s22 = sld [smem:[#allocation36_spill]]  ;;  %v3086_v8 = vld [vmem:[%s4757_s19] ss:$0 sm:$0xff] }
 0xdd6   : > { %v3085_v36 = vld [vmem:[%s4756_s22] ss:$0 sm:$0xff]  ;;  %s3799_s22 = sshll.u32 %s3901_s23, 4  ;;  %s3800_s22 = int_to_ptr.vmem [resolvable:$false] %s3799_s22 }
 0xdd7   : > { %s3801_s13 = scalar_lea.vmem %s3800_s22, 256  ;;  %p3802_p0 = scmp.lt.s32.totalorder %s4601_s24, %s3800_s22 }
 0xdd8   : > { %p3803_p2 = scmp.lt.s32.totalorder %s3801_s13, %s3795_s0 }
 0xdda   : > { %p3804_p3 = por %p3803_p2, %p3802_p0 }
 0xddc   : > { %p3805_p6 = pnand %p3804_p3, %p3798_p13 }
 0xe42   : > { %v2547_v39 = vpop.permute.xlu1 %2546 }
 0xe43   : > { %2549 = vst.msk [vmem:[#allocation2] sm:$0xff] %vm1549_vm5, %v2547_v39 }
 0xe4a   : > { %v2550_v40 = vld [vmem:[#allocation2] sm:$0xff] }
 0xe4b   : > { %3321 = vmatmul.mubr.msk.f32.vlgmr.msra.gmra.mrb[18].mxu0 %vm798_vm1, %v2550_v40 }
 0xe4c   : > { %3350 = vmatprep.mubr.msk.f32.mxu0 %vm3884_vm0, %v3885_v1  ;;  %v2665_v1 = vld [vmem:[%s4656_s12] sm:$0xff]  ;;  %3425 = vmatpush3.bf16.msra.mxu0 %v3424_v60 }
 0xe4d   : > { %v3418_v53 = vpack.c.bf16 %v2666_v52, %v2665_v1  ;;  %3426 = vmatprep.subr.bf16.mxu0 %v3883_v0 }
 0xe4f   : > { %3419 = vmatpush3.bf16.msra.mxu1 %v3418_v53 }
 0xe50   : > { %3420 = vmatprep.subr.bf16.mxu1 %v3883_v0  ;;  %3428 = vmatpush3.bf16.msra.mxu0 %v3427_v62 }
 0xe51   : > { %3429 = vmatprep.subr.bf16.mxu0 %v3883_v0 }
 0xe54   : > { %3431 = vmatpush3.bf16.msra.mxu0 %v3430_v2 }
 0xe55   : > { %3432 = vmatprep.subr.bf16.mxu0 %v3883_v0  ;;  %v2756_v0 = vld [vmem:[%s4658_s14 + $0x30] sm:$0xff] }
 0xe56   : > { %v3433_v15 = vpack.c.bf16 %v2757_v14, %v2756_v0 }
 0xe58   : > { %3434 = vmatpush3.bf16.msra.mxu0 %v3433_v15 }
 0xf1e   : > { %v2631_v42 = vpop.f32.mrb[18].mxu0 }
 0xf1f   : > { %v2632_v43 = vadd.f32 %v3077_v41, %v2631_v42  ;;  %v3322_v44 = vpop.f32.mrb[19].mxu0 }
 0xf21   : > { %v2635_v45 = vadd.f32 %v2632_v43, %v4419_v57  ;;  %v2667_v57 = vld [vmem:[%s4656_s12 + $0x10] sm:$0xff] }
 0xf22   : > { %v3421_v55 = vpack.c.bf16 %v2668_v54, %v2667_v57 }
 0xf23   : > { %v2638_v46 = vsel %vm798_vm1, %v2635_v45, 0.0 }
 0xf24   : > { %2639 = vadd.xlane.f32.xlu0 %v2638_v46  ;;  %3422 = vmatpush3.bf16.msra.mxu1 %v3421_v55 }
 0xfb1   : > { %v2640_v47 = vpop.xlane.xlu0 %2639 }
 0xfb2   : > { %v2641_v48 = vmul.f32 0.03125, %v2640_v47 }
 0xfb4   : > { %v2642_v49 = vsub.f32 %v2635_v45, %v2641_v48 }
 0xfb6   : > { %v2643_v50 = vmul.f32 %v2642_v49, %v2642_v49 }
 0xfb8   : > { %v2644_v51 = vsel %vm798_vm1, %v2643_v50, 0.0 }
 0xfb9   : > { %2645 = vadd.xlane.f32.xlu1 %v2644_v51 }
0x1046   : > { %v2646_v5 = vpop.xlane.xlu1 %2645 }
0x1047   : > { %v2647_v6 = vmul.f32 0.03125, %v2646_v5 }
0x1049   : > { %v2648_v7 = vadd.f32 1e-05, %v2647_v6 }
0x104b   : > { %3621 = vrsqrt.f32 %v2648_v7 }
0x1055   : > { %v3622_v9 = vpop.eup %3621 }
0x1056   : > { %v2650_v63 = vmul.f32 %v3622_v9, %v2642_v49 }
0x1058   : > { %v2657_v12 = vmul.f32 %v3079_v10, %v2650_v63 }
0x105a   : > { %v2664_v13 = vadd.f32 %v3080_v11, %v2657_v12 }
0x105c   : > { %3332 = vmatmul.mubr.msk.f32.vlgmr.msra.gmra.mrb[22].mxu1 %vm798_vm1, %v2664_v13 }
0x112f   : > { %v2745_v17 = vpop.f32.mrb[22].mxu1 }
0x1130   : > { %v2746_v18 = vadd.f32 %v3081_v16, %v2745_v17  ;;  %v3333_v19 = vpop.f32.mrb[23].mxu1 }
0x1132   : > { %v2749_v20 = vmax.f32 %v2746_v18, 0.0 }
0x1134   : > { %3351 = vmatmul.mubr.msk.f32.vlgmr.msra.gmra.mrb[20].mxu0 %vm2765_vm11, %v2749_v20 }
0x1207   : > { %v2835_v22 = vpop.f32.mrb[20].mxu0 }
0x1208   : > { %v2836_v23 = vadd.f32 %v3083_v21, %v2835_v22  ;;  %v3352_v24 = vpop.f32.mrb[21].mxu0 }
0x120a   : > { %v2839_v25 = vadd.f32 %v2836_v23, %v2664_v13 }
0x120c   : > { %v2842_v26 = vsel %vm798_vm1, %v2839_v25, 0.0 }
0x120d   : > { %2843 = vadd.xlane.f32.xlu0 %v2842_v26 }
0x129a   : > { %v2844_v27 = vpop.xlane.xlu0 %2843 }
0x129b   : > { %v2845_v28 = vmul.f32 0.03125, %v2844_v27 }
0x129d   : > { %v2846_v29 = vsub.f32 %v2839_v25, %v2845_v28 }
0x129f   : > { %v2847_v30 = vmul.f32 %v2846_v29, %v2846_v29 }
0x12a1   : > { %v2848_v31 = vsel %vm798_vm1, %v2847_v30, 0.0 }
0x12a2   : > { %2849 = vadd.xlane.f32.xlu0 %v2848_v31 }
0x132f   : > { %v2850_v32 = vpop.xlane.xlu0 %2849 }
0x1330   : > { %v2851_v33 = vmul.f32 0.03125, %v2850_v32 }
0x1332   : > { %v2852_v34 = vadd.f32 1e-05, %v2851_v33 }
0x1334   : > { %3623 = vrsqrt.f32 %v2852_v34 }
0x133e   : > { %v3624_v35 = vpop.eup %3623 }
0x133f   : > { %v2854_v37 = vmul.f32 %v3624_v35, %v2846_v29 }
0x1341   : > { %v2861_v38 = vmul.f32 %v3085_v36, %v2854_v37 }
0x1343   : > { %v2868_v39 = vadd.f32 %v3086_v8, %v2861_v38 }
0x1345   : > { %2869 = vst.msk [vmem:[%s778_s27] sm:$0xff] %vm798_vm1, %v2868_v39 }
0x1346   : > { %3808 = shalt.err (!%p3805_p6)
}
0x1347   : > { %s3809_s8 = scalar_lea.hbm %s4599_s11, 128  ;;  %s3813_s2 = scalar_lea.hbm %s4759_s10, 256 }
0x1348   : > { %p3810_p11 = scmp.ne.s32.totalorder %s4599_s11, %s3809_s8  ;;  %p3814_p5 = scmp.lt.u32.totalorder %s4599_s11, %s4759_s10 }
0x1349   : > { %p3815_p9 = scmp.lt.u32.totalorder %s3813_s2, %s3809_s8  ;;  %p3817_p10 = scmp.lt.u32.totalorder %s3809_s8, %s4599_s11 }
0x134a   : > { %p3811_p12 = pnand %p3810_p11, %p4760_p4 }
0x134b   : > { %p3816_p7 = por %p3815_p9, %p3814_p5 }
0x134c   : > { %p3812_p8 = pneg %p3811_p12 }
0x134d   : > { %p3818_p1 = por %p3817_p10, %p3816_p7 }
0x134f   : > { %p3819_p13 = pnand %p3818_p1, %p3812_p8 }
0x1351   : > { %3822 = shalt.err (!%p3819_p13)
}
0x1352   : > { %3457 = dma.vmem_to_hbm [thread:$0]  (%p4760_p4), %s4601_s24, 128, %s4599_s11, %s2871_s1  }
0x1353 PF: > { %s2896_s7 = sand.u32 1, %s3861_s3   ;;  %p4761_p0 = scmp.ne.s32.totalorder %s4722_s15, 0 }
0x1354   : > { %p4762_p2 = scmp.ge.s32.totalorder %s3873_s30, 2  ;;  %s2897_s27 = scalar_lea.sflag [#allocation5], %s2896_s7 }
0x1356   : > { %p3480_p3 = pnand %p4762_p2, %p4761_p0 }
0x1358   : > { %3856 = dma.done.wait (!%p3480_p3), %s2897_s27, 128  }
0x1359   : > { %3858 = vsyncadd (!%p3480_p3), %s2897_s27, 4294967168  ;;  %p38_p6 = scmp.ge.s32.totalorder %s4181_s26, 4   ;;  %s4763_s3 = smov %s3865_s28 }
0x135a   : > { %s4764_s28 = smov %s3869_s29  ;;  %s4765_s29 = smov %s4193_s20 }
0x135b   : > { %s4766_s30 = smov %s4181_s26  ;;  %40 = sbr.rel (!%p38_p6) target bundleno = 28 (0x1c), region = 176 }
0x1362   :  { %2902 = vsyncpa [#allocation4], 1 }
0x1363   :  { %2904 = vsyncpa [#allocation4 + $0x1], 1 }
0x1364   :  { %2905 = vsyncpa [#allocation7], 1 }
0x1365   :  { %2906 = vsyncpa [#allocation10], 1 }
0x1366   :  { %2907 = vsyncpa [#allocation13], 1 }
0x1367   :  { %2908 = vsyncpa [#allocation5], 1 }
0x1368   :  { %2910 = vsyncpa [#allocation5 + $0x1], 1 }

// kernel: tpu_custom_call.1
= control target key start
LH: loop header
LB: loop body
LE: loop exit
PB: predicated region body
PF: predicated region fallthrough
CT: control target
= control target key end

     0   :  { %s4644_s0 = inlined_call_operand.hbm [shape: f32[2,8,32], index: 0, kind: input, shape index: {}]   ;;  %s4645_s1 = inlined_call_operand.vmem [shape: f32[2,12,32], index: 1, kind: input, shape index: {}]   ;;  %s4646_s2 = inlined_call_operand.vmem [shape: f32[32,96], index: 2, kind: input, shape index: {}]   ;;  %s4647_s3 = inlined_call_operand.vmem [shape: f32[1,96], index: 3, kind: input, shape index: {}]   ;;  %s4648_s4 = inlined_call_operand.vmem [shape: f32[32,32], index: 4, kind: input, shape index: {}]   ;;  %s4649_s5 = inlined_call_operand.hbm [shape: f32[1,32], index: 5, kind: input, shape index: {}]   ;;  %s4650_s6 = inlined_call_operand.vmem [shape: f32[32,32], index: 6, kind: input, shape index: {}]   ;;  %s4651_s7 = inlined_call_operand.hbm [shape: f32[1,32], index: 7, kind: input, shape index: {}]   ;;  %s4652_s8 = inlined_call_operand.vmem [shape: f32[32,64], index: 8, kind: input, shape index: {}]   ;;  %s4653_s9 = inlined_call_operand.hbm [shape: f32[1,64], index: 9, kind: input, shape index: {}]   ;;  %s4654_s10 = inlined_call_operand.hbm [shape: f32[32,32], index: 10, kind: input, shape index: {}]   ;;  %s4655_s11 = inlined_call_operand.hbm [shape: f32[1,32], index: 11, kind: input, shape index: {}]   ;;  %s4656_s12 = inlined_call_operand.vmem [shape: f32[32,64], index: 12, kind: input, shape index: {}]   ;;  %s4657_s13 = inlined_call_operand.vmem [shape: f32[1,64], index: 13, kind: input, shape index: {}]   ;;  %s4658_s14 = inlined_call_operand.vmem [shape: f32[64,32], index: 14, kind: input, shape index: {}]   ;;  %s4659_s15 = inlined_call_operand.vmem [shape: f32[1,32], index: 15, kind: input, shape index: {}]   ;;  %s4660_s16 = inlined_call_operand.vmem [shape: f32[1,32], index: 16, kind: input, shape index: {}]   ;;  %s4661_s17 = inlined_call_operand.vmem [shape: f32[1,32], index: 17, kind: input, shape index: {}]   ;;  %s4662_s18 = inlined_call_operand.vmem [shape: f32[1,32], index: 18, kind: input, shape index: {}]   ;;  %s4663_s19 = inlined_call_operand.vmem [shape: f32[1,32], index: 19, kind: input, shape index: {}]   ;;  %s4664_s20 = inlined_call_operand.vmem [shape: f32[1,32], index: 20, kind: input, shape index: {}]   ;;  %s4665_s21 = inlined_call_operand.vmem [shape: f32[1,32], index: 21, kind: input, shape index: {}]   ;;  %s4666_s22 = inlined_call_operand.hbm [shape: f32[2,8,32], index: 22, kind: output, shape index: {}]  }
   0x1   :  { %4692 = sst [smem:[#allocation20_spill]] %s4644_s0 }
   0x2   :  { %4693 = sst [smem:[#allocation21_spill]] %s4645_s1 }
   0x3   :  { %4694 = sst [smem:[#allocation22_spill]] %s4646_s2 }
   0x4   :  { %4695 = sst [smem:[#allocation23_spill]] %s4647_s3 }
   0x5   :  { %4696 = sst [smem:[#allocation24_spill]] %s4648_s4 }
   0x6   :  { %4697 = sst [smem:[#allocation25_spill]] %s4649_s5 }
   0x7   :  { %4698 = sst [smem:[#allocation26_spill]] %s4650_s6 }
   0x8   :  { %4699 = sst [smem:[#allocation27_spill]] %s4651_s7 }
   0x9   :  { %4700 = sst [smem:[#allocation28_spill]] %s4652_s8 }
   0xa   :  { %4701 = sst [smem:[#allocation29_spill]] %s4653_s9 }
   0xb   :  { %4702 = sst [smem:[#allocation30_spill]] %s4654_s10 }
   0xc   :  { %4703 = sst [smem:[#allocation31_spill]] %s4655_s11 }
   0xd   :  { %4704 = sst [smem:[#allocation32_spill]] %s4657_s13 }
   0xe   :  { %4705 = sst [smem:[#allocation33_spill]] %s4659_s15 }
   0xf   :  { %4706 = sst [smem:[#allocation34_spill]] %s4662_s18 }
  0x10   :  { %4707 = sst [smem:[#allocation35_spill]] %s4663_s19 }
  0x11   :  { %4708 = sst [smem:[#allocation36_spill]] %s4664_s20 }
  0x12   :  { %4709 = sst [smem:[#allocation37_spill]] %s4665_s21 }
  0x13   :  { %4710 = sst [smem:[#allocation38_spill]] %s4666_s22 }
  0x14   :  { %27 = vsyncpa [#allocation4], 0 }
  0x15   :  { %29 = vsyncpa [#allocation4 + $0x1], 0 }
  0x16   :  { %30 = vsyncpa [#allocation7], 0 }
  0x17   :  { %31 = vsyncpa [#allocation10], 0 }
  0x18   :  { %32 = vsyncpa [#allocation13], 0 }
  0x19   :  { %33 = vsyncpa [#allocation5], 0 }
  0x1a   :  { %35 = vsyncpa [#allocation5 + $0x1], 0  ;;  %s4017_s3 = smov 0   ;;  %s4019_s28 = smov 0  }
  0x1b   :  { %s4021_s29 = smov 0   ;;  %s4023_s30 = smov 0  }
  0x1c LB: > { %s3875_s4 = smov [#allocation6]   ;;  %s4038_s23 = sadd.s32 4294967295, %s3873_s30   ;;  %s3873_s30 = sphi %s4023_s30, %s4766_s30   ;;  %s3869_s29 = sphi %s4021_s29, %s4765_s29   ;;  %s3865_s28 = sphi %s4019_s28, %s4764_s28   ;;  %s3861_s3 = sphi %s4017_s3, %s4763_s3  }
  0x1d   : > { %s566_s0 = sshll.u32 %s3875_s4, 4  ;;  %p3015_p0 = scmp.ge.s32.totalorder %s3873_s30, 1  ;;  %s4043_s0 = int_to_ptr.vmem [resolvable:$true] %s566_s0 }
  0x1e   : > { %p4673_p1 = scmp.eq.s32.totalorder %s4038_s23, 0  ;;  %p544_p2 = scmp.lt.s32.totalorder %s3873_s30, 3 }
  0x1f   : > { %s3876_s5 = smov [#allocation9]   ;;  %s3877_s6 = smov [#allocation8]  }
  0x20   : > { %p4045_p3 = pnand %p3015_p0, %p544_p2  ;;  %s594_s24 = sshll.u32 %s3876_s5, 4  ;;  %s4052_s24 = int_to_ptr.vmem [resolvable:$true] %s594_s24 }
  0x21   : > { %s580_s25 = sshll.u32 %s3877_s6, 4  ;;  %s3878_s2 = smov [#allocation11]   ;;  %s4060_s25 = int_to_ptr.vmem [resolvable:$true] %s580_s25 }
  0x22   : > { %s4711_s1 = scalar_select %p4045_p3, 1, 0 }
  0x23   : > { %p3459_p5 = pneg %p4045_p3  ;;  %s4062_s27 = sshll.u32 %s3878_s2, 4  ;;  %s605_s27 = int_to_ptr.vmem [resolvable:$true] %s4062_s27 }
  0x24   : > { %s4713_s21 = sld [smem:[#allocation25_spill]] }
  0x25   : > { %p4056_p6 = pnand %p3459_p5, %p4673_p1 }
  0x27   : > { %p4072_p8 = pneg %p4056_p6 }
  0x2a   : > { %s3625_s20 = scalar_lea.hbm %s4713_s21, 16 }
  0x2b   : > { %p3626_p7 = scmp.ne.s32.totalorder %s4713_s21, %s3625_s20  ;;  %p3632_p11 = scmp.lt.u32.totalorder %s3625_s20, %s4713_s21 }
  0x2d   : > { %p3628_p9 = pnand %p4072_p8, %p3626_p7 }
  0x2f   : > { %p3629_p10 = pneg %p3628_p9 }
  0x31   : > { %p3634_p12 = pnand %p3632_p11, %p3629_p10 }
  0x33   : > { %3637 = shalt.err (!%p3634_p12)
}
  0x34   : > { %s3638_s15 = scalar_lea.vmem %s4043_s0, 16  ;;  %s3645_s22 = scalar_lea.vmem %s4043_s0, 32 }
  0x35   : > { %p3639_p13 = scmp.ne.s32.totalorder %s4043_s0, %s3638_s15  ;;  %p3646_p5 = scmp.lt.s32.totalorder %s4043_s0, %s4043_s0 }
  0x36   : > { %p3647_p7 = scmp.lt.s32.totalorder %s3645_s22, %s3638_s15 }
  0x37   : > { %p3641_p0 = pnand %p3639_p13, %p4072_p8 }
  0x38   : > { %p3648_p9 = por %p3647_p7, %p3646_p5 }
  0x39   : > { %p3642_p2 = pneg %p3641_p0 }
  0x3b   : > { %p3649_p4 = pnand %p3648_p9, %p3642_p2 }
  0x3d   : > { %3652 = shalt.err (!%p3649_p4)
}
  0x3e   : > { %3462 = dma.hbm_to_vmem [thread:$0]  (!%p4056_p6), %s4713_s21, 16, %s4043_s0, [#allocation7]  }
  0x3f   : > { %s4715_s9 = sld [smem:[#allocation29_spill]] }
  0x45   : > { %s3653_s2 = scalar_lea.hbm %s4715_s9, 16 }
  0x46   : > { %p3654_p10 = scmp.ne.s32.totalorder %s4715_s9, %s3653_s2  ;;  %p3660_p4 = scmp.lt.u32.totalorder %s3653_s2, %s4715_s9 }
  0x48   : > { %p3656_p11 = pnand %p3654_p10, %p4072_p8 }
  0x4a   : > { %p3657_p12 = pneg %p3656_p11 }
  0x4c   : > { %p3662_p13 = pnand %p3660_p4, %p3657_p12 }
  0x4e   : > { %3665 = shalt.err (!%p3662_p13)
}
  0x4f   : > { %s3666_s0 = scalar_lea.vmem %s4052_s24, 16  ;;  %s3673_s18 = scalar_lea.vmem %s4052_s24, 32 }
  0x50   : > { %p3667_p0 = scmp.ne.s32.totalorder %s4052_s24, %s3666_s0  ;;  %p3674_p7 = scmp.lt.s32.totalorder %s4052_s24, %s4052_s24 }
  0x51   : > { %p3675_p9 = scmp.lt.s32.totalorder %s3673_s18, %s3666_s0 }
  0x52   : > { %p3669_p2 = pnand %p3667_p0, %p4072_p8 }
  0x53   : > { %p3676_p10 = por %p3675_p9, %p3674_p7 }
  0x54   : > { %p3670_p5 = pneg %p3669_p2 }
  0x56   : > { %p3677_p11 = pnand %p3676_p10, %p3670_p5 }
  0x58   : > { %3680 = shalt.err (!%p3677_p11)
}
  0x59   : > { %3468 = dma.hbm_to_vmem [thread:$0]  (!%p4056_p6), %s4715_s9, 16, %s4052_s24, [#allocation10]  }
  0x5a   : > { %s4716_s7 = sld [smem:[#allocation27_spill]] }
  0x60   : > { %s3681_s5 = scalar_lea.hbm %s4716_s7, 16 }
  0x61   : > { %p3682_p12 = scmp.ne.s32.totalorder %s4716_s7, %s3681_s5  ;;  %p3688_p0 = scmp.lt.u32.totalorder %s3681_s5, %s4716_s7 }
  0x63   : > { %p3684_p4 = pnand %p3682_p12, %p4072_p8 }
  0x65   : > { %p3685_p13 = pneg %p3684_p4 }
  0x67   : > { %p3690_p2 = pnand %p3688_p0, %p3685_p13 }
  0x69   : > { %3693 = shalt.err (!%p3690_p2)
}
  0x6a   : > { %s3694_s24 = scalar_lea.vmem %s4060_s25, 16  ;;  %s3701_s18 = scalar_lea.vmem %s4060_s25, 32 }
  0x6b   : > { %p3695_p5 = scmp.ne.s32.totalorder %s4060_s25, %s3694_s24  ;;  %p3702_p10 = scmp.lt.s32.totalorder %s4060_s25, %s4060_s25 }
  0x6c   : > { %p3703_p11 = scmp.lt.s32.totalorder %s3701_s18, %s3694_s24 }
  0x6d   : > { %p3697_p7 = pnand %p3695_p5, %p4072_p8 }
  0x6e   : > { %p3704_p12 = por %p3703_p11, %p3702_p10 }
  0x6f   : > { %p3698_p9 = pneg %p3697_p7 }
  0x71   : > { %p3705_p4 = pnand %p3704_p12, %p3698_p9 }
  0x73   : > { %3708 = shalt.err (!%p3705_p4)
}
  0x74   : > { %3465 = dma.hbm_to_vmem [thread:$0]  (!%p4056_p6), %s4716_s7, 16, %s4060_s25, [#allocation7]  }
  0x75   : > { %s4717_s10 = sld [smem:[#allocation30_spill]] }
  0x7b   : > { %s3709_s5 = scalar_lea.hbm %s4717_s10, 512 }
  0x7c   : > { %p3710_p13 = scmp.ne.s32.totalorder %s4717_s10, %s3709_s5  ;;  %p3716_p5 = scmp.lt.u32.totalorder %s3709_s5, %s4717_s10 }
  0x7e   : > { %p3712_p0 = pnand %p3710_p13, %p4072_p8 }
  0x80   : > { %p3713_p2 = pneg %p3712_p0 }
  0x82   : > { %p3718_p7 = pnand %p3716_p5, %p3713_p2 }
  0x84   : > { %3721 = shalt.err (!%p3718_p7)
}
  0x85   : > { %s3722_s24 = scalar_lea.vmem %s605_s27, 512  ;;  %p3730_p12 = scmp.lt.s32.totalorder %s605_s27, %s605_s27 }
  0x86   : > { %p3723_p9 = scmp.ne.s32.totalorder %s605_s27, %s3722_s24  ;;  %p3731_p4 = scmp.lt.s32.totalorder %s3722_s24, %s3722_s24 }
  0x88   : > { %p3725_p10 = pnand %p3723_p9, %p4072_p8  ;;  %p3732_p1 = por %p3731_p4, %p3730_p12 }
  0x8a   : > { %p3726_p11 = pneg %p3725_p10 }
  0x8c   : > { %p3733_p3 = pnand %p3732_p1, %p3726_p11 }
  0x8e   : > { %3736 = shalt.err (!%p3733_p3)
}
  0x8f   : > { %s3879_s25 = smov 128   ;;  %s3880_s18 = smov 8  }
  0x90   : > { %3471 = dma.hbm_to_vmem [thread:$0]  (!%p4056_p6), %s4717_s10, 512, %s605_s27, [#allocation10], %s3879_s25, %s3879_s25, %s3880_s18  }
  0x91   : > { %s3881_s20 = smov [#allocation12]   ;;  %s4718_s11 = sld [smem:[#allocation31_spill]] }
  0x92   : > { %s618_s4 = sshll.u32 %s3881_s20, 4  ;;  %s619_s4 = int_to_ptr.vmem [resolvable:$true] %s618_s4 }
  0x97   : > { %s3737_s15 = scalar_lea.hbm %s4718_s11, 16 }
  0x98   : > { %p3738_p1 = scmp.ne.s32.totalorder %s4718_s11, %s3737_s15  ;;  %p3744_p0 = scmp.lt.u32.totalorder %s3737_s15, %s4718_s11 }
  0x9a   : > { %p3740_p3 = pnand %p3738_p1, %p4072_p8 }
  0x9c   : > { %p3741_p13 = pneg %p3740_p3 }
  0x9e   : > { %p3746_p2 = pnand %p3744_p0, %p3741_p13 }
  0xa0   : > { %3749 = shalt.err (!%p3746_p2)
}
  0xa1   : > { %s3750_s27 = scalar_lea.vmem %s619_s4, 16  ;;  %s3757_s25 = scalar_lea.vmem %s619_s4, 32 }
  0xa2   : > { %p3751_p5 = scmp.ne.s32.totalorder %s619_s4, %s3750_s27  ;;  %p3758_p10 = scmp.lt.s32.totalorder %s619_s4, %s619_s4 }
  0xa3   : > { %p3759_p11 = scmp.lt.s32.totalorder %s3757_s25, %s3750_s27 }
  0xa4   : > { %p3753_p7 = pnand %p3751_p5, %p4072_p8 }
  0xa5   : > { %p3760_p12 = por %p3759_p11, %p3758_p10 }
  0xa6   : > { %p3754_p9 = pneg %p3753_p7 }
  0xa8   : > { %p3761_p4 = pnand %p3760_p12, %p3754_p9 }
  0xaa   : > { %3764 = shalt.err (!%p3761_p4)
}
  0xab   : > { %3474 = dma.hbm_to_vmem [thread:$0]  (!%p4056_p6), %s4718_s11, 16, %s619_s4, [#allocation13]  }
  0xac   : > { %s3014_s7 = sadd.s32 4294967294, %s3873_s30   ;;  %s4181_s26 = sadd.s32 1, %s3873_s30  }
  0xad   : > { %s48_s6 = sadd.s32 1, %s3869_s29  ;;  %s45_s13 = ssub.s32 %s3873_s30, %s4181_s26 }
  0xae   : > { %p55_p8 = scmp.ne.s32.totalorder %s3869_s29, %s3865_s28  ;;  %p46_p1 = scmp.eq.s32.totalorder %s45_s13, 0 }
  0xaf   : > { %p56_p3 = scmp.eq.s32.totalorder %s3873_s30, 0  ;;  %p61_p13 = scmp.ne.s32.totalorder %s3865_s28, %s3861_s3 }
  0xb0   : > { %p531_p0 = scmp.eq.s32.totalorder %s4038_s23, 1  ;;  %p4719_p5 = scmp.eq.s32.totalorder %s4038_s23, 0 }
  0xb1   : > { %s4193_s20 = scalar_select %p46_p1, %s3869_s29, %s48_s6  }
  0xb2   : > { %p57_p2 = por %p56_p3, %p55_p8  ;;  %p4197_p7 = por %p4719_p5, %p61_p13 }
  0xb3   : > { %p4201_p6 = por %p531_p0, %p55_p8  ;;  %p537_p9 = scmp.eq.s32.totalorder %s3014_s7, 1 }
  0xb4   : > { %p3488_p10 = scmp.lt.s32.totalorder %s3873_s30, 2  ;;  %s659_s2 = sand.u32 1, %s3869_s29  }
  0xb5   : > { %s4721_s4 = scalar_select %p4201_p6, 1, 0 }
  0xb6   : > { %p4207_p11 = por %p537_p9, %p61_p13  ;;  %s3022_s22 = sshll.u32 %s659_s2, 3 }
  0xb7   : > { %s3023_s0 = sshll.u32 %s3873_s30, 7  ;;  %s4723_s25 = sld [smem:[#allocation20_spill]] }
  0xb8   : > { %s4722_s15 = scalar_select %p4207_p11, 1, 0 }
  0xb9   : > { %s663_s19 = scalar_lea.vmem [#allocation3], %s3022_s22  ;;  %p4217_p12 = pnand %p3488_p10, %p57_p2 }
  0xba   : > { %s670_s6 = sshll.u32 %s663_s19, 4  ;;  %s660_s13 = scalar_lea.sflag [#allocation4], %s659_s2  ;;  %s4221_s6 = int_to_ptr.vmem [resolvable:$true] %s670_s6 }
  0xbb   : > { %p3767_p8 = pneg %p4217_p12 }
  0xbd   : > { %s4215_s18 = scalar_lea.hbm %s4723_s25, %s3023_s0  ;;  %s3770_s24 = scalar_lea.hbm %s4723_s25, 256 }
  0xbe   : > { %s3765_s9 = scalar_lea.hbm %s4215_s18, 128  ;;  %p3771_p13 = scmp.lt.u32.totalorder %s4215_s18, %s4723_s25 }
  0xbf   : > { %p3766_p4 = scmp.ne.s32.totalorder %s4215_s18, %s3765_s9  ;;  %p3772_p0 = scmp.lt.u32.totalorder %s3770_s24, %s3765_s9 }
  0xc0   : > { %p3774_p5 = scmp.lt.u32.totalorder %s3765_s9, %s4215_s18 }
  0xc1   : > { %p3768_p1 = pnand %p3767_p8, %p3766_p4  ;;  %p3773_p2 = por %p3772_p0, %p3771_p13 }
  0xc3   : > { %p3769_p3 = pneg %p3768_p1  ;;  %p3775_p9 = por %p3774_p5, %p3773_p2 }
  0xc5   : > { %p3776_p10 = pnand %p3775_p9, %p3769_p3 }
  0xc7   : > { %3779 = shalt.err (!%p3776_p10)
}
  0xc8   : > { %s3780_s2 = scalar_lea.vmem %s4221_s6, 128  ;;  %s3882_s0 = smov [#allocation3]  }
  0xc9   : > { %p3781_p4 = scmp.ne.s32.totalorder %s4221_s6, %s3780_s2  ;;  %s3785_s22 = sshll.u32 %s3882_s0, 4  ;;  %s3786_s22 = int_to_ptr.vmem [resolvable:$false] %s3785_s22 }
  0xca   : > { %s3787_s27 = scalar_lea.vmem %s3786_s22, 256  ;;  %p3788_p6 = scmp.lt.s32.totalorder %s4221_s6, %s3786_s22 }
  0xcb   : > { %p3783_p1 = pnand %p3781_p4, %p3767_p8  ;;  %p3789_p13 = scmp.lt.s32.totalorder %s3787_s27, %s3780_s2 }
  0xcd   : > { %p3784_p11 = pneg %p3783_p1  ;;  %p3790_p0 = por %p3789_p13, %p3788_p6 }
  0xcf   : > { %p3791_p2 = pnand %p3790_p0, %p3784_p11 }
  0xd1   : > { %3794 = shalt.err (!%p3791_p2)
}
  0xd2   : > { %3478 = dma.hbm_to_vmem [thread:$0]  (!%p4217_p12), %s4215_s18, 128, %s4221_s6, %s660_s13  }
  0xd3   : > { %p4725_p3 = scmp.ne.s32.totalorder %s4711_s1, 0 }
  0xd4   : > { %s4251_s9 = sand.u32 (!%p4725_p3), 1, %s3865_s28  }
  0xd5   : > { %687 = sbr.rel (%p4725_p3) target bundleno = 4947 (0x1353), region = 108  ;;  %s4676_s24 = sshll.u32 (!%p4725_p3), %s4251_s9, 3 }
  0xd6   : > { %s690_s19 = scalar_lea.sflag (!%p4725_p3), [#allocation4], %s4251_s9  ;;  %s693_s2 = scalar_lea.vmem (!%p4725_p3), [#allocation3], %s4676_s24 }
  0xdc   : > { %3840 = dma.done.wait (%p4197_p7), %s690_s19, 128  }
  0xdd   : > { %3842 = vsyncadd (%p4197_p7), %s690_s19, 4294967168  ;;  %p4726_p6 = scmp.eq.s32.totalorder %s4038_s23, 0 }
  0xdf   : > { %3844 = dma.done.wait (%p4726_p6), [#allocation7], 32   ;;  %p4727_p11 = pmov %p4726_p6 }
  0xe0   : > { %p4728_p12 = pmov %p4726_p6 }
  0xe1   : > { %3846 = vsyncadd (%p4727_p11), [#allocation7], 4294967264 }
  0xe2   : > { %3848 = dma.done.wait (%p4728_p12), [#allocation10], 528   ;;  %p4729_p8 = pmov %p4726_p6 }
  0xe3   : > { %p4730_p5 = pmov %p4726_p6 }
  0xe4   : > { %3850 = vsyncadd (%p4729_p8), [#allocation10], 4294966768 }
  0xe5   : > { %3852 = dma.done.wait (%p4730_p5), [#allocation13], 16   ;;  %p4731_p9 = pmov %p4730_p5 }
  0xe6   : > { %v3883_v0 = vmov 0.0|0.0   ;;  %vm3884_vm0 = vmmov 0   ;;  %v3885_v1 = vmov 0.0   ;;  %s4732_s18 = sld [smem:[#allocation22_spill]]  ;;  %v4292_v8 = vld [vmem:[%s693_s2] sm:$0xff]  ;;  %vm798_vm1 = vcmask 261120  }
  0xe7   : > { %3854 = vsyncadd (%p4731_p9), [#allocation13], 4294967280  ;;  %3353 = vmatprep.subr.bf16.mxu1 %v3883_v0  ;;  %3180 = vmatprep.mubr.msk.f32.mxu1 %vm3884_vm0, %v3885_v1  ;;  %s4733_s5 = sld [smem:[#allocation23_spill]]  ;;  %s4688_s6 = smov 120   ;;  %vm875_vm2 = vcmask 64512   ;;  %vm1207_vm3 = vcmask 130112  }
  0xe8   : > { %3193 = vmatprep.subr.mxu0 %v3885_v1  ;;  %3195 = vmatprep.mubr.msk.f32.mxu0 %vm3884_vm0, %v3885_v1  ;;  %s4684_s2 = smov 96   ;;  %s4680_s7 = smov 80   ;;  %vm1378_vm4 = vcmask 195712   ;;  %vm1549_vm5 = vcmask 261312   ;;  %vm4427_vm6 = vmpackc.low %vm875_vm2, %vm875_vm2  ;;  %vm1922_vm7 = vcmask 97280   ;;  %vm1940_vm8 = vcmask 1043456  }
  0xe9   : > { %s4687_s13 = smov 88   ;;  %s4677_s0 = smov 72   ;;  %vm3900_vm9 = vmmov 1   ;;  %vm2765_vm11 = vcmask 523264  }
  0xea   : > { %s4681_s22 = smov 112   ;;  %s4678_s27 = smov 104   ;;  %vm4462_vm10 = vmpackc.low %vm1940_vm8, %vm3900_vm9 }
  0xeb   : > { %s3893_s19 = smov 56   ;;  %s3894_s1 = smov 64  }
  0xec   : > { %v787_v2 = vld [vmem:[%s4732_s18] sm:$0xff]  ;;  %v788_v3 = vld [vmem:[%s4732_s18 + $0x8] sm:$0xff]  ;;  %v789_v4 = vld [vmem:[%s4732_s18 + $0x10] sm:$0xff]  ;;  %s3896_s24 = smov 48   ;;  %s4735_s8 = sld [smem:[#allocation28_spill]] }
  0xed   : > { %v3354_v5 = vpack.c.bf16 %v788_v3, %v787_v2  ;;  %v790_v6 = vld [vmem:[%s4732_s18 + $0x18] sm:$0xff]  ;;  %v3034_v9 = vld [vmem:[%s4733_s5] ss:$0 sm:$0xff]  ;;  %s3895_s5 = smov 40   ;;  %p779_p7 = scmp.lt.s32.totalorder %s4038_s23, 1 }
  0xee   : > { %v3357_v7 = vpack.c.bf16 %v790_v6, %v789_v4  ;;  %s4759_s10 = sld [smem:[#allocation38_spill]]  ;;  %p4760_p4 = scmp.ne.s32.totalorder %s4721_s4, 0 }
  0xef   : > { %3355 = vmatpush3.bf16.msra.mxu1 %v3354_v5 }
  0xf0   : > { %3356 = vmatprep.subr.bf16.mxu1 %v3883_v0 }
  0xf3   : > { %3358 = vmatpush3.bf16.msra.mxu1 %v3357_v7 }
  0xf4   : > { %3183 = vmatprep.subr.mxu1 %v3885_v1 }
  0xf6   : > { %3181 = vmatmul.mubr.msk.f32.vlgmr.msra.gmra.mrb[0].mxu1 %vm798_vm1, %v4292_v8 }
  0xf7   : > { %3185 = vmatprep.mubr.msk.f32.mxu1 %vm3884_vm0, %v3885_v1 }
 0x1c9   : > { %v868_v10 = vpop.f32.mrb[0].mxu1 }
 0x1ca   : > { %v869_v11 = vadd.f32 %v3034_v9, %v868_v10  ;;  %v3182_v12 = vpop.f32.mrb[1].mxu1 }
 0x1cc   : > { %1038 = vrot.lane.b32.xlu1 %v869_v11, %s4688_s6  ;;  %873 = vrot.lane.b32.xlu0 %v869_v11, %s4684_s2  ;;  %s4737_s2 = sld [smem:[#allocation26_spill]] }
 0x1d0   : > { %1211 = vrot.lane.b32.xlu1 %v869_v11, %s4680_s7  ;;  %1040 = vrot.lane.b32.xlu0 %v869_v11, %s4687_s13  ;;  %s4685_s7 = smov 24   ;;  %s4736_s13 = sld [smem:[#allocation21_spill]] }
 0x1d4   : > { %1382 = vrot.lane.b32.xlu1 %v869_v11, %s4677_s0  ;;  %1209 = vrot.lane.b32.xlu0 %v869_v11, %s4681_s22  ;;  %s780_s22 = scalar_select %p779_p7, %s4038_s23, 1 }
 0x1d5   : > { %s4750_s0 = smov 16  }
 0x1d8   : > { %1380 = vrot.lane.b32.xlu0 %v869_v11, %s4678_s27  ;;  %s3091_s27 = sshll.u32 %s780_s22, 4  ;;  %s4740_s22 = smov 120  }
 0x1d9   : > { %s783_s6 = scalar_lea.vmem %s4736_s13, %s3091_s27  ;;  %s4741_s13 = smov 88  }
 0x1da   : > { %s4745_s27 = smov 104  }
 0x23e   : > { %v1039_v13 = vpop.permute.xlu1 %1038  ;;  %v874_v14 = vpop.permute.xlu0 %873 }
 0x23f   : > { %3184 = vmatpush3.xpose.msk.msra.mxu1 %vm875_vm2, %v874_v14 }
 0x240   : > { %3188 = vmatprep.subr.mxu1 %v3885_v1 }
 0x242   : > { %3186 = vmatmul.mubr.msk.f32.vlgmr.msra.gmra.mrb[2].mxu1 %vm875_vm2, %v869_v11  ;;  %v1041_v15 = vpop.permute.xlu0 %1040  ;;  %v1212_v16 = vpop.permute.xlu1 %1211 }
 0x243   : > { %3194 = vmatpush3.xpose.msk.msra.mxu0 %vm875_vm2, %v1041_v15  ;;  %3190 = vmatprep.mubr.msk.f32.mxu1 %vm3884_vm0, %v3885_v1 }
 0x244   : > { %3203 = vmatprep.subr.mxu0 %v3885_v1 }
 0x246   : > { %3196 = vmatmul.mubr.msk.f32.vlgmr.msra.gmra.mrb[0].mxu0 %vm875_vm2, %v1039_v13  ;;  %v1210_v17 = vpop.permute.xlu0 %1209  ;;  %v1383_v18 = vpop.permute.xlu1 %1382 }
 0x247   : > { %3204 = vmatpush3.xpose.msk.msra.mxu0 %vm875_vm2, %v1212_v16  ;;  %3205 = vmatprep.mubr.msk.f32.mxu0 %vm3884_vm0, %v3885_v1 }
 0x248   : > { %3213 = vmatprep.subr.mxu0 %v3885_v1 }
 0x24a   : > { %3206 = vmatmul.mubr.msk.f32.vlgmr.msra.gmra.mrb[2].mxu0 %vm875_vm2, %v1210_v17  ;;  %v1381_v19 = vpop.permute.xlu0 %1380 }
 0x24b   : > { %3214 = vmatpush3.xpose.msk.msra.mxu0 %vm875_vm2, %v1383_v18  ;;  %3215 = vmatprep.mubr.msk.f32.mxu0 %vm3884_vm0, %v3885_v1 }
 0x24c   : > { %3359 = vmatprep.subr.bf16.mxu0 %v3883_v0 }
 0x24e   : > { %3216 = vmatmul.mubr.msk.f32.vlgmr.msra.gmra.mrb[4].mxu0 %vm875_vm2, %v1381_v19 }
 0x24f   : > { %3231 = vmatprep.mubr.msk.f32.mxu0 %vm3884_vm0, %v3885_v1 }
 0x315   : > { %v946_v20 = vpop.f32.mrb[2].mxu1 }
 0x316   : > { %v3187_v21 = vpop.f32.mrb[3].mxu1  ;;  %v950_v22 = vsel %vm875_vm2, %v946_v20, -inf }
 0x317   : > { %951 = vmax.xlane.f32.xlu1 %v950_v22 }
 0x319   : > { %v1112_v23 = vpop.f32.mrb[0].mxu0 }
 0x31a   : > { %v3197_v24 = vpop.f32.mrb[1].mxu0  ;;  %v1116_v25 = vsel %vm875_vm2, %v1112_v23, -inf }
 0x31b   : > { %1117 = vmax.xlane.f32.xlu0 %v1116_v25  ;;  %v3048_v25 = vld [vmem:[#allocation6] ss:$0 sm:$0xff] }
 0x31d   : > { %v1283_v26 = vpop.f32.mrb[2].mxu0 }
 0x31e   : > { %v3207_v27 = vpop.f32.mrb[3].mxu0  ;;  %v1287_v28 = vsel %vm875_vm2, %v1283_v26, -inf }
 0x31f   : > { %1288 = vmax.xlane.f32.xlu0 %v1287_v28 }
 0x321   : > { %v1454_v29 = vpop.f32.mrb[4].mxu0 }
 0x322   : > { %v3217_v30 = vpop.f32.mrb[5].mxu0  ;;  %v1458_v31 = vsel %vm875_vm2, %v1454_v29, -inf }
 0x328   : > { %1125 = vrot.lane.b32.xlu1 %v869_v11, %s3893_s19  ;;  %s4686_s19 = smov 16  }
 0x335   : > { %959 = vrot.lane.b32.xlu0 %v869_v11, %s3894_s1  ;;  %s4749_s1 = smov 8  }
 0x339   : > { %1467 = vrot.lane.b32.xlu0 %v869_v11, %s3895_s5  ;;  %s4734_s5 = sld [smem:[#allocation24_spill]] }
 0x33f   : > { %v1552_v6 = vld [vmem:[%s4734_s5] sm:$0xff]  ;;  %v1553_v7 = vld [vmem:[%s4734_s5 + $0x8] sm:$0xff]  ;;  %v1554_v12 = vld [vmem:[%s4734_s5 + $0x10] sm:$0xff] }
 0x340   : > { %v1555_v13 = vld [vmem:[%s4734_s5 + $0x18] sm:$0xff] }
 0x341   : > { %v3363_v16 = vpack.c.bf16 %v1555_v13, %v1554_v12 }
 0x34c   : > { %1459 = vmax.xlane.f32.xlu1 %v1458_v31  ;;  %v1751_v31 = vld [vmem:[%s4735_s8] sm:$0xff] }
 0x35d   : > { %1296 = vrot.lane.b32.xlu1 %v869_v11, %s3896_s24  ;;  %s4683_s24 = smov 8   ;;  %v3360_v11 = vpack.c.bf16 %v1553_v7, %v1552_v6  ;;  %v3052_v7 = vld [vmem:[#allocation8] ss:$0 sm:$0xff] }
 0x35f   : > { %3361 = vmatpush3.bf16.msra.mxu0 %v3360_v11 }
 0x360   : > { %3362 = vmatprep.subr.bf16.mxu0 %v3883_v0 }
 0x363   : > { %3364 = vmatpush3.bf16.msra.mxu0 %v3363_v16 }
 0x3a4   : > { %v952_v32 = vpop.xlane.xlu1 %951 }
 0x3a5   : > { %v953_v33 = vsub.f32 %v946_v20, %v952_v32  ;;  %v1752_v32 = vld [vmem:[%s4735_s8 + $0x8] sm:$0xff] }
 0x3a7   : > { %v954_v34 = vmul.f32 1.442695, %v953_v33  ;;  %v3371_v33 = vpack.c.bf16 %v1752_v32, %v1751_v31 }
 0x3a8   : > { %v1118_v35 = vpop.xlane.xlu0 %1117  ;;  %v1126_v43 = vpop.permute.xlu1 %1125 }
 0x3a9   : > { %3587 = vpow2.f32 %v954_v34  ;;  %v1119_v36 = vsub.f32 %v1112_v23, %v1118_v35  ;;  %3372 = vmatprep.subr.bf16.mxu0 %v3371_v33 }
 0x3ab   : > { %v1120_v37 = vmul.f32 1.442695, %v1119_v36 }
 0x3ac   : > { %v1289_v38 = vpop.xlane.xlu0 %1288 }
 0x3ad   : > { %3589 = vpow2.f32 %v1120_v37  ;;  %v1290_v39 = vsub.f32 %v1283_v26, %v1289_v38  ;;  %v1753_v38 = vld [vmem:[%s4735_s8 + $0x10] sm:$0xff] }
 0x3af   : > { %v1291_v40 = vmul.f32 1.442695, %v1290_v39  ;;  %v1754_v39 = vld [vmem:[%s4735_s8 + $0x18] sm:$0xff] }
 0x3b0   : > { %v960_v41 = vpop.permute.xlu0 %959 }
 0x3b1   : > { %3591 = vpow2.f32 %v1291_v40  ;;  %3189 = vmatpush3.msra.mxu1 %v960_v41  ;;  %v3375_v40 = vpack.c.bf16 %v1754_v39, %v1753_v38  ;;  %v785_v41 = vld [vmem:[%s783_s6] sm:$0xff] }
 0x3b2   : > { %3198 = vmatprep.subr.mxu1 %v3885_v1 }
 0x3b3   : > { %v3588_v42 = vpop.eup %3587 }
 0x3b4   : > { %3191 = vmatmul.mubr.msk.f32.vlgmr.msra.gmra.mrb[4].mxu1 %vm875_vm2, %v3588_v42  ;;  %v956_v48 = vsel %vm875_vm2, %v3588_v42, 0.0  ;;  %v1468_v53 = vpop.permute.xlu0 %1467  ;;  %v786_v42 = vld [vmem:[%s783_s6 + $0x8] sm:$0xf]  ;;  %s4743_s6 = smov 112  }
 0x3b5   : > { %3199 = vmatpush3.msra.mxu1 %v1126_v43  ;;  %3200 = vmatprep.mubr.msk.f32.mxu1 %vm3884_vm0, %v3885_v1  ;;  %v1667_v43 = vld [vmem:[%s4737_s2] sm:$0xff] }
 0x3b6   : > { %3208 = vmatprep.subr.mxu1 %v3885_v1 }
 0x3b7   : > { %v3590_v44 = vpop.eup %3589 }
 0x3b8   : > { %3201 = vmatmul.mubr.msk.f32.vlgmr.msra.gmra.mrb[6].mxu1 %vm875_vm2, %v3590_v44  ;;  %v1122_v45 = vsel %vm875_vm2, %v3590_v44, 0.0  ;;  %v1668_v44 = vld [vmem:[%s4737_s2 + $0x8] sm:$0xff] }
 0x3b9   : > { %1123 = vadd.xlane.f32.xlu1 %v1122_v45  ;;  %3210 = vmatprep.mubr.msk.f32.mxu1 %vm3884_vm0, %v3885_v1  ;;  %v3366_v45 = vpack.c.bf16 %v1668_v44, %v1667_v43 }
 0x3bb   : > { %v3592_v46 = vpop.eup %3591 }
 0x3bc   : > { %v1293_v47 = vsel %vm875_vm2, %v3592_v46, 0.0 }
 0x3bd   : > { %1294 = vadd.xlane.f32.xlu0 %v1293_v47  ;;  %957 = vadd.xlane.f32.xlu1 %v956_v48  ;;  %v1670_v47 = vld [vmem:[%s4737_s2 + $0x18] sm:$0xff] }
 0x3d9   : > { %v1460_v49 = vpop.xlane.xlu1 %1459 }
 0x3da   : > { %v1461_v50 = vsub.f32 %v1454_v29, %v1460_v49 }
 0x3dc   : > { %v1462_v51 = vmul.f32 1.442695, %v1461_v50 }
 0x3dd   : > { %v1297_v52 = vpop.permute.xlu1 %1296 }
 0x3de   : > { %3593 = vpow2.f32 %v1462_v51  ;;  %3209 = vmatpush3.msra.mxu1 %v1297_v52 }
 0x3df   : > { %3211 = vmatmul.mubr.msk.f32.vlgmr.msra.gmra.mrb[8].mxu1 %vm875_vm2, %v3592_v46  ;;  %3218 = vmatprep.subr.mxu1 %v3885_v1  ;;  %v1669_v46 = vld [vmem:[%s4737_s2 + $0x10] sm:$0xff] }
 0x3e0   : > { %3219 = vmatpush3.msra.mxu1 %v1468_v53  ;;  %3220 = vmatprep.mubr.msk.f32.mxu1 %vm3884_vm0, %v3885_v1  ;;  %v3369_v48 = vpack.c.bf16 %v1670_v47, %v1669_v46  ;;  %v3050_v53 = vld [vmem:[%s4660_s16] ss:$0 sm:$0xff] }
 0x3e1   : > { %3365 = vmatprep.subr.bf16.mxu1 %v3883_v0 }
 0x3e8   : > { %v3594_v54 = vpop.eup %3593 }
 0x3e9   : > { %3221 = vmatmul.mubr.msk.f32.vlgmr.msra.gmra.mrb[10].mxu1 %vm875_vm2, %v3594_v54  ;;  %v1464_v55 = vsel %vm875_vm2, %v3594_v54, 0.0 }
 0x3ea   : > { %1465 = vadd.xlane.f32.xlu0 %v1464_v55  ;;  %3242 = vmatprep.mubr.msk.f32.mxu1 %vm3884_vm0, %v3885_v1  ;;  %v3051_v55 = vld [vmem:[%s4661_s17] ss:$0 sm:$0xff] }
 0x3eb   : > { %3367 = vmatpush3.bf16.msra.mxu1 %v3366_v45 }
 0x3ec   : > { %3368 = vmatprep.subr.bf16.mxu1 %v3883_v0 }
 0x3ef   : > { %3370 = vmatpush3.bf16.msra.mxu1 %v3369_v48 }
 0x3f0   : > { %3379 = vmatprep.subr.bf16.mxu1 %v3883_v0 }
 0x446   : > { %v1124_v56 = vpop.xlane.xlu1 %1123 }
 0x44a   : > { %v958_v57 = vpop.xlane.xlu1 %957  ;;  %v1295_v4 = vpop.xlane.xlu0 %1294 }
 0x44b   : > { %3595 = vrcp.f32 %v958_v57 }
 0x44c   : > { %3597 = vrcp.f32 %v1124_v56 }
 0x44d   : > { %3599 = vrcp.f32 %v1295_v4 }
 0x455   : > { %v3596_v58 = vpop.eup %3595 }
 0x456   : > { %v3598_v62 = vpop.eup %3597 }
 0x457   : > { %v3600_v9 = vpop.eup %3599 }
 0x477   : > { %v1466_v5 = vpop.xlane.xlu0 %1465 }
 0x478   : > { %3601 = vrcp.f32 %v1466_v5 }
 0x482   : > { %v3602_v17 = vpop.eup %3601 }
 0x487   : > { %v1031_v59 = vpop.f32.mrb[4].mxu1 }
 0x488   : > { %v1036_v60 = vmul.f32 %v3596_v58, %v1031_v59  ;;  %v3192_v61 = vpop.f32.mrb[5].mxu1  ;;  %v3054_v58 = vld [vmem:[#allocation9] ss:$0 sm:$0xff] }
 0x48a   : > { %1037 = vst.msk [vmem:[#allocation2] sm:$0xff] %vm875_vm2, %v1036_v60 }
 0x48b   : > { %v1197_v63 = vpop.f32.mrb[6].mxu1 }
 0x48c   : > { %v1202_v2 = vmul.f32 %v3598_v62, %v1197_v63  ;;  %v3202_v3 = vpop.f32.mrb[7].mxu1 }
 0x48e   : > { %1204 = vrot.lane.b32.xlu0 %v1202_v2, %s4683_s24  ;;  %s4748_s24 = smov 72  }
 0x4b2   : > { %v1368_v10 = vpop.f32.mrb[8].mxu1 }
 0x4b3   : > { %v1373_v14 = vmul.f32 %v3600_v9, %v1368_v10  ;;  %v3212_v15 = vpop.f32.mrb[9].mxu1 }
 0x4b5   : > { %1375 = vrot.lane.b32.xlu1 %v1373_v14, %s4686_s19  ;;  %s4742_s19 = smov 96  }
 0x4bc   : > { %v1539_v18 = vpop.f32.mrb[10].mxu1 }
 0x4bd   : > { %v1544_v19 = vmul.f32 %v3602_v17, %v1539_v18  ;;  %v3222_v20 = vpop.f32.mrb[11].mxu1 }
 0x4bf   : > { %1546 = vrot.lane.b32.xlu1 %v1544_v19, %s4685_s7  ;;  %s4744_s7 = smov 80  }
 0x500   : > { %v1205_v21 = vpop.permute.xlu0 %1204 }
 0x501   : > { %1208 = vst.msk [vmem:[#allocation2] sm:$0xff] %vm1207_vm3, %v1205_v21 }
 0x527   : > { %v1376_v22 = vpop.permute.xlu1 %1375 }
 0x528   : > { %1379 = vst.msk [vmem:[#allocation2] sm:$0xff] %vm1378_vm4, %v1376_v22 }
 0x531   : > { %v1547_v23 = vpop.permute.xlu1 %1546 }
 0x532   : > { %1550 = vst.msk [vmem:[#allocation2] sm:$0xff] %vm1549_vm5, %v1547_v23 }
 0x539   : > { %v1551_v24 = vld [vmem:[#allocation2] sm:$0xff] }
 0x53a   : > { %3232 = vmatmul.mubr.msk.f32.vlgmr.msra.gmra.mrb[6].mxu0 %vm798_vm1, %v1551_v24 }
 0x53b   : > { %3374 = vmatpush3.bf16.msra.mxu0 %v3371_v33  ;;  %3253 = vmatprep.mubr.msk.f32.mxu0 %vm798_vm1, %v785_v41 }
 0x53c   : > { %3376 = vmatprep.subr.bf16.mxu0 %v3375_v40 }
 0x53f   : > { %3378 = vmatpush3.bf16.msra.mxu0 %v3375_v40 }
 0x540   : > { %3383 = vmatprep.subr.bf16.mxu0 %v3883_v0 }
 0x542   : > { %3254 = vmatmul.mubr.msk.f32.vlgmr.msra.gmra.mrb[8].mxu0 %vm798_vm1, %v786_v42 }
 0x543   : > { %3267 = vmatprep.mubr.msk.f32.mxu0 %vm3884_vm0, %v3885_v1 }
 0x60d   : > { %v1632_v26 = vpop.f32.mrb[6].mxu0 }
 0x60e   : > { %v1633_v27 = vadd.f32 %v3048_v25, %v1632_v26  ;;  %v3233_v28 = vpop.f32.mrb[7].mxu0 }
 0x610   : > { %v1636_v29 = vadd.f32 %v1633_v27, %v4292_v8 }
 0x612   : > { %v1639_v30 = vsel %vm798_vm1, %v1636_v29, 0.0 }
 0x613   : > { %1640 = vadd.xlane.f32.xlu0 %v1639_v30 }
 0x615   : > { %v3255_v59 = vpop.f32.mrb[8].mxu0 }
 0x616   : > { %v1840_v60 = vadd.f32 %v3255_v59, %v3054_v58  ;;  %v1834_v61 = vpop.f32.mrb[9].mxu0 }
 0x617   : > { %v1835_v62 = vadd.f32 %v3054_v58, %v1834_v61 }
 0x619   : > { %v4431_v2 = vpack.i.bf16 %v1840_v60, %v1835_v62  ;;  %v3380_v3 = vpack.c.bf16 %v1840_v60, %v1835_v62 }
 0x629   : > { %3553 = vrot.lane.b32.xlu0 %v4431_v2, %s4740_s22 }
 0x6a0   : > { %v1641_v34 = vpop.xlane.xlu0 %1640 }
 0x6a1   : > { %v1643_v35 = vmul.f32 0.03125, %v1641_v34 }
 0x6a3   : > { %v1644_v36 = vsub.f32 %v1636_v29, %v1643_v35 }
 0x6a4   : > { %v3554_v4 = vpop.permute.xlu0 %3553 }
 0x6a5   : > { %v1645_v37 = vmul.f32 %v1644_v36, %v1644_v36  ;;  %v3556_v5 = vunpack.i.h.bf16 %v3554_v4  ;;  %v3555_v6 = vunpack.i.l.bf16 %v3554_v4 }
 0x6a7   : > { %v1646_v8 = vsel %vm798_vm1, %v1645_v37, 0.0  ;;  %v3388_v10 = vpack.c.bf16 %v3556_v5, %v3555_v6 }
 0x6a8   : > { %1647 = vadd.xlane.f32.xlu1 %v1646_v8 }
 0x735   : > { %v1648_v49 = vpop.xlane.xlu1 %1647 }
 0x736   : > { %v1649_v50 = vmul.f32 0.03125, %v1648_v49 }
 0x738   : > { %v1650_v51 = vadd.f32 1e-05, %v1649_v50 }
 0x73a   : > { %3603 = vrsqrt.f32 %v1650_v51 }
 0x744   : > { %v3604_v52 = vpop.eup %3603 }
 0x745   : > { %v1652_v54 = vmul.f32 %v3604_v52, %v1644_v36 }
 0x747   : > { %v1659_v56 = vmul.f32 %v3050_v53, %v1652_v54 }
 0x749   : > { %v4419_v57 = vadd.f32 %v3051_v55, %v1659_v56 }
 0x74b   : > { %3243 = vmatmul.mubr.msk.f32.vlgmr.msra.gmra.mrb[12].mxu1 %vm798_vm1, %v4419_v57 }
 0x74c   : > { %3260 = vmatprep.mubr.msk.f32.mxu1 %vm3884_vm0, %v3885_v1  ;;  %3382 = vmatpush3.bf16.xpose.msk.msra.mxu1 %vm4427_vm6, %v3380_v3 }
 0x74d   : > { %3387 = vmatprep.subr.bf16.mxu1 %v3883_v0 }
 0x81e   : > { %v1747_v9 = vpop.f32.mrb[12].mxu1 }
 0x81f   : > { %v1748_v11 = vadd.f32 %v3052_v7, %v1747_v9  ;;  %v3244_v12 = vpop.f32.mrb[13].mxu1 }
 0x821   : > { %2016 = vrot.lane.b32.xlu1 %v1748_v11, %s4740_s22  ;;  %3261 = vmatmul.mubr.msk.f32.vlgmr.msra.gmra.mrb[14].mxu1 %vm875_vm2, %v1748_v11  ;;  %s4751_s22 = smov 24  }
 0x822   : > { %3390 = vmatpush3.bf16.xpose.msk.msra.mxu1 %vm4427_vm6, %v3388_v10  ;;  %3274 = vmatprep.mubr.msk.f32.mxu1 %vm3884_vm0, %v3885_v1 }
 0x823   : > { %3399 = vmatprep.subr.bf16.mxu1 %v3883_v0 }
 0x825   : > { %3563 = vrot.lane.b32.xlu1 %v4431_v2, %s4741_s13 }
 0x893   : > { %v2017_v13 = vpop.permute.xlu1 %2016 }
 0x894   : > { %3275 = vmatmul.mubr.msk.f32.vlgmr.msra.gmra.mrb[16].mxu1 %vm875_vm2, %v2017_v13 }
 0x895   : > { %3295 = vmatprep.mubr.msk.f32.mxu1 %vm3884_vm0, %v3885_v1 }
 0x897   : > { %v3564_v28 = vpop.permute.xlu1 %3563 }
 0x898   : > { %v3566_v29 = vunpack.i.h.bf16 %v3564_v28  ;;  %v3565_v30 = vunpack.i.l.bf16 %v3564_v28 }
 0x89a   : > { %v3392_v32 = vpack.c.bf16 %v3566_v29, %v3565_v30  ;;  %v2551_v30 = vld [vmem:[#allocation11] sm:$0xff] }
 0x8f4   : > { %v1918_v14 = vpop.f32.mrb[14].mxu1 }
 0x8f5   : > { %v3262_v15 = vpop.f32.mrb[15].mxu1  ;;  %v1923_v16 = vsel %vm1922_vm7, %v1918_v14, -inf }
 0x8f6   : > { %1924 = vmax.xlane.f32.xlu0 %v1923_v16 }
 0x90c   : > { %3558 = vrot.lane.b32.xlu0 %v4431_v2, %s4742_s19  ;;  %s4757_s19 = sld [smem:[#allocation37_spill]] }
 0x910   : > { %3568 = vrot.lane.b32.xlu0 %v4431_v2, %s4743_s6 }
 0x967   : > { %v2094_v17 = vpop.f32.mrb[16].mxu1 }
 0x968   : > { %v3276_v18 = vpop.f32.mrb[17].mxu1  ;;  %v2098_v19 = vsel %vm1922_vm7, %v2094_v17, -inf }
 0x969   : > { %2099 = vmax.xlane.f32.xlu1 %v2098_v19 }
 0x97a   : > { %2194 = vrot.lane.b32.xlu1 %v1748_v11, %s4743_s6  ;;  %s4752_s6 = sld [smem:[#allocation34_spill]] }
 0x97e   : > { %3573 = vrot.lane.b32.xlu1 %v4431_v2, %s4744_s7  ;;  %s4758_s7 = sshll.u32 %s4251_s9, 3 }
 0x982   : > { %3578 = vrot.lane.b32.xlu1 %v4431_v2, %s4745_s27 }
 0x983   : > { %v1925_v20 = vpop.xlane.xlu0 %1924 }
 0x984   : > { %v1926_v21 = vsub.f32 %v1918_v14, %v1925_v20 }
 0x986   : > { %v1927_v22 = vmul.f32 1.442695, %v1926_v21  ;;  %2372 = vrot.lane.b32.xlu1 %v1748_v11, %s4745_s27  ;;  %s778_s27 = scalar_lea.vmem [#allocation14], %s4758_s7 }
 0x987   : > { %v3559_v23 = vpop.permute.xlu0 %3558 }
 0x988   : > { %3605 = vpow2.f32 %v1927_v22  ;;  %v3561_v24 = vunpack.i.h.bf16 %v3559_v23  ;;  %v3560_v25 = vunpack.i.l.bf16 %v3559_v23 }
 0x98a   : > { %v3384_v27 = vpack.c.bf16 %v3561_v24, %v3560_v25 }
 0x98b   : > { %v3569_v37 = vpop.permute.xlu0 %3568 }
 0x98c   : > { %3386 = vmatpush3.bf16.msk.msra.mxu0 %vm4462_vm10, %v3384_v27  ;;  %v3571_v40 = vunpack.i.h.bf16 %v3569_v37  ;;  %v3570_v41 = vunpack.i.l.bf16 %v3569_v37 }
 0x98d   : > { %3391 = vmatprep.subr.bf16.mxu0 %v3883_v0 }
 0x98e   : > { %v3396_v44 = vpack.c.bf16 %v3571_v40, %v3570_v41  ;;  %v3077_v41 = vld [vmem:[#allocation12] ss:$0 sm:$0xff] }
 0x992   : > { %v4469_v31 = vpop.eup %3605 }
 0x993   : > { %3268 = vmatmul.mubr.msk.f32.vlgmr.msra.gmra.mrb[10].mxu0 %vm1922_vm7, %v4469_v31  ;;  %v1929_v12 = vsel %vm1922_vm7, %v4469_v31, 0.0  ;;  %v2552_v31 = vld [vmem:[#allocation11 + $0x8] sm:$0xff] }
 0x994   : > { %3394 = vmatpush3.bf16.msk.msra.mxu0 %vm4462_vm10, %v3392_v32  ;;  %3281 = vmatprep.mubr.msk.f32.mxu0 %vm3884_vm0, %v3885_v1  ;;  %v3412_v32 = vpack.c.bf16 %v2552_v31, %v2551_v30 }
 0x995   : > { %3395 = vmatprep.subr.bf16.mxu0 %v3883_v0 }
 0x9f6   : > { %v2100_v33 = vpop.xlane.xlu1 %2099 }
 0x9f7   : > { %v2101_v34 = vsub.f32 %v2094_v17, %v2100_v33  ;;  %v2553_v33 = vld [vmem:[#allocation11 + $0x10] sm:$0xff] }
 0x9f9   : > { %v2102_v35 = vmul.f32 1.442695, %v2101_v34  ;;  %v2554_v34 = vld [vmem:[#allocation11 + $0x18] sm:$0xff] }
 0x9fa   : > { %v2195_v36 = vpop.permute.xlu1 %2194 }
 0x9fb   : > { %3607 = vpow2.f32 %v2102_v35  ;;  %v3415_v35 = vpack.c.bf16 %v2554_v34, %v2553_v33 }
 0x9fe   : > { %v3574_v8 = vpop.permute.xlu1 %3573 }
 0x9ff   : > { %v3576_v38 = vunpack.i.h.bf16 %v3574_v8  ;;  %v3575_v39 = vunpack.i.l.bf16 %v3574_v8 }
 0xa01   : > { %v3400_v42 = vpack.c.bf16 %v3576_v38, %v3575_v39 }
 0xa02   : > { %v3579_v60 = vpop.permute.xlu1 %3578 }
 0xa03   : > { %3402 = vmatpush3.bf16.msk.msra.mxu1 %vm4462_vm10, %v3400_v42  ;;  %v3581_v61 = vunpack.i.h.bf16 %v3579_v60  ;;  %v3580_v62 = vunpack.i.l.bf16 %v3579_v60 }
 0xa04   : > { %3403 = vmatprep.subr.bf16.mxu1 %v3883_v0 }
 0xa05   : > { %v3608_v43 = vpop.eup %3607  ;;  %v3404_v4 = vpack.c.bf16 %v3581_v61, %v3580_v62  ;;  %v2753_v61 = vld [vmem:[%s4658_s14 + $0x18] sm:$0xff] }
 0xa06   : > { %3282 = vmatmul.mubr.msk.f32.vlgmr.msra.gmra.mrb[12].mxu0 %vm1922_vm7, %v3608_v43  ;;  %v2104_v63 = vsel %vm1922_vm7, %v3608_v43, 0.0 }
 0xa07   : > { %3398 = vmatpush3.bf16.xpose.msk.msra.mxu0 %vm4427_vm6, %v3396_v44  ;;  %3288 = vmatprep.mubr.msk.f32.mxu0 %vm3884_vm0, %v3885_v1 }
 0xa08   : > { %3407 = vmatprep.subr.bf16.mxu0 %v3883_v0 }
 0xa0e   : > { %3289 = vmatmul.mubr.msk.f32.vlgmr.msra.gmra.mrb[14].mxu0 %vm875_vm2, %v2195_v36 }
 0xa0f   : > { %3309 = vmatprep.mubr.msk.f32.mxu0 %vm3884_vm0, %v3885_v1 }
 0xa66   : > { %v4490_v45 = vpop.f32.mrb[10].mxu0 }
 0xa67   : > { %v3269_v46 = vpop.f32.mrb[11].mxu0 }
 0xad9   : > { %v2183_v47 = vpop.f32.mrb[12].mxu0 }
 0xada   : > { %v3283_v48 = vpop.f32.mrb[13].mxu0 }
 0xae1   : > { %v2272_v49 = vpop.f32.mrb[14].mxu0 }
 0xae2   : > { %v3290_v50 = vpop.f32.mrb[15].mxu0  ;;  %v2276_v51 = vsel %vm1922_vm7, %v2272_v49, -inf }
 0xae3   : > { %2277 = vmax.xlane.f32.xlu0 %v2276_v51 }
 0xaf9   : > { %3583 = vrot.lane.b32.xlu0 %v4431_v2, %s4748_s24  ;;  %v2373_v2 = vpop.permute.xlu1 %2372  ;;  %s4753_s24 = sld [smem:[#allocation35_spill]] }
 0xb70   : > { %v2278_v52 = vpop.xlane.xlu0 %2277 }
 0xb71   : > { %v2279_v53 = vsub.f32 %v2272_v49, %v2278_v52  ;;  %v2666_v52 = vld [vmem:[%s4656_s12 + $0x8] sm:$0xff] }
 0xb73   : > { %v2280_v54 = vmul.f32 1.442695, %v2279_v53 }
 0xb74   : > { %v3584_v55 = vpop.permute.xlu0 %3583 }
 0xb75   : > { %3609 = vpow2.f32 %v2280_v54  ;;  %v3586_v56 = vunpack.i.h.bf16 %v3584_v55  ;;  %v3585_v58 = vunpack.i.l.bf16 %v3584_v55  ;;  %v2668_v54 = vld [vmem:[%s4656_s12 + $0x18] sm:$0xff] }
 0xb77   : > { %v3408_v59 = vpack.c.bf16 %v3586_v56, %v3585_v58  ;;  %v2750_v56 = vld [vmem:[%s4658_s14] sm:$0xff]  ;;  %v2751_v58 = vld [vmem:[%s4658_s14 + $0x8] sm:$0xff] }
 0xb78   : > { %v3424_v60 = vpack.c.bf16 %v2751_v58, %v2750_v56 }
 0xb79   : > { %3410 = vmatpush3.bf16.msk.msra.mxu0 %vm4462_vm10, %v3408_v59  ;;  %v2752_v59 = vld [vmem:[%s4658_s14 + $0x10] sm:$0xff] }
 0xb7a   : > { %3411 = vmatprep.subr.bf16.mxu0 %v3883_v0  ;;  %v3427_v62 = vpack.c.bf16 %v2753_v61, %v2752_v59 }
 0xb7f   : > { %v3610_v3 = vpop.eup %3609 }
 0xb80   : > { %3296 = vmatmul.mubr.msk.f32.vlgmr.msra.gmra.mrb[18].mxu1 %vm1922_vm7, %v3610_v3  ;;  %v2282_v11 = vsel %vm1922_vm7, %v3610_v3, 0.0  ;;  %v2754_v3 = vld [vmem:[%s4658_s14 + $0x20] sm:$0xff] }
 0xb81   : > { %3406 = vmatpush3.bf16.xpose.msk.msra.mxu1 %vm4427_vm6, %v3404_v4  ;;  %3302 = vmatprep.mubr.msk.f32.mxu1 %vm3884_vm0, %v3885_v1  ;;  %v2755_v4 = vld [vmem:[%s4658_s14 + $0x28] sm:$0xff] }
 0xb82   : > { %3417 = vmatprep.subr.bf16.mxu1 %v3883_v0 }
 0xb88   : > { %3303 = vmatmul.mubr.msk.f32.vlgmr.msra.gmra.mrb[20].mxu1 %vm875_vm2, %v2373_v2  ;;  %v3430_v2 = vpack.c.bf16 %v2755_v4, %v2754_v3 }
 0xb89   : > { %3331 = vmatprep.mubr.msk.f32.mxu1 %vm3884_vm0, %v3885_v1 }
 0xc53   : > { %v2361_v5 = vpop.f32.mrb[18].mxu1 }
 0xc54   : > { %v3297_v6 = vpop.f32.mrb[19].mxu1 }
 0xc5b   : > { %v2450_v7 = vpop.f32.mrb[20].mxu1 }
 0xc5c   : > { %v3304_v9 = vpop.f32.mrb[21].mxu1  ;;  %v2454_v10 = vsel %vm1922_vm7, %v2450_v7, -inf }
 0xc5d   : > { %2455 = vmax.xlane.f32.xlu1 %v2454_v10  ;;  %v3079_v10 = vld [vmem:[%s4752_s6] ss:$0 sm:$0xff]  ;;  %s4754_s6 = sld [smem:[#allocation32_spill]] }
 0xc61   : > { %2105 = vadd.xlane.f32.xlu1 %v2104_v63 }
 0xc65   : > { %2283 = vadd.xlane.f32.xlu1 %v2282_v11  ;;  %v3080_v11 = vld [vmem:[%s4753_s24] ss:$0 sm:$0xff]  ;;  %s4755_s24 = sld [smem:[#allocation33_spill]] }
 0xc69   : > { %1930 = vadd.xlane.f32.xlu1 %v1929_v12 }
 0xcea   : > { %v2456_v13 = vpop.xlane.xlu1 %2455 }
 0xceb   : > { %v2457_v14 = vsub.f32 %v2450_v7, %v2456_v13 }
 0xced   : > { %v2458_v15 = vmul.f32 1.442695, %v2457_v14  ;;  %v2757_v14 = vld [vmem:[%s4658_s14 + $0x38] sm:$0xff] }
 0xcee   : > { %v2106_v16 = vpop.xlane.xlu1 %2105 }
 0xcef   : > { %3611 = vpow2.f32 %v2458_v15 }
 0xcf0   : > { %3613 = vrcp.f32 %v2106_v16  ;;  %v3081_v16 = vld [vmem:[%s4754_s6] ss:$0 sm:$0xff]  ;;  %s3088_s6 = sshll.u32 %s4038_s23, 7  ;;  %s3901_s23 = smov [#allocation14]  }
 0xcf1   : > { %s4599_s11 = scalar_lea.hbm %s4759_s10, %s3088_s6 }
 0xcf2   : > { %v2284_v17 = vpop.xlane.xlu1 %2283 }
 0xcf3   : > { %3615 = vrcp.f32 %v2284_v17 }
 0xcf6   : > { %v1931_v18 = vpop.xlane.xlu1 %1930 }
 0xcf7   : > { %3617 = vrcp.f32 %v1931_v18 }
 0xcf9   : > { %v3612_v19 = vpop.eup %3611 }
 0xcfa   : > { %v3614_v20 = vpop.eup %3613  ;;  %3310 = vmatmul.mubr.msk.f32.vlgmr.msra.gmra.mrb[16].mxu0 %vm1922_vm7, %v3612_v19  ;;  %v2460_v21 = vsel %vm1922_vm7, %v3612_v19, 0.0 }
 0xcfb   : > { %2461 = vadd.xlane.f32.xlu0 %v2460_v21  ;;  %v2188_v22 = vmul.f32 %v3614_v20, %v2183_v47  ;;  %3320 = vmatprep.mubr.msk.f32.mxu0 %vm3884_vm0, %v3885_v1  ;;  %v3083_v21 = vld [vmem:[%s4755_s24] ss:$0 sm:$0xff]  ;;  %s2884_s24 = sshll.u32 %s778_s27, 4  ;;  %s4601_s24 = int_to_ptr.vmem [resolvable:$true] %s2884_s24 }
 0xcfc   : > { %3413 = vmatpush3.bf16.msra.mxu0 %v3412_v32 }
 0xcfd   : > { %v3616_v23 = vpop.eup %3615  ;;  %2190 = vrot.lane.b32.xlu1 %v2188_v22, %s4749_s1  ;;  %3414 = vmatprep.subr.bf16.mxu0 %v3883_v0  ;;  %s2871_s1 = scalar_lea.sflag [#allocation5], %s4251_s9 }
 0xcfe   : > { %v2366_v24 = vmul.f32 %v3616_v23, %v2361_v5 }
 0xd00   : > { %3416 = vmatpush3.bf16.msra.mxu0 %v3415_v35 }
 0xd01   : > { %v3618_v25 = vpop.eup %3617  ;;  %2368 = vrot.lane.b32.xlu1 %v2366_v24, %s4750_s0  ;;  %3423 = vmatprep.subr.bf16.mxu0 %v3883_v0  ;;  %s3795_s0 = scalar_lea.vmem %s4601_s24, 128 }
 0xd02   : > { %v2014_v26 = vmul.f32 %v3618_v25, %v4490_v45  ;;  %p3796_p10 = scmp.ne.s32.totalorder %s4601_s24, %s3795_s0 }
 0xd04   : > { %2015 = vst.msk [vmem:[#allocation2] sm:$0xff] %vm875_vm2, %v2014_v26  ;;  %p3797_p1 = pnand %p3796_p10, %p4760_p4 }
 0xd06   : > { %p3798_p13 = pneg %p3797_p1 }
 0xd6f   : > { %v2191_v27 = vpop.permute.xlu1 %2190 }
 0xd70   : > { %2193 = vst.msk [vmem:[#allocation2] sm:$0xff] %vm1207_vm3, %v2191_v27 }
 0xd73   : > { %v2369_v28 = vpop.permute.xlu1 %2368 }
 0xd74   : > { %2371 = vst.msk [vmem:[#allocation2] sm:$0xff] %vm1378_vm4, %v2369_v28 }
 0xd88   : > { %v2462_v29 = vpop.xlane.xlu0 %2461 }
 0xd89   : > { %3619 = vrcp.f32 %v2462_v29 }
 0xd93   : > { %v3620_v36 = vpop.eup %3619 }
 0xdcd   : > { %v2539_v37 = vpop.f32.mrb[16].mxu0 }
 0xdce   : > { %v2544_v8 = vmul.f32 %v3620_v36, %v2539_v37  ;;  %v3311_v38 = vpop.f32.mrb[17].mxu0 }
 0xdd0   : > { %2546 = vrot.lane.b32.xlu1 %v2544_v8, %s4751_s22  ;;  %s4756_s22 = sld [smem:[#allocation36_spill]]  ;;  %v3086_v8 = vld [vmem:[%s4757_s19] ss:$0 sm:$0xff] }
 0xdd6   : > { %v3085_v36 = vld [vmem:[%s4756_s22] ss:$0 sm:$0xff]  ;;  %s3799_s22 = sshll.u32 %s3901_s23, 4  ;;  %s3800_s22 = int_to_ptr.vmem [resolvable:$false] %s3799_s22 }
 0xdd7   : > { %s3801_s13 = scalar_lea.vmem %s3800_s22, 256  ;;  %p3802_p0 = scmp.lt.s32.totalorder %s4601_s24, %s3800_s22 }
 0xdd8   : > { %p3803_p2 = scmp.lt.s32.totalorder %s3801_s13, %s3795_s0 }
 0xdda   : > { %p3804_p3 = por %p3803_p2, %p3802_p0 }
 0xddc   : > { %p3805_p6 = pnand %p3804_p3, %p3798_p13 }
 0xe42   : > { %v2547_v39 = vpop.permute.xlu1 %2546 }
 0xe43   : > { %2549 = vst.msk [vmem:[#allocation2] sm:$0xff] %vm1549_vm5, %v2547_v39 }
 0xe4a   : > { %v2550_v40 = vld [vmem:[#allocation2] sm:$0xff] }
 0xe4b   : > { %3321 = vmatmul.mubr.msk.f32.vlgmr.msra.gmra.mrb[18].mxu0 %vm798_vm1, %v2550_v40 }
 0xe4c   : > { %3350 = vmatprep.mubr.msk.f32.mxu0 %vm3884_vm0, %v3885_v1  ;;  %v2665_v1 = vld [vmem:[%s4656_s12] sm:$0xff]  ;;  %3425 = vmatpush3.bf16.msra.mxu0 %v3424_v60 }
 0xe4d   : > { %v3418_v53 = vpack.c.bf16 %v2666_v52, %v2665_v1  ;;  %3426 = vmatprep.subr.bf16.mxu0 %v3883_v0 }
 0xe4f   : > { %3419 = vmatpush3.bf16.msra.mxu1 %v3418_v53 }
 0xe50   : > { %3420 = vmatprep.subr.bf16.mxu1 %v3883_v0  ;;  %3428 = vmatpush3.bf16.msra.mxu0 %v3427_v62 }
 0xe51   : > { %3429 = vmatprep.subr.bf16.mxu0 %v3883_v0 }
 0xe54   : > { %3431 = vmatpush3.bf16.msra.mxu0 %v3430_v2 }
 0xe55   : > { %3432 = vmatprep.subr.bf16.mxu0 %v3883_v0  ;;  %v2756_v0 = vld [vmem:[%s4658_s14 + $0x30] sm:$0xff] }
 0xe56   : > { %v3433_v15 = vpack.c.bf16 %v2757_v14, %v2756_v0 }
 0xe58   : > { %3434 = vmatpush3.bf16.msra.mxu0 %v3433_v15 }
 0xf1e   : > { %v2631_v42 = vpop.f32.mrb[18].mxu0 }
 0xf1f   : > { %v2632_v43 = vadd.f32 %v3077_v41, %v2631_v42  ;;  %v3322_v44 = vpop.f32.mrb[19].mxu0 }
 0xf21   : > { %v2635_v45 = vadd.f32 %v2632_v43, %v4419_v57  ;;  %v2667_v57 = vld [vmem:[%s4656_s12 + $0x10] sm:$0xff] }
 0xf22   : > { %v3421_v55 = vpack.c.bf16 %v2668_v54, %v2667_v57 }
 0xf23   : > { %v2638_v46 = vsel %vm798_vm1, %v2635_v45, 0.0 }
 0xf24   : > { %2639 = vadd.xlane.f32.xlu0 %v2638_v46  ;;  %3422 = vmatpush3.bf16.msra.mxu1 %v3421_v55 }
 0xfb1   : > { %v2640_v47 = vpop.xlane.xlu0 %2639 }
 0xfb2   : > { %v2641_v48 = vmul.f32 0.03125, %v2640_v47 }
 0xfb4   : > { %v2642_v49 = vsub.f32 %v2635_v45, %v2641_v48 }
 0xfb6   : > { %v2643_v50 = vmul.f32 %v2642_v49, %v2642_v49 }
 0xfb8   : > { %v2644_v51 = vsel %vm798_vm1, %v2643_v50, 0.0 }
 0xfb9   : > { %2645 = vadd.xlane.f32.xlu1 %v2644_v51 }
0x1046   : > { %v2646_v5 = vpop.xlane.xlu1 %2645 }
0x1047   : > { %v2647_v6 = vmul.f32 0.03125, %v2646_v5 }
0x1049   : > { %v2648_v7 = vadd.f32 1e-05, %v2647_v6 }
0x104b   : > { %3621 = vrsqrt.f32 %v2648_v7 }
0x1055   : > { %v3622_v9 = vpop.eup %3621 }
0x1056   : > { %v2650_v63 = vmul.f32 %v3622_v9, %v2642_v49 }
0x1058   : > { %v2657_v12 = vmul.f32 %v3079_v10, %v2650_v63 }
0x105a   : > { %v2664_v13 = vadd.f32 %v3080_v11, %v2657_v12 }
0x105c   : > { %3332 = vmatmul.mubr.msk.f32.vlgmr.msra.gmra.mrb[22].mxu1 %vm798_vm1, %v2664_v13 }
0x112f   : > { %v2745_v17 = vpop.f32.mrb[22].mxu1 }
0x1130   : > { %v2746_v18 = vadd.f32 %v3081_v16, %v2745_v17  ;;  %v3333_v19 = vpop.f32.mrb[23].mxu1 }
0x1132   : > { %v2749_v20 = vmax.f32 %v2746_v18, 0.0 }
0x1134   : > { %3351 = vmatmul.mubr.msk.f32.vlgmr.msra.gmra.mrb[20].mxu0 %vm2765_vm11, %v2749_v20 }
0x1207   : > { %v2835_v22 = vpop.f32.mrb[20].mxu0 }
0x1208   : > { %v2836_v23 = vadd.f32 %v3083_v21, %v2835_v22  ;;  %v3352_v24 = vpop.f32.mrb[21].mxu0 }
0x120a   : > { %v2839_v25 = vadd.f32 %v2836_v23, %v2664_v13 }
0x120c   : > { %v2842_v26 = vsel %vm798_vm1, %v2839_v25, 0.0 }
0x120d   : > { %2843 = vadd.xlane.f32.xlu0 %v2842_v26 }
0x129a   : > { %v2844_v27 = vpop.xlane.xlu0 %2843 }
0x129b   : > { %v2845_v28 = vmul.f32 0.03125, %v2844_v27 }
0x129d   : > { %v2846_v29 = vsub.f32 %v2839_v25, %v2845_v28 }
0x129f   : > { %v2847_v30 = vmul.f32 %v2846_v29, %v2846_v29 }
0x12a1   : > { %v2848_v31 = vsel %vm798_vm1, %v2847_v30, 0.0 }
0x12a2   : > { %2849 = vadd.xlane.f32.xlu0 %v2848_v31 }
0x132f   : > { %v2850_v32 = vpop.xlane.xlu0 %2849 }
0x1330   : > { %v2851_v33 = vmul.f32 0.03125, %v2850_v32 }
0x1332   : > { %v2852_v34 = vadd.f32 1e-05, %v2851_v33 }
0x1334   : > { %3623 = vrsqrt.f32 %v2852_v34 }
0x133e   : > { %v3624_v35 = vpop.eup %3623 }
0x133f   : > { %v2854_v37 = vmul.f32 %v3624_v35, %v2846_v29 }
0x1341   : > { %v2861_v38 = vmul.f32 %v3085_v36, %v2854_v37 }
0x1343   : > { %v2868_v39 = vadd.f32 %v3086_v8, %v2861_v38 }
0x1345   : > { %2869 = vst.msk [vmem:[%s778_s27] sm:$0xff] %vm798_vm1, %v2868_v39 }
0x1346   : > { %3808 = shalt.err (!%p3805_p6)
}
0x1347   : > { %s3809_s8 = scalar_lea.hbm %s4599_s11, 128  ;;  %s3813_s2 = scalar_lea.hbm %s4759_s10, 256 }
0x1348   : > { %p3810_p11 = scmp.ne.s32.totalorder %s4599_s11, %s3809_s8  ;;  %p3814_p5 = scmp.lt.u32.totalorder %s4599_s11, %s4759_s10 }
0x1349   : > { %p3815_p9 = scmp.lt.u32.totalorder %s3813_s2, %s3809_s8  ;;  %p3817_p10 = scmp.lt.u32.totalorder %s3809_s8, %s4599_s11 }
0x134a   : > { %p3811_p12 = pnand %p3810_p11, %p4760_p4 }
0x134b   : > { %p3816_p7 = por %p3815_p9, %p3814_p5 }
0x134c   : > { %p3812_p8 = pneg %p3811_p12 }
0x134d   : > { %p3818_p1 = por %p3817_p10, %p3816_p7 }
0x134f   : > { %p3819_p13 = pnand %p3818_p1, %p3812_p8 }
0x1351   : > { %3822 = shalt.err (!%p3819_p13)
}
0x1352   : > { %3457 = dma.vmem_to_hbm [thread:$0]  (%p4760_p4), %s4601_s24, 128, %s4599_s11, %s2871_s1  }
0x1353 PF: > { %s2896_s7 = sand.u32 1, %s3861_s3   ;;  %p4761_p0 = scmp.ne.s32.totalorder %s4722_s15, 0 }
0x1354   : > { %p4762_p2 = scmp.ge.s32.totalorder %s3873_s30, 2  ;;  %s2897_s27 = scalar_lea.sflag [#allocation5], %s2896_s7 }
0x1356   : > { %p3480_p3 = pnand %p4762_p2, %p4761_p0 }
0x1358   : > { %3856 = dma.done.wait (!%p3480_p3), %s2897_s27, 128  }
0x1359   : > { %3858 = vsyncadd (!%p3480_p3), %s2897_s27, 4294967168  ;;  %p38_p6 = scmp.ge.s32.totalorder %s4181_s26, 4   ;;  %s4763_s3 = smov %s3865_s28 }
0x135a   : > { %s4764_s28 = smov %s3869_s29  ;;  %s4765_s29 = smov %s4193_s20 }
0x135b   : > { %s4766_s30 = smov %s4181_s26  ;;  %40 = sbr.rel (!%p38_p6) target bundleno = 28 (0x1c), region = 176 }
0x1362   :  { %2902 = vsyncpa [#allocation4], 1 }
0x1363   :  { %2904 = vsyncpa [#allocation4 + $0x1], 1 }
0x1364   :  { %2905 = vsyncpa [#allocation7], 1 }
0x1365   :  { %2906 = vsyncpa [#allocation10], 1 }
0x1366   :  { %2907 = vsyncpa [#allocation13], 1 }
0x1367   :  { %2908 = vsyncpa [#allocation5], 1 }
0x1368   :  { %2910 = vsyncpa [#allocation5 + $0x1], 1 }

</bundles_post_ra>
